<compile_context>
chip_gen: v6e
topology: v6e:2x2x1
jax: 0.10.0
libtpu: 0.0.40
codegen_flags: <defaults>
</compile_context>

<pallas_src>
import math
import functools

import jax
import jax.numpy as jnp
from jax import lax
from jax.experimental import pallas as pl
from jax.experimental.pallas import tpu as pltpu


def _contact(a_hat, m_scaled, assume_symmetric_u):
    # assume_symmetric_u: m_scaled == m,     a = a^2 * m                 (exact iff u symmetric)
    # general:            m_scaled == m/2,   a = (a^2 + a^2.T) * (m/2)   (== reference)
    a_sq = a_hat * a_hat
    if assume_symmetric_u:
        return a_sq * m_scaled
    return (a_sq + jnp.transpose(a_sq)) * m_scaled


def _lag_pp_zero_kernel(u_hbm, x_ref, xt_ref, out_ref,
                        m_ref, nsu_ref, ahat_ref, lmbd_ref, rs_ref, sched_ref, dma_sem, *,
                        steps, k, s, rho, alpha0, beta0, lr_decay,
                        assume_symmetric_u):
    L = m_ref.shape[0]
    b = pl.program_id(0)
    t = pl.program_id(1)

    # ------------- one-time (per batch element) setup, first step only -------------
    @pl.when(t == 0)
    def _init():
        # u lives in HBM (pl.ANY); pull this batch element's (L,L) slab into the nsu scratch,
        # overlapping the DMA with the constraint-matrix build (which only needs x).
        u_copy = pltpu.make_async_copy(u_hbm.at[b], nsu_ref, dma_sem)
        u_copy.start()

        xv = x_ref[0]        # (L, 4)  column forms
        xtv = xt_ref[0]      # (4, L)  row forms
        a_col, u_col, c_col, g_col = (xv[:, 0:1], xv[:, 1:2], xv[:, 2:3], xv[:, 3:4])
        a_row, u_row, c_row, g_row = (xtv[0:1, :], xtv[1:2, :], xtv[2:3, :], xtv[3:4, :])

        # constraint_matrix_batch: A-U, C-G, U-G pairings; band |i-j|<=3 zeroed.
        m = (a_col * u_row + u_col * a_row
             + c_col * g_row + g_col * c_row
             + u_col * g_row + g_col * u_row)
        row_i = lax.broadcasted_iota(jnp.int32, (L, L), 0)
        col_i = lax.broadcasted_iota(jnp.int32, (L, L), 1)
        band = jnp.abs(row_i - col_i) <= 3
        m = jnp.where(band, 0.0, m)
        if not assume_symmetric_u:
            m = m * 0.5    # fold the 1/2 of (a^2 + a^2.T)/2 into m (exact, power of two)
        m_ref[...] = m

        # learning-rate schedule scalars (SMEM), decayed by repeated multiplication (== reference)
        sched_ref[0] = jnp.float32(alpha0)
        sched_ref[1] = jnp.float32(beta0)

        u_copy.wait()
        u0 = nsu_ref[...]                              # raw u for this batch element
        # u2 = soft_sign(u - s, k) * u ; a_hat = sigmoid(u2) * soft_sign(u2 - s, k)
        u2 = jax.nn.sigmoid(k * (u0 - s)) * u0
        ahat_ref[...] = jax.nn.sigmoid(u2) * jax.nn.sigmoid(k * (u2 - s))
        # Loop invariant: -(u2 + u2.T)/2 is the only way u2 enters the step loop.
        nsu_ref[...] = (u2 + jnp.transpose(u2)) * (-0.5)

        a0 = _contact(ahat_ref[...], m, assume_symmetric_u)
        rs0 = jnp.sum(a0, axis=-1, keepdims=True)      # (L, 1)
        rs_ref[...] = rs0
        lmbd_ref[...] = jnp.maximum(rs0 - 1.0, 0.0)

    # ------------- per-step learning rates (carried SMEM scalars) -------------
    alpha_t = sched_ref[0]
    beta_t = sched_ref[1]
    alpha_dec = alpha_t * jnp.float32(lr_decay)        # alpha after in-step decay (threshold)
    sched_ref[0] = alpha_dec
    sched_ref[1] = beta_t * jnp.float32(lr_decay)
    # grad step scale: alpha with true m, or 2*alpha with the stored m/2 (exact rewrite)
    grad_scale = alpha_t if assume_symmetric_u else alpha_t * 2.0
    thresh = rho * alpha_dec

    # ------------- one unconstrained-optimization step -------------
    ms = m_ref[...]
    a_hat = ahat_ref[...]
    lmbd = lmbd_ref[...]                               # (L, 1)
    rs = rs_ref[...]                                   # (L, 1) = sum(a, -1) of current a

    w = lmbd * jax.nn.sigmoid(k * (rs - 1.0))          # (L, 1)
    # grad_a + grad_a.T  ==  -(u2+u2.T)/2 + w + w.T   (exact, no per-step (L,L) transpose)
    sym_grad = nsu_ref[...] + w + jnp.transpose(w)
    a_hat = a_hat - grad_scale * (a_hat * ms * sym_grad)
    a_hat = jnp.maximum(jnp.abs(a_hat) - thresh, 0.0)
    a_hat = jnp.minimum(a_hat, 1.0)                    # == clip(-1,1): a_hat >= 0 here
    ahat_ref[...] = a_hat

    a = _contact(a_hat, ms, assume_symmetric_u)
    out_ref[0, 0] = a.astype(out_ref.dtype)

    # lambda / row_sum carry for the next step -- dead on the last step, skip it there.
    @pl.when(t != steps - 1)
    def _carry():
        rs_new = jnp.sum(a, axis=-1, keepdims=True)
        rs_ref[...] = rs_new
        lmbd_ref[...] = lmbd + beta_t * jnp.maximum(rs_new - 1.0, 0.0)


def _vmem_cap_bytes():
    try:
        return int(pltpu.get_tpu_info().vmem_capacity_bytes)
    except Exception:
        return 64 * 1024 * 1024          # conservative: v7x per-core physical VMEM


def lag_pp_zero(u, x, *, steps, k, s=math.log(9.0), rho=1.0,
                alpha=0.01, beta=0.1, lr_decay=0.99,
                assume_symmetric_u=False, emit_last_only=False,
                out_dtype=jnp.float32):
    """Lag_PP_zero forward. Returns the list a_t_list[1:] (length `steps`), or a length-1
    list holding only the final map if emit_last_only=True (reduced HBM writeback)."""
    assert steps >= 1
    B, L, L2 = u.shape
    assert L == L2 and x.shape == (B, L, 4)

    u = u.astype(jnp.float32)
    x = x.astype(jnp.float32)

    # Pad L to a lane-dense multiple of 128 (exact: zero-padded x rows zero out m there).
    Lp = max(128, ((L + 127) // 128) * 128)
    if Lp != L:
        u = jnp.pad(u, ((0, 0), (0, Lp - L), (0, Lp - L)))
        x = jnp.pad(x, ((0, 0), (0, Lp - L), (0, 0)))
    xt = jnp.swapaxes(x, -1, -2)                       # (B, 4, Lp) row forms

    kern = functools.partial(
        _lag_pp_zero_kernel, steps=steps, k=float(k), s=float(s), rho=float(rho),
        alpha0=float(alpha), beta0=float(beta), lr_decay=float(lr_decay),
        assume_symmetric_u=assume_symmetric_u)

    n_emit = 1 if emit_last_only else steps
    out_itemsize = jnp.dtype(out_dtype).itemsize
    if emit_last_only:
        out_index = lambda bb, tt: (0, bb, 0, 0)       # block resident over t; one HBM writeback
    else:
        out_index = lambda bb, tt: (tt, bb, 0, 0)      # stream every step's map to HBM

    # VMEM budget: 3x (Lp,Lp) f32 scratch, double-buffered output block, init-time temporaries
    # (u2 and its transpose), small x/xt blocks, slack. Always request explicitly: v5e's default
    # scoped limit is 16 MiB; cap at 7/8 of physical (v7x: 56 MiB).
    vmem_est = (4 * 3 * Lp * Lp
                + 2 * out_itemsize * Lp * Lp
                + 4 * 2 * Lp * Lp
                + 1100 * Lp
                + (1 << 20))
    vmem_limit = int(min(max(vmem_est * 5 // 4, 32 * 1024 * 1024),
                         (_vmem_cap_bytes() * 7) // 8))

    cost = pl.CostEstimate(
        flops=int(B * Lp * Lp * (14 * steps + 24)),
        transcendentals=int(B * (3 * Lp * Lp + 2 * steps * Lp)),
        bytes_accessed=int(B * Lp * Lp * 4 + 2 * B * Lp * 4 * 4
                           + n_emit * B * Lp * Lp * out_itemsize),
    )

    out = pl.pallas_call(
        kern,
        out_shape=jax.ShapeDtypeStruct((n_emit, B, Lp, Lp), out_dtype),
        grid_spec=pltpu.PrefetchScalarGridSpec(
            num_scalar_prefetch=0,
            grid=(B, steps),
            in_specs=[
                pl.BlockSpec(memory_space=pl.ANY),                   # u stays in HBM; DMA at t==0
                pl.BlockSpec((1, Lp, 4), lambda bb, tt: (bb, 0, 0)),  # x columns
                pl.BlockSpec((1, 4, Lp), lambda bb, tt: (bb, 0, 0)),  # x rows
            ],
            out_specs=pl.BlockSpec((1, 1, Lp, Lp), out_index),
            scratch_shapes=[
                pltpu.VMEM((Lp, Lp), jnp.float32),   # m (scaled; invariant)
                pltpu.VMEM((Lp, Lp), jnp.float32),   # -(u2+u2.T)/2 (invariant; DMA landing pad)
                pltpu.VMEM((Lp, Lp), jnp.float32),   # a_hat   (carried)
                pltpu.VMEM((Lp, 1), jnp.float32),    # lambda  (carried)
                pltpu.VMEM((Lp, 1), jnp.float32),    # row_sum (carried)
                pltpu.SMEM((2,), jnp.float32),       # [alpha_t, beta_t] schedule (carried)
                pltpu.SemaphoreType.DMA,             # u HBM->VMEM copy completion
            ],
        ),
        compiler_params=pltpu.CompilerParams(
            dimension_semantics=("parallel", "arbitrary"),
            vmem_limit_bytes=vmem_limit),
        cost_estimate=cost,
    )(u, x, xt)

    if Lp != L:
        out = out[:, :, :L, :L]
    # PyTorch returns a_t_list[1:] as a python list of length `steps`.
    return [out[i] for i in range(n_emit)]


def lag_pp_zero_ref(u, x, *, steps, k, s=math.log(9.0), rho=1.0,
                    alpha=0.01, beta=0.1, lr_decay=0.99):
    """Pure-JAX reference (direct transcription of the PyTorch forward)."""
    base_a, base_u, base_c, base_g = (x[..., 0], x[..., 1], x[..., 2], x[..., 3])

    def sym_outer(p, q):
        pq = p[:, :, None] * q[:, None, :]
        return pq + jnp.swapaxes(pq, -1, -2)

    m = sym_outer(base_a, base_u) + sym_outer(base_c, base_g) + sym_outer(base_u, base_g)
    L = u.shape[-1]
    idx = jnp.arange(L)
    band = jnp.abs(idx[:, None] - idx[None, :]) <= 3
    m = jnp.where(band[None], 0.0, m)

    u2 = jax.nn.sigmoid(k * (u - s)) * u
    a_hat = jax.nn.sigmoid(u2) * jax.nn.sigmoid(k * (u2 - s))

    def contact(ah):
        a = ah * ah
        a = (a + jnp.swapaxes(a, -1, -2)) / 2
        return a * m

    a = contact(a_hat)
    lmbd = jnp.maximum(jnp.sum(a, -1) - 1.0, 0.0)
    outs = []
    for _ in range(steps):
        grad_a = -u2 / 2 + (lmbd * jax.nn.sigmoid(k * (jnp.sum(a, -1) - 1.0)))[..., None]
        grad = a_hat * m * (grad_a + jnp.swapaxes(grad_a, -1, -2))
        a_hat = a_hat - alpha * grad
        alpha = alpha * lr_decay
        a_hat = jnp.maximum(jnp.abs(a_hat) - rho * alpha, 0.0)
        a_hat = jnp.clip(a_hat, -1.0, 1.0)
        a = contact(a_hat)
        lmbd = lmbd + beta * jnp.maximum(jnp.sum(a, -1) - 1.0, 0.0)
        beta = beta * lr_decay
        outs.append(a)
    return outs


if __name__ == "__main__":
    key = jax.random.PRNGKey(0)
    k1, k2, k3, k4 = jax.random.split(key, 4)

    # --- check 1: lane-aligned L, symmetric u, symmetric fast path (typical E2Efold usage) ---
    B, L, steps, k = 2, 128, 4, 1.0
    u1 = jax.random.normal(k1, (B, L, L), dtype=jnp.float32) * 3.0
    u1 = (u1 + jnp.swapaxes(u1, -1, -2)) / 2.0
    x1 = jax.nn.softmax(jax.random.normal(k2, (B, L, 4), dtype=jnp.float32), axis=-1)

    outs = lag_pp_zero(u1, x1, steps=steps, k=k, assume_symmetric_u=True)
    outs = [jax.block_until_ready(o) for o in outs]
    refs = lag_pp_zero_ref(u1, x1, steps=steps, k=k)
    for o, r in zip(outs, refs):
        assert o.shape == (B, L, L)
        assert jnp.allclose(o, r, atol=5e-5, rtol=5e-5), "mismatch vs JAX reference (test 1)"

    # --- check 2: ragged L (padded to 128 inside the wrapper), general (asymmetric) u ---
    B2, L2, steps2 = 1, 100, 2
    u2 = jax.random.normal(k3, (B2, L2, L2), dtype=jnp.float32) * 3.0
    x2 = jax.nn.softmax(jax.random.normal(k4, (B2, L2, 4), dtype=jnp.float32), axis=-1)

    outs2 = lag_pp_zero(u2, x2, steps=steps2, k=k)
    outs2 = [jax.block_until_ready(o) for o in outs2]
    refs2 = lag_pp_zero_ref(u2, x2, steps=steps2, k=k)
    for o, r in zip(outs2, refs2):
        assert o.shape == (B2, L2, L2)
        assert jnp.allclose(o, r, atol=5e-5, rtol=5e-5), "mismatch vs JAX reference (test 2)"

    # --- check 3: reduced-writeback mode (only the final map is emitted) ---
    outs3 = lag_pp_zero(u1, x1, steps=steps, k=k, assume_symmetric_u=True, emit_last_only=True)
    out_last = jax.block_until_ready(outs3[0])
    assert out_last.shape == (B, L, L)
    assert jnp.allclose(out_last, refs[-1], atol=5e-5, rtol=5e-5), "mismatch (test 3, last-only)"

    print("KERNEL_OK")
</pallas_src>

<mosaic_0001>
module attributes {stable_mosaic.version = 11 : i64} {
  func.func @_lag_pp_zero_kernel(%arg0: i32, %arg1: i32, %arg2: memref<2x128x128xf32, #tpu.memory_space<any>>, %arg3: memref<1x128x4xf32, #tpu.memory_space<vmem>>, %arg4: memref<1x4x128xf32, #tpu.memory_space<vmem>>, %arg5: memref<1x1x128x128xf32, #tpu.memory_space<vmem>>, %arg6: memref<128x128xf32, #tpu.memory_space<vmem>>, %arg7: memref<128x128xf32, #tpu.memory_space<vmem>>, %arg8: memref<128x128xf32, #tpu.memory_space<vmem>>, %arg9: memref<128x1xf32, #tpu.memory_space<vmem>>, %arg10: memref<128x1xf32, #tpu.memory_space<vmem>>, %arg11: memref<2xf32, #tpu.memory_space<smem>>, %arg12: memref<!tpu.dma_semaphore, #tpu.memory_space<semaphore_mem>>) attributes {dimension_semantics = [#tpu.dimension_semantics<parallel>, #tpu.dimension_semantics<arbitrary>], iteration_bounds = array<i64: 2, 4>, scalar_prefetch = 0 : i64, scratch_operands = 7 : i64, tpu.core_type = #tpu.core_type<tc>, window_params = [{}, {transform_indices = @transform_1, window_bounds = array<i64: 1, 128, 4>}, {transform_indices = @transform_2, window_bounds = array<i64: 1, 4, 128>}, {transform_indices = @transform_3, window_bounds = array<i64: 1, 1, 128, 128>}]} {
    %c0_i32 = arith.constant 0 : i32
    %0 = arith.cmpi eq, %arg1, %c0_i32 : i32
    %1 = arith.extui %0 : i1 to i32
    %c0_i32_0 = arith.constant 0 : i32
    %2 = arith.cmpi ne, %1, %c0_i32_0 : i32
    scf.if %2 {
      %c0_i32_27 = arith.constant 0 : i32
      %c0_i32_28 = arith.constant 0 : i32
      %51 = tpu.memref_slice %arg2[%arg0, %c0_i32_27, %c0_i32_28] : memref<2x128x128xf32, #tpu.memory_space<any>> -> memref<1x128x128xf32, #tpu.memory_space<any>>
      %52 = tpu.memref_squeeze %51 : memref<1x128x128xf32, #tpu.memory_space<any>> -> memref<128x128xf32, #tpu.memory_space<any>>
      tpu.enqueue_dma source(%52 : memref<128x128xf32, #tpu.memory_space<any>>) target(%arg7 : memref<128x128xf32, #tpu.memory_space<vmem>>) target_semaphore(%arg12 : memref<!tpu.dma_semaphore, #tpu.memory_space<semaphore_mem>>)
      %c0_29 = arith.constant 0 : index
      %c0_30 = arith.constant 0 : index
      %c0_31 = arith.constant 0 : index
      %53 = vector.load %arg3[%c0_29, %c0_30, %c0_31] : memref<1x128x4xf32, #tpu.memory_space<vmem>>, vector<1x128x4xf32>
      %54 = vector.shape_cast %53 : vector<1x128x4xf32> to vector<128x4xf32>
      %c0_32 = arith.constant 0 : index
      %c0_33 = arith.constant 0 : index
      %c0_34 = arith.constant 0 : index
      %55 = vector.load %arg4[%c0_32, %c0_33, %c0_34] : memref<1x4x128xf32, #tpu.memory_space<vmem>>, vector<1x4x128xf32>
      %56 = vector.shape_cast %55 : vector<1x4x128xf32> to vector<4x128xf32>
      %57 = vector.extract_strided_slice %54 {offsets = [0, 0], sizes = [128, 1], strides = [1, 1]} : vector<128x4xf32> to vector<128x1xf32>
      %58 = vector.extract_strided_slice %54 {offsets = [0, 1], sizes = [128, 1], strides = [1, 1]} : vector<128x4xf32> to vector<128x1xf32>
      %59 = vector.extract_strided_slice %54 {offsets = [0, 2], sizes = [128, 1], strides = [1, 1]} : vector<128x4xf32> to vector<128x1xf32>
      %60 = vector.extract_strided_slice %54 {offsets = [0, 3], sizes = [128, 1], strides = [1, 1]} : vector<128x4xf32> to vector<128x1xf32>
      %61 = vector.extract_strided_slice %56 {offsets = [0, 0], sizes = [1, 128], strides = [1, 1]} : vector<4x128xf32> to vector<1x128xf32>
      %62 = vector.extract_strided_slice %56 {offsets = [1, 0], sizes = [1, 128], strides = [1, 1]} : vector<4x128xf32> to vector<1x128xf32>
      %63 = vector.extract_strided_slice %56 {offsets = [2, 0], sizes = [1, 128], strides = [1, 1]} : vector<4x128xf32> to vector<1x128xf32>
      %64 = vector.extract_strided_slice %56 {offsets = [3, 0], sizes = [1, 128], strides = [1, 1]} : vector<4x128xf32> to vector<1x128xf32>
      %65 = vector.broadcast %57 : vector<128x1xf32> to vector<128x128xf32>
      %66 = vector.broadcast %62 : vector<1x128xf32> to vector<128x128xf32>
      %67 = arith.mulf %65, %66 : vector<128x128xf32>
      %68 = vector.broadcast %58 : vector<128x1xf32> to vector<128x128xf32>
      %69 = vector.broadcast %61 : vector<1x128xf32> to vector<128x128xf32>
      %70 = arith.mulf %68, %69 : vector<128x128xf32>
      %71 = arith.addf %67, %70 : vector<128x128xf32>
      %72 = vector.broadcast %59 : vector<128x1xf32> to vector<128x128xf32>
      %73 = vector.broadcast %64 : vector<1x128xf32> to vector<128x128xf32>
      %74 = arith.mulf %72, %73 : vector<128x128xf32>
      %75 = arith.addf %71, %74 : vector<128x128xf32>
      %76 = vector.broadcast %60 : vector<128x1xf32> to vector<128x128xf32>
      %77 = vector.broadcast %63 : vector<1x128xf32> to vector<128x128xf32>
      %78 = arith.mulf %76, %77 : vector<128x128xf32>
      %79 = arith.addf %75, %78 : vector<128x128xf32>
      %80 = vector.broadcast %58 : vector<128x1xf32> to vector<128x128xf32>
      %81 = vector.broadcast %64 : vector<1x128xf32> to vector<128x128xf32>
      %82 = arith.mulf %80, %81 : vector<128x128xf32>
      %83 = arith.addf %79, %82 : vector<128x128xf32>
      %84 = vector.broadcast %60 : vector<128x1xf32> to vector<128x128xf32>
      %85 = vector.broadcast %62 : vector<1x128xf32> to vector<128x128xf32>
      %86 = arith.mulf %84, %85 : vector<128x128xf32>
      %87 = arith.addf %83, %86 : vector<128x128xf32>
      %88 = tpu.iota {dimensions = array<i32: 0>} : vector<128x128xi32>
      %89 = tpu.iota {dimensions = array<i32: 1>} : vector<128x128xi32>
      %90 = arith.subi %88, %89 : vector<128x128xi32>
      %91 = math.absi %90 : vector<128x128xi32>
      %c3_i32_35 = arith.constant 3 : i32
      %92 = vector.broadcast %c3_i32_35 : i32 to vector<128x128xi32>
      %93 = arith.cmpi sle, %91, %92 : vector<128x128xi32>
      %cst_36 = arith.constant 0.000000e+00 : f32
      %94 = vector.broadcast %cst_36 : f32 to vector<128x128xf32>
      %95 = arith.select %93, %94, %87 : vector<128x128xi1>, vector<128x128xf32>
      %c0_37 = arith.constant 0 : index
      %c0_38 = arith.constant 0 : index
      %96 = vector.load %arg6[%c0_37, %c0_38] : memref<128x128xf32, #tpu.memory_space<vmem>>, vector<128x128xf32>
      tpu.vector_store %arg6[%c0_37, %c0_38], %95 {strides = array<i32>} : memref<128x128xf32, #tpu.memory_space<vmem>>, vector<128x128xf32>,
      %cst_39 = arith.constant 0.00999999977 : f32
      %c0_40 = arith.constant 0 : index
      %97 = memref.load %arg11[%c0_40] : memref<2xf32, #tpu.memory_space<smem>>
      memref.store %cst_39, %arg11[%c0_40] : memref<2xf32, #tpu.memory_space<smem>>
      %cst_41 = arith.constant 1.000000e-01 : f32
      %c1_42 = arith.constant 1 : index
      %98 = memref.load %arg11[%c1_42] : memref<2xf32, #tpu.memory_space<smem>>
      memref.store %cst_41, %arg11[%c1_42] : memref<2xf32, #tpu.memory_space<smem>>
      %c0_i32_43 = arith.constant 0 : i32
      %c0_i32_44 = arith.constant 0 : i32
      %99 = tpu.memref_slice %arg2[%arg0, %c0_i32_43, %c0_i32_44] : memref<2x128x128xf32, #tpu.memory_space<any>> -> memref<1x128x128xf32, #tpu.memory_space<any>>
      %100 = tpu.memref_squeeze %99 : memref<1x128x128xf32, #tpu.memory_space<any>> -> memref<128x128xf32, #tpu.memory_space<any>>
      tpu.wait_dma2 semaphore(%arg12 : memref<!tpu.dma_semaphore, #tpu.memory_space<semaphore_mem>>) src(%100 : memref<128x128xf32, #tpu.memory_space<any>>) dst(%arg7 : memref<128x128xf32, #tpu.memory_space<vmem>>)
      %c0_45 = arith.constant 0 : index
      %c0_46 = arith.constant 0 : index
      %101 = vector.load %arg7[%c0_45, %c0_46] : memref<128x128xf32, #tpu.memory_space<vmem>>, vector<128x128xf32>
      %cst_47 = arith.constant 2.19722462 : f32
      %102 = vector.broadcast %cst_47 : f32 to vector<128x128xf32>
      %103 = arith.subf %101, %102 : vector<128x128xf32>
      %cst_48 = arith.constant 1.000000e+00 : f32
      %104 = vector.broadcast %cst_48 : f32 to vector<128x128xf32>
      %105 = arith.mulf %104, %103 : vector<128x128xf32>
      %106 = arith.negf %105 : vector<128x128xf32>
      %107 = math.exp %106 : vector<128x128xf32>
      %cst_49 = arith.constant 1.000000e+00 : f32
      %108 = vector.broadcast %cst_49 : f32 to vector<128x128xf32>
      %109 = arith.addf %108, %107 : vector<128x128xf32>
      %110 = arith.divf %108, %109 : vector<128x128xf32>
      %111 = arith.mulf %110, %101 : vector<128x128xf32>
      %112 = arith.negf %111 : vector<128x128xf32>
      %113 = math.exp %112 : vector<128x128xf32>
      %cst_50 = arith.constant 1.000000e+00 : f32
      %114 = vector.broadcast %cst_50 : f32 to vector<128x128xf32>
      %115 = arith.addf %114, %113 : vector<128x128xf32>
      %116 = arith.divf %114, %115 : vector<128x128xf32>
      %cst_51 = arith.constant 2.19722462 : f32
      %117 = vector.broadcast %cst_51 : f32 to vector<128x128xf32>
      %118 = arith.subf %111, %117 : vector<128x128xf32>
      %cst_52 = arith.constant 1.000000e+00 : f32
      %119 = vector.broadcast %cst_52 : f32 to vector<128x128xf32>
      %120 = arith.mulf %119, %118 : vector<128x128xf32>
      %121 = arith.negf %120 : vector<128x128xf32>
      %122 = math.exp %121 : vector<128x128xf32>
      %cst_53 = arith.constant 1.000000e+00 : f32
      %123 = vector.broadcast %cst_53 : f32 to vector<128x128xf32>
      %124 = arith.addf %123, %122 : vector<128x128xf32>
      %125 = arith.divf %123, %124 : vector<128x128xf32>
      %126 = arith.mulf %116, %125 : vector<128x128xf32>
      %c0_54 = arith.constant 0 : index
      %c0_55 = arith.constant 0 : index
      %127 = vector.load %arg8[%c0_54, %c0_55] : memref<128x128xf32, #tpu.memory_space<vmem>>, vector<128x128xf32>
      tpu.vector_store %arg8[%c0_54, %c0_55], %126 {strides = array<i32>} : memref<128x128xf32, #tpu.memory_space<vmem>>, vector<128x128xf32>,
      %128 = tpu.transpose %111, [1, 0] : vector<128x128xf32> -> vector<128x128xf32>
      %129 = arith.addf %111, %128 : vector<128x128xf32>
      %cst_56 = arith.constant -5.000000e-01 : f32
      %130 = vector.broadcast %cst_56 : f32 to vector<128x128xf32>
      %131 = arith.mulf %129, %130 : vector<128x128xf32>
      %c0_57 = arith.constant 0 : index
      %c0_58 = arith.constant 0 : index
      %132 = vector.load %arg7[%c0_57, %c0_58] : memref<128x128xf32, #tpu.memory_space<vmem>>, vector<128x128xf32>
      tpu.vector_store %arg7[%c0_57, %c0_58], %131 {strides = array<i32>} : memref<128x128xf32, #tpu.memory_space<vmem>>, vector<128x128xf32>,
      %c0_59 = arith.constant 0 : index
      %c0_60 = arith.constant 0 : index
      %133 = vector.load %arg8[%c0_59, %c0_60] : memref<128x128xf32, #tpu.memory_space<vmem>>, vector<128x128xf32>
      %134 = arith.mulf %133, %133 : vector<128x128xf32>
      %135 = arith.mulf %134, %95 : vector<128x128xf32>
      %cst_61 = arith.constant dense<0.000000e+00> : vector<128xf32>
      %136 = vector.multi_reduction <add>, %135, %cst_61 [1] : vector<128x128xf32> to vector<128xf32>
      %137 = vector.shape_cast %136 : vector<128xf32> to vector<128x1xf32>
      %c0_62 = arith.constant 0 : index
      %c0_63 = arith.constant 0 : index
      %138 = vector.load %arg10[%c0_62, %c0_63] : memref<128x1xf32, #tpu.memory_space<vmem>>, vector<128x1xf32>
      tpu.vector_store %arg10[%c0_62, %c0_63], %137 {strides = array<i32>} : memref<128x1xf32, #tpu.memory_space<vmem>>, vector<128x1xf32>,
      %cst_64 = arith.constant 1.000000e+00 : f32
      %139 = vector.broadcast %cst_64 : f32 to vector<128x1xf32>
      %140 = arith.subf %137, %139 : vector<128x1xf32>
      %cst_65 = arith.constant 0.000000e+00 : f32
      %141 = vector.broadcast %cst_65 : f32 to vector<128x1xf32>
      %142 = arith.maximumf %140, %141 : vector<128x1xf32>
      %c0_66 = arith.constant 0 : index
      %c0_67 = arith.constant 0 : index
      %143 = vector.load %arg9[%c0_66, %c0_67] : memref<128x1xf32, #tpu.memory_space<vmem>>, vector<128x1xf32>
      tpu.vector_store %arg9[%c0_66, %c0_67], %142 {strides = array<i32>} : memref<128x1xf32, #tpu.memory_space<vmem>>, vector<128x1xf32>,
    } else {
    }
    %c0 = arith.constant 0 : index
    %3 = memref.load %arg11[%c0] : memref<2xf32, #tpu.memory_space<smem>>
    %c1 = arith.constant 1 : index
    %4 = memref.load %arg11[%c1] : memref<2xf32, #tpu.memory_space<smem>>
    %cst = arith.constant 9.900000e-01 : f32
    %5 = arith.mulf %3, %cst : f32
    %c0_1 = arith.constant 0 : index
    %6 = memref.load %arg11[%c0_1] : memref<2xf32, #tpu.memory_space<smem>>
    memref.store %5, %arg11[%c0_1] : memref<2xf32, #tpu.memory_space<smem>>
    %cst_2 = arith.constant 9.900000e-01 : f32
    %7 = arith.mulf %4, %cst_2 : f32
    %c1_3 = arith.constant 1 : index
    %8 = memref.load %arg11[%c1_3] : memref<2xf32, #tpu.memory_space<smem>>
    memref.store %7, %arg11[%c1_3] : memref<2xf32, #tpu.memory_space<smem>>
    %cst_4 = arith.constant 1.000000e+00 : f32
    %9 = arith.mulf %cst_4, %5 : f32
    %c0_5 = arith.constant 0 : index
    %c0_6 = arith.constant 0 : index
    %10 = vector.load %arg6[%c0_5, %c0_6] : memref<128x128xf32, #tpu.memory_space<vmem>>, vector<128x128xf32>
    %c0_7 = arith.constant 0 : index
    %c0_8 = arith.constant 0 : index
    %11 = vector.load %arg8[%c0_7, %c0_8] : memref<128x128xf32, #tpu.memory_space<vmem>>, vector<128x128xf32>
    %c0_9 = arith.constant 0 : index
    %c0_10 = arith.constant 0 : index
    %12 = vector.load %arg9[%c0_9, %c0_10] : memref<128x1xf32, #tpu.memory_space<vmem>>, vector<128x1xf32>
    %c0_11 = arith.constant 0 : index
    %c0_12 = arith.constant 0 : index
    %13 = vector.load %arg10[%c0_11, %c0_12] : memref<128x1xf32, #tpu.memory_space<vmem>>, vector<128x1xf32>
    %cst_13 = arith.constant 1.000000e+00 : f32
    %14 = vector.broadcast %cst_13 : f32 to vector<128x1xf32>
    %15 = arith.subf %13, %14 : vector<128x1xf32>
    %cst_14 = arith.constant 1.000000e+00 : f32
    %16 = vector.broadcast %cst_14 : f32 to vector<128x1xf32>
    %17 = arith.mulf %16, %15 : vector<128x1xf32>
    %18 = arith.negf %17 : vector<128x1xf32>
    %19 = math.exp %18 : vector<128x1xf32>
    %cst_15 = arith.constant 1.000000e+00 : f32
    %20 = vector.broadcast %cst_15 : f32 to vector<128x1xf32>
    %21 = arith.addf %20, %19 : vector<128x1xf32>
    %22 = arith.divf %20, %21 : vector<128x1xf32>
    %23 = arith.mulf %12, %22 : vector<128x1xf32>
    %c0_16 = arith.constant 0 : index
    %c0_17 = arith.constant 0 : index
    %24 = vector.load %arg7[%c0_16, %c0_17] : memref<128x128xf32, #tpu.memory_space<vmem>>, vector<128x128xf32>
    %25 = vector.broadcast %23 : vector<128x1xf32> to vector<128x128xf32>
    %26 = arith.addf %24, %25 : vector<128x128xf32>
    %27 = tpu.transpose %23, [1, 0] : vector<128x1xf32> -> vector<1x128xf32>
    %28 = vector.broadcast %27 : vector<1x128xf32> to vector<128x128xf32>
    %29 = arith.addf %26, %28 : vector<128x128xf32>
    %30 = arith.mulf %11, %10 : vector<128x128xf32>
    %31 = arith.mulf %30, %29 : vector<128x128xf32>
    %32 = vector.broadcast %3 : f32 to vector<128x128xf32>
    %33 = arith.mulf %32, %31 : vector<128x128xf32>
    %34 = arith.subf %11, %33 : vector<128x128xf32>
    %35 = math.absf %34 : vector<128x128xf32>
    %36 = vector.broadcast %9 : f32 to vector<128x128xf32>
    %37 = arith.subf %35, %36 : vector<128x128xf32>
    %cst_18 = arith.constant 0.000000e+00 : f32
    %38 = vector.broadcast %cst_18 : f32 to vector<128x128xf32>
    %39 = arith.maximumf %37, %38 : vector<128x128xf32>
    %cst_19 = arith.constant 1.000000e+00 : f32
    %40 = vector.broadcast %cst_19 : f32 to vector<128x128xf32>
    %41 = arith.minimumf %39, %40 : vector<128x128xf32>
    %c0_20 = arith.constant 0 : index
    %c0_21 = arith.constant 0 : index
    %42 = vector.load %arg8[%c0_20, %c0_21] : memref<128x128xf32, #tpu.memory_space<vmem>>, vector<128x128xf32>
    tpu.vector_store %arg8[%c0_20, %c0_21], %41 {strides = array<i32>} : memref<128x128xf32, #tpu.memory_space<vmem>>, vector<128x128xf32>,
    %43 = arith.mulf %41, %41 : vector<128x128xf32>
    %44 = arith.mulf %43, %10 : vector<128x128xf32>
    %c0_22 = arith.constant 0 : index
    %c0_23 = arith.constant 0 : index
    %c0_24 = arith.constant 0 : index
    %c0_25 = arith.constant 0 : index
    %45 = vector.load %arg5[%c0_22, %c0_23, %c0_24, %c0_25] : memref<1x1x128x128xf32, #tpu.memory_space<vmem>>, vector<1x1x128x128xf32>
    %46 = vector.shape_cast %45 : vector<1x1x128x128xf32> to vector<128x128xf32>
    %47 = vector.shape_cast %44 : vector<128x128xf32> to vector<1x1x128x128xf32>
    tpu.vector_store %arg5[%c0_22, %c0_23, %c0_24, %c0_25], %47 {strides = array<i32>} : memref<1x1x128x128xf32, #tpu.memory_space<vmem>>, vector<1x1x128x128xf32>,
    %c3_i32 = arith.constant 3 : i32
    %48 = arith.cmpi ne, %arg1, %c3_i32 : i32
    %49 = arith.extui %48 : i1 to i32
    %c0_i32_26 = arith.constant 0 : i32
    %50 = arith.cmpi ne, %49, %c0_i32_26 : i32
    scf.if %50 {
      %cst_27 = arith.constant dense<0.000000e+00> : vector<128xf32>
      %51 = vector.multi_reduction <add>, %44, %cst_27 [1] : vector<128x128xf32> to vector<128xf32>
      %52 = vector.shape_cast %51 : vector<128xf32> to vector<128x1xf32>
      %c0_28 = arith.constant 0 : index
      %c0_29 = arith.constant 0 : index
      %53 = vector.load %arg10[%c0_28, %c0_29] : memref<128x1xf32, #tpu.memory_space<vmem>>, vector<128x1xf32>
      tpu.vector_store %arg10[%c0_28, %c0_29], %52 {strides = array<i32>} : memref<128x1xf32, #tpu.memory_space<vmem>>, vector<128x1xf32>,
      %cst_30 = arith.constant 1.000000e+00 : f32
      %54 = vector.broadcast %cst_30 : f32 to vector<128x1xf32>
      %55 = arith.subf %52, %54 : vector<128x1xf32>
      %cst_31 = arith.constant 0.000000e+00 : f32
      %56 = vector.broadcast %cst_31 : f32 to vector<128x1xf32>
      %57 = arith.maximumf %55, %56 : vector<128x1xf32>
      %58 = vector.broadcast %4 : f32 to vector<128x1xf32>
      %59 = arith.mulf %58, %57 : vector<128x1xf32>
      %60 = arith.addf %12, %59 : vector<128x1xf32>
      %c0_32 = arith.constant 0 : index
      %c0_33 = arith.constant 0 : index
      %61 = vector.load %arg9[%c0_32, %c0_33] : memref<128x1xf32, #tpu.memory_space<vmem>>, vector<128x1xf32>
      tpu.vector_store %arg9[%c0_32, %c0_33], %60 {strides = array<i32>} : memref<128x1xf32, #tpu.memory_space<vmem>>, vector<128x1xf32>,
    } else {
    }
    return
  }
  func.func @transform_1(%arg0: i32, %arg1: i32) -> (i32, i32, i32) {
    %c0_i32 = arith.constant 0 : i32
    %c0_i32_0 = arith.constant 0 : i32
    %c0_i32_1 = arith.constant 0 : i32
    return %arg0, %c0_i32, %c0_i32_0 : i32, i32, i32
  }
  func.func @transform_2(%arg0: i32, %arg1: i32) -> (i32, i32, i32) {
    %c0_i32 = arith.constant 0 : i32
    %c0_i32_0 = arith.constant 0 : i32
    %c0_i32_1 = arith.constant 0 : i32
    return %arg0, %c0_i32, %c0_i32_0 : i32, i32, i32
  }
  func.func @transform_3(%arg0: i32, %arg1: i32) -> (i32, i32, i32, i32) {
    %c0_i32 = arith.constant 0 : i32
    %c0_i32_0 = arith.constant 0 : i32
    %c0_i32_1 = arith.constant 0 : i32
    return %arg1, %arg0, %c0_i32, %c0_i32_0 : i32, i32, i32, i32
  }
}

</mosaic_0001>

<bundles_post_ra>
// kernel: tpu_custom_call.1
= control target key start
LH: loop header
LB: loop body
LE: loop exit
PB: predicated region body
PF: predicated region fallthrough
CT: control target
= control target key end

     0   :  { %8 = vsyncpa [#allocation10], 0  ;;  %s4293_s0 = inlined_call_operand.vmem [shape: f32[2,128,128], index: 0, kind: input, shape index: {}]   ;;  %s4294_s1 = inlined_call_operand.vmem [shape: f32[2,128,4], index: 1, kind: input, shape index: {}]   ;;  %s4295_s2 = inlined_call_operand.vmem [shape: f32[2,4,128], index: 2, kind: input, shape index: {}]   ;;  %s4296_s3 = inlined_call_operand.hbm [shape: f32[4,2,128,128], index: 3, kind: output, shape index: {}]  }
   0x1   :  { %10 = vsyncpa [#allocation10 + $0x1], 0  ;;  %s2946_s12 = smov 0   ;;  %s2948_s13 = smov 0  }
   0x2   :  { %s2950_s14 = smov 0   ;;  %s2952_s15 = smov 0  }
   0x3   :  { %s2954_s16 = smov 0   ;;  %s2956_s17 = smov 0  }
   0x4   :  { %s2958_s18 = smov 0   ;;  %s2960_s19 = smov 0  }
   0x5 LB: > { %s2293_s20 = sadd.s32 4294967295, %s2914_s19   ;;  %s2294_s21 = sadd.s32 4294967294, %s2914_s19   ;;  %s2914_s19 = sphi %s2960_s19, %s16_s19   ;;  %s2910_s18 = sphi %s2958_s18, %s4488_s18   ;;  %s2906_s17 = sphi %s2956_s17, %s4487_s17   ;;  %s2902_s16 = sphi %s2954_s16, %s4486_s16   ;;  %s2898_s15 = sphi %s2952_s15, %s4485_s15   ;;  %s2894_s14 = sphi %s2950_s14, %s4484_s14   ;;  %s2890_s13 = sphi %s2948_s13, %s4483_s13   ;;  %s2886_s12 = sphi %s2946_s12, %s4482_s12  }
   0x6   : > { %s25_s22 = sadd.s32 1, %s2906_s17  ;;  %s28_s23 = sadd.s32 1, %s2910_s18 }
   0x7   : > { %p26_p0 = scmp.ge.s32.totalorder %s25_s22, 4  ;;  %p99_p1 = scmp.ne.s32.totalorder %s2894_s14, %s2890_s13 }
   0x8   : > { %p100_p2 = scmp.eq.s32.totalorder %s2293_s20, 7  ;;  %p105_p5 = scmp.ne.s32.totalorder %s2890_s13, %s2886_s12 }
   0x9   : > { %s4490_s22 = smov (%p26_p0, %s25_s22), 0  ;;  %s4492_s23 = smov (!%p26_p0, %s28_s23), %s2910_s18 }
   0xa   : > { %s84_s24 = ssub.s32 %s2906_s17, %s4490_s22  ;;  %p2997_p3 = por %p100_p2, %p99_p1 }
   0xb   : > { %p30_p4 = scmp.ge.s32.totalorder %s4492_s23, 2  ;;  %p106_p6 = scmp.eq.s32.totalorder %s2294_s21, 7 }
   0xc   : > { %p2297_p7 = scmp.ge.s32.totalorder %s2914_s19, 1  ;;  %p139_p9 = scmp.lt.s32.totalorder %s2914_s19, 9 }
   0xd   : > { %s4494_s23 = smov (%p30_p4, %s4492_s23), 0  ;;  %p3006_p8 = por %p106_p6, %p105_p5 }
   0xe   : > { %s85_s27 = ssub.s32 %s2910_s18, %s4494_s23  ;;  %s89_s28 = sadd.s32 1, %s2894_s14 }
   0xf   : > { %s86_s29 = sor.u32 %s85_s27, %s84_s24  ;;  %p140_p10 = pnand %p2297_p7, %p139_p9 }
  0x10   : > { %p87_p11 = scmp.eq.s32.totalorder %s86_s29, 0 }
  0x11   : > { %143 = sbr.rel (%p140_p10) target bundleno = 1054 (0x41e), region = 28 }
  0x12   : > { %s3015_s30 = scalar_select %p87_p11, %s2894_s14, %s89_s28  }
  0x16   : > { %s4297_s4 = sand.u32 1, %s2890_s13   ;;  %p165_p12 = scmp.lt.s32.totalorder %s2902_s16, 1 }
  0x17   : > { %s2298_s5 = sshll.u32 %s4297_s4, 7  ;;  %p2302_p13 = scmp.ne.s32.totalorder %s2898_s15, 0 }
  0x18   : > { %s166_s6 = scalar_select %p165_p12, %s2902_s16, 1 }
  0x19   : > { %s3032_s27 = scalar_lea.vmem [#allocation9], %s2298_s5  ;;  %177 = sbr.rel (%p2302_p13) target bundleno = 583 (0x247), region = 32 }
  0x1a   : > { %s2473_s7 = sshll.u32 %s166_s6, 7  ;;  %s2301_s8 = sshll.u32 %s166_s6, 2 }
  0x1b   : > { %s3025_s11 = scalar_lea.vmem %s4294_s1, %s2473_s7  ;;  %s3030_s24 = scalar_lea.vmem %s4295_s2, %s2301_s8 }
  0x1e   : > { %s2303_s28 = sshll.u32 %s2902_s16, 7  ;;  %v3058_v16 = vld [vmem:[%s3025_s11 + $0x10] sm:$0xff]  ;;  %v3061_v17 = vld [vmem:[%s3025_s11] sm:$0xff]  ;;  %v2916_v18 = vmov 0   ;;  %v3066_v19 = vld [vmem:[%s3025_s11 + $0x18] sm:$0xff] }
  0x1f   : > { %s3039_s6 = scalar_lea.vmem %s4293_s0, %s2303_s28  ;;  %2555 = vset.pattern.permute.xlu1 %v2916_v18  ;;  %2554 = vset.pattern.permute.xlu0 %v2916_v18  ;;  %v3069_v20 = vld [vmem:[%s3025_s11 + $0x8] sm:$0xff] }
  0x20   : > { %v213_v0 = vld [vmem:[%s3039_s6] sm:$0xff]  ;;  %v215_v1 = vld [vmem:[%s3039_s6 + $0x8] sm:$0xff]  ;;  %v217_v2 = vld [vmem:[%s3039_s6 + $0x10] sm:$0xff]  ;;  %282 = vperm.xlu1 %2555, %v3058_v16   ;;  %272 = vperm.xlu0 %2554, %v3061_v17  }
  0x21   : > { %214 = vst [vmem:[#allocation3 + $0x28] sm:$0xff] %v213_v0  ;;  %216 = vst [vmem:[#allocation3 + $0x68] sm:$0xff] %v215_v1  ;;  %v219_v3 = vld [vmem:[%s3039_s6 + $0x18] sm:$0xff]  ;;  %v221_v4 = vld [vmem:[%s3039_s6 + $0x20] sm:$0xff] }
  0x22   : > { %218 = vst [vmem:[#allocation3 + $0x10] sm:$0xff] %v217_v2  ;;  %v223_v5 = vld [vmem:[%s3039_s6 + $0x28] sm:$0xff]  ;;  %220 = vst [vmem:[#allocation3 + $0x40] sm:$0xff] %v219_v3  ;;  %v225_v6 = vld [vmem:[%s3039_s6 + $0x30] sm:$0xff] }
  0x23   : > { %222 = vst [vmem:[#allocation3 + $0x48] sm:$0xff] %v221_v4  ;;  %224 = vst [vmem:[#allocation3 + $0x30] sm:$0xff] %v223_v5  ;;  %v227_v7 = vld [vmem:[%s3039_s6 + $0x38] sm:$0xff]  ;;  %v229_v8 = vld [vmem:[%s3039_s6 + $0x40] sm:$0xff] }
  0x24   : > { %226 = vst [vmem:[#allocation3 + $0x70] sm:$0xff] %v225_v6  ;;  %228 = vst [vmem:[#allocation3 + $0x38] sm:$0xff] %v227_v7  ;;  %v231_v9 = vld [vmem:[%s3039_s6 + $0x48] sm:$0xff]  ;;  %v233_v10 = vld [vmem:[%s3039_s6 + $0x50] sm:$0xff] }
  0x25   : > { %230 = vst [vmem:[#allocation3 + $0x20] sm:$0xff] %v229_v8  ;;  %v235_v11 = vld [vmem:[%s3039_s6 + $0x58] sm:$0xff]  ;;  %232 = vst [vmem:[#allocation3 + $0x78] sm:$0xff] %v231_v9  ;;  %v237_v12 = vld [vmem:[%s3039_s6 + $0x60] sm:$0xff] }
  0x26   : > { %234 = vst [vmem:[#allocation3 + $0x18] sm:$0xff] %v233_v10  ;;  %236 = vst [vmem:[#allocation3 + $0x58] sm:$0xff] %v235_v11  ;;  %v239_v13 = vld [vmem:[%s3039_s6 + $0x68] sm:$0xff]  ;;  %v241_v14 = vld [vmem:[%s3039_s6 + $0x70] sm:$0xff] }
  0x27   : > { %238 = vst [vmem:[#allocation3] sm:$0xff] %v237_v12  ;;  %240 = vst [vmem:[#allocation3 + $0x8] sm:$0xff] %v239_v13  ;;  %v243_v15 = vld [vmem:[%s3039_s6 + $0x78] sm:$0xff] }
  0x28   : > { %242 = vst [vmem:[#allocation3 + $0x60] sm:$0xff] %v241_v14  ;;  %244 = vst [vmem:[#allocation3 + $0x50] sm:$0xff] %v243_v15 }
  0x29   : > { %252 = vsyncadd [#allocation8], 2048  ;;  %287 = vperm.xlu1 %2555, %v3066_v19   ;;  %277 = vperm.xlu0 %2554, %v3069_v20   ;;  %v3074_v21 = vld [vmem:[%s3025_s11 + $0x28] sm:$0xff]  ;;  %v3077_v22 = vld [vmem:[%s3025_s11 + $0x20] sm:$0xff]  ;;  %v2917_v33 = vmov 1   ;;  %v2918_v34 = vmov 2   ;;  %v350_v46 = vlaneseq }
  0x2a   : > { %v3082_v23 = vld [vmem:[%s3025_s11 + $0x38] sm:$0xff]  ;;  %v3085_v24 = vld [vmem:[%s3025_s11 + $0x30] sm:$0xff]  ;;  %v3090_v25 = vld [vmem:[%s3025_s11 + $0x48] sm:$0xff]  ;;  %v2919_v35 = vmov 3   ;;  %s2920_s4 = smov 0.01  }
  0x2b   : > { %v3093_v26 = vld [vmem:[%s3025_s11 + $0x40] sm:$0xff]  ;;  %v264_v27 = vld [vmem:[%s3025_s11 + $0x58] sm:$0xff]  ;;  %v3099_v28 = vld [vmem:[%s3025_s11 + $0x50] sm:$0xff]  ;;  %866 = sst [smem:[#allocation7]] %s2920_s4  ;;  %s2921_s5 = smov 0.1  }
  0x2c   : > { %v266_v29 = vld [vmem:[%s3025_s11 + $0x68] sm:$0xff]  ;;  %v3104_v30 = vld [vmem:[%s3025_s11 + $0x60] sm:$0xff]  ;;  %v268_v31 = vld [vmem:[%s3025_s11 + $0x78] sm:$0xff]  ;;  %868 = sst [smem:[#allocation7 + $0x1]] %s2921_s5  ;;  %v3163_v49 = vshrl.u32 %v350_v46, 7 }
  0x2d   : > { %297 = vperm.xlu1 %2555, %v3074_v21   ;;  %292 = vperm.xlu0 %2554, %v3077_v22   ;;  %v3109_v32 = vld [vmem:[%s3025_s11 + $0x70] sm:$0xff]  ;;  %v3172_v56 = vld [vmem:[%s3030_s24] sm:$0xf] }
  0x2e   : > { %v436_v52 = vsub.s32 0, %v3163_v49  ;;  %v352_v53 = vsub.s32 1, %v3163_v49 }
  0x30   : > { %v3175_v57 = vrot.slane %v3172_v56, %v436_v52  ;;  %v3178_v58 = vrot.slane %v3172_v56, %v352_v53  ;;  %v738_v52 = vadd.s32 24, %v3163_v49  ;;  %v736_v53 = vadd.s32 8, %v3163_v49 }
  0x31   : > { %307 = vperm.xlu1 %2555, %v3082_v23   ;;  %302 = vperm.xlu0 %2554, %v3085_v24  }
  0x35   : > { %317 = vperm.xlu1 %2555, %v3090_v25   ;;  %312 = vperm.xlu0 %2554, %v3093_v26  }
  0x39   : > { %327 = vperm.xlu1 %2555, %v264_v27   ;;  %322 = vperm.xlu0 %2554, %v3099_v28  }
  0x3d   : > { %337 = vperm.xlu1 %2555, %v266_v29   ;;  %332 = vperm.xlu0 %2554, %v3104_v30  }
  0x41   : > { %347 = vperm.xlu1 %2555, %v268_v31   ;;  %342 = vperm.xlu0 %2554, %v3109_v32  }
  0x45   : > { %2557 = vset.pattern.permute.xlu1 %v2917_v33  ;;  %2556 = vset.pattern.permute.xlu0 %v2917_v33 }
  0x46   : > { %375 = vperm.xlu1 %2557, %v3069_v20   ;;  %371 = vperm.xlu0 %2556, %v3061_v17  }
  0x4a   : > { %379 = vperm.xlu1 %2557, %v3058_v16   ;;  %383 = vperm.xlu0 %2556, %v3066_v19  }
  0x4e   : > { %387 = vperm.xlu1 %2557, %v3077_v22   ;;  %391 = vperm.xlu0 %2556, %v3074_v21  }
  0x52   : > { %395 = vperm.xlu1 %2557, %v3085_v24   ;;  %399 = vperm.xlu0 %2556, %v3082_v23  }
  0x56   : > { %403 = vperm.xlu1 %2557, %v3093_v26   ;;  %407 = vperm.xlu0 %2556, %v3090_v25  }
  0x5a   : > { %411 = vperm.xlu1 %2557, %v3099_v28   ;;  %415 = vperm.xlu0 %2556, %v264_v27  }
  0x5e   : > { %419 = vperm.xlu1 %2557, %v3104_v30   ;;  %423 = vperm.xlu0 %2556, %v266_v29  }
  0x62   : > { %427 = vperm.xlu1 %2557, %v3109_v32   ;;  %431 = vperm.xlu0 %2556, %v268_v31  }
  0x66   : > { %2558 = vset.pattern.permute.xlu1 %v2918_v34  ;;  %2559 = vset.pattern.permute.xlu0 %v2918_v34 }
  0x67   : > { %471 = vperm.xlu1 %2558, %v3061_v17   ;;  %475 = vperm.xlu0 %2559, %v3069_v20  }
  0x6b   : > { %479 = vperm.xlu1 %2558, %v3058_v16   ;;  %487 = vperm.xlu0 %2559, %v3077_v22  }
  0x6f   : > { %483 = vperm.xlu1 %2558, %v3066_v19   ;;  %495 = vperm.xlu0 %2559, %v3085_v24  }
  0x73   : > { %491 = vperm.xlu1 %2558, %v3074_v21   ;;  %503 = vperm.xlu0 %2559, %v3093_v26  }
  0x77   : > { %499 = vperm.xlu1 %2558, %v3082_v23   ;;  %511 = vperm.xlu0 %2559, %v3099_v28  }
  0x7b   : > { %507 = vperm.xlu1 %2558, %v3090_v25   ;;  %519 = vperm.xlu0 %2559, %v3104_v30  }
  0x7f   : > { %515 = vperm.xlu1 %2558, %v264_v27   ;;  %527 = vperm.xlu0 %2559, %v3109_v32  }
  0x83   : > { %523 = vperm.xlu1 %2558, %v266_v29   ;;  %2560 = vset.pattern.permute.xlu0 %v2919_v35 }
  0x84   : > { %571 = vperm.xlu0 %2560, %v3061_v17  }
  0x87   : > { %531 = vperm.xlu1 %2558, %v268_v31  }
  0x88   : > { %583 = vperm.xlu0 %2560, %v3066_v19  }
  0x8b   : > { %2561 = vset.pattern.permute.xlu1 %v2919_v35 }
  0x8c   : > { %575 = vperm.xlu1 %2561, %v3069_v20   ;;  %591 = vperm.xlu0 %2560, %v3074_v21  }
  0x90   : > { %579 = vperm.xlu1 %2561, %v3058_v16   ;;  %599 = vperm.xlu0 %2560, %v3082_v23  }
  0x94   : > { %587 = vperm.xlu1 %2561, %v3077_v22   ;;  %607 = vperm.xlu0 %2560, %v3090_v25  }
  0x98   : > { %595 = vperm.xlu1 %2561, %v3085_v24   ;;  %615 = vperm.xlu0 %2560, %v264_v27  }
  0x9b   : > { %v283_v36 = vpop.permute.xlu1 %282  ;;  %v3149_v37 = vpop.permute.xlu0 %272 }
  0x9c   : > { %603 = vperm.xlu1 %2561, %v3093_v26   ;;  %623 = vperm.xlu0 %2560, %v266_v29   ;;  %v356_v2 = vmul.f32 %v3178_v58, %v283_v36 }
  0xa0   : > { %611 = vperm.xlu1 %2561, %v3099_v28   ;;  %631 = vperm.xlu0 %2560, %v268_v31  }
  0xa4   : > { %v3151_v38 = vpop.permute.xlu1 %287  ;;  %619 = vperm.xlu1 %2561, %v3104_v30   ;;  %v278_v39 = vpop.permute.xlu0 %277 }
  0xa5   : > { %v355_v61 = vmul.f32 %v3178_v58, %v278_v39 }
  0xa8   : > { %v3154_v40 = vpop.permute.xlu1 %297  ;;  %627 = vperm.xlu1 %2561, %v3109_v32   ;;  %v293_v41 = vpop.permute.xlu0 %292 }
  0xa9   : > { %v358_v7 = vmul.f32 %v3178_v58, %v293_v41 }
  0xac   : > { %v3157_v42 = vpop.permute.xlu1 %307  ;;  %v303_v43 = vpop.permute.xlu0 %302 }
  0xad   : > { %v360_v12 = vmul.f32 %v3178_v58, %v303_v43  ;;  %v536_v43 = vsub.s32 3, %v3163_v49 }
  0xb0   : > { %v3159_v44 = vpop.permute.xlu1 %317  ;;  %v313_v45 = vpop.permute.xlu0 %312 }
  0xb1   : > { %v362_v17 = vmul.f32 %v3178_v58, %v313_v45 }
  0xb4   : > { %v3161_v47 = vpop.permute.xlu1 %327  ;;  %v323_v48 = vpop.permute.xlu0 %322 }
  0xb5   : > { %v364_v22 = vmul.f32 %v3178_v58, %v323_v48 }
  0xb8   : > { %v3165_v50 = vpop.permute.xlu1 %337  ;;  %v333_v51 = vpop.permute.xlu0 %332 }
  0xb9   : > { %v366_v27 = vmul.f32 %v3178_v58, %v333_v51  ;;  %v3265_v51 = vand.u32 127, %v350_v46 }
  0xbb   : > { %v753_v46 = vsub.s32 %v3163_v49, %v3265_v51 }
  0xbc   : > { %v3169_v54 = vpop.permute.xlu1 %347  ;;  %v343_v55 = vpop.permute.xlu0 %342 }
  0xbd   : > { %v368_v32 = vmul.f32 %v3178_v58, %v343_v55  ;;  %v740_v55 = vadd.s32 40, %v3163_v49 }
  0xc1   : > { %v3180_v59 = vpop.permute.xlu1 %375  ;;  %v3182_v60 = vpop.permute.xlu0 %371 }
  0xc2   : > { %v439_v62 = vmul.f32 %v3175_v57, %v3180_v59 }
  0xc4   : > { %v3187_v63 = vadd.f32 %v439_v62, %v355_v61  ;;  %v3271_v61 = vrot.slane %v3172_v56, %v536_v43  ;;  %v737_v62 = vadd.s32 16, %v3163_v49  ;;  %v750_v43 = vadd.s32 120, %v3163_v49 }
  0xc5   : > { %v3189_v0 = vpop.permute.xlu1 %379  ;;  %v3191_v1 = vpop.permute.xlu0 %383 }
  0xc6   : > { %4349 = vst [vmem:[#allocation14_spill] sm:$0xff] %v3187_v63  ;;  %v440_v3 = vmul.f32 %v3175_v57, %v3189_v0 }
  0xc8   : > { %v3196_v4 = vadd.f32 %v440_v3, %v356_v2  ;;  %v742_v2 = vadd.s32 56, %v3163_v49  ;;  %v739_v3 = vadd.s32 32, %v3163_v49 }
  0xc9   : > { %v3198_v5 = vpop.permute.xlu1 %387  ;;  %v3200_v6 = vpop.permute.xlu0 %391 }
  0xca   : > { %4350 = vst [vmem:[#allocation15_spill] sm:$0xff] %v3196_v4  ;;  %v442_v8 = vmul.f32 %v3175_v57, %v3198_v5 }
  0xcc   : > { %v3205_v9 = vadd.f32 %v442_v8, %v358_v7 }
  0xcd   : > { %v3207_v10 = vpop.permute.xlu1 %395  ;;  %v3209_v11 = vpop.permute.xlu0 %399 }
  0xce   : > { %4351 = vst [vmem:[#allocation16_spill] sm:$0xff] %v3205_v9  ;;  %v444_v13 = vmul.f32 %v3175_v57, %v3207_v10 }
  0xd0   : > { %v3214_v14 = vadd.f32 %v444_v13, %v360_v12  ;;  %v744_v12 = vadd.s32 72, %v3163_v49  ;;  %v741_v13 = vadd.s32 48, %v3163_v49 }
  0xd1   : > { %v3216_v15 = vpop.permute.xlu1 %403  ;;  %v3218_v16 = vpop.permute.xlu0 %407 }
  0xd2   : > { %4352 = vst [vmem:[#allocation17_spill] sm:$0xff] %v3214_v14  ;;  %v446_v18 = vmul.f32 %v3175_v57, %v3216_v15 }
  0xd4   : > { %v3223_v19 = vadd.f32 %v446_v18, %v362_v17  ;;  %v746_v17 = vadd.s32 88, %v3163_v49  ;;  %v756_v18 = vsub.s32 %v738_v52, %v3265_v51  ;;  %v757_v52 = vsub.s32 %v739_v3, %v3265_v51 }
  0xd5   : > { %v3225_v20 = vpop.permute.xlu1 %411  ;;  %v3227_v21 = vpop.permute.xlu0 %415 }
  0xd6   : > { %4353 = vst [vmem:[#allocation18_spill] sm:$0xff] %v3223_v19  ;;  %4354 = vst [vmem:[#allocation19_spill] sm:$0xff] %v3225_v20  ;;  %v448_v23 = vmul.f32 %v3175_v57, %v3225_v20  ;;  %v762_v19 = vsub.s32 %v744_v12, %v3265_v51 }
  0xd7   : > { %4355 = vst [vmem:[#allocation20_spill] sm:$0xff] %v3227_v21 }
  0xd8   : > { %v3232_v24 = vadd.f32 %v448_v23, %v364_v22  ;;  %v743_v22 = vadd.s32 64, %v3163_v49  ;;  %v748_v23 = vadd.s32 104, %v3163_v49 }
  0xd9   : > { %v3234_v25 = vpop.permute.xlu1 %419  ;;  %v3236_v26 = vpop.permute.xlu0 %423 }
  0xda   : > { %4356 = vst [vmem:[#allocation21_spill] sm:$0xff] %v3232_v24  ;;  %4357 = vst [vmem:[#allocation22_spill] sm:$0xff] %v3234_v25  ;;  %v450_v28 = vmul.f32 %v3175_v57, %v3234_v25  ;;  %v747_v25 = vadd.s32 96, %v3163_v49  ;;  %v770_v24 = vsub.s32 0, %v753_v46 }
  0xdb   : > { %4358 = vst [vmem:[#allocation23_spill] sm:$0xff] %v3236_v26 }
  0xdc   : > { %v3241_v29 = vadd.f32 %v450_v28, %v366_v27  ;;  %v745_v27 = vadd.s32 80, %v3163_v49  ;;  %v636_v28 = vsub.s32 2, %v3163_v49 }
  0xdd   : > { %v3243_v30 = vpop.permute.xlu1 %427  ;;  %v3245_v31 = vpop.permute.xlu0 %431 }
  0xde   : > { %4359 = vst [vmem:[#allocation24_spill] sm:$0xff] %v3241_v29  ;;  %4360 = vst [vmem:[#allocation25_spill] sm:$0xff] %v3243_v30  ;;  %v452_v33 = vmul.f32 %v3175_v57, %v3243_v30  ;;  %v755_v30 = vsub.s32 %v737_v62, %v3265_v51  ;;  %v761_v62 = vsub.s32 %v743_v22, %v3265_v51 }
  0xdf   : > { %4361 = vst [vmem:[#allocation26_spill] sm:$0xff] %v3245_v31  ;;  %v763_v3 = vsub.s32 %v745_v27, %v3265_v51  ;;  %v3308_v14 = vrot.slane %v3172_v56, %v636_v28  ;;  %v3316_v22 = vmin.u32 %v770_v24, %v753_v46 }
  0xe0   : > { %v3250_v34 = vadd.f32 %v452_v33, %v368_v32  ;;  %v754_v32 = vsub.s32 %v736_v53, %v3265_v51  ;;  %v758_v33 = vsub.s32 %v740_v55, %v3265_v51  ;;  %v759_v53 = vsub.s32 %v741_v13, %v3265_v51 }
  0xe1   : > { %v764_v55 = vsub.s32 %v746_v17, %v3265_v51  ;;  %v776_v4 = vsub.s32 0, %v755_v30  ;;  %v765_v13 = vsub.s32 %v747_v25, %v3265_v51  ;;  %v794_v28 = vsub.s32 0, %v761_v62 }
  0xe2   : > { %4362 = vst [vmem:[#allocation27_spill] sm:$0xff] %v3250_v34  ;;  %v3252_v35 = vpop.permute.xlu1 %471  ;;  %v3254_v36 = vpop.permute.xlu0 %475  ;;  %v760_v34 = vsub.s32 %v742_v2, %v3265_v51  ;;  %v766_v2 = vsub.s32 %v748_v23, %v3265_v51  ;;  %v785_v9 = vsub.s32 0, %v758_v33  ;;  %v797_v23 = vsub.s32 0, %v762_v19 }
  0xe3   : > { %v788_v27 = vsub.s32 0, %v759_v53  ;;  %v803_v63 = vsub.s32 0, %v764_v55  ;;  %v800_v31 = vsub.s32 0, %v763_v3  ;;  %v749_v25 = vadd.s32 112, %v3163_v49 }
  0xe4   : > { %v791_v12 = vsub.s32 0, %v760_v34  ;;  %v3322_v26 = vmin.u32 %v785_v9, %v758_v33  ;;  %v806_v46 = vsub.s32 0, %v765_v13  ;;  %v354_v49 = vmul.f32 %v3178_v58, %v3149_v37 }
  0xe5   : > { %v3339_v9 = vmin.u32 %v788_v27, %v759_v53  ;;  %v359_v37 = vmul.f32 %v3178_v58, %v3154_v40  ;;  %vm817_vm0 = vcmp.le.s32.totalorder %v3316_v22, 3  ;;  %v443_v40 = vmul.f32 %v3175_v57, %v3200_v6 }
  0xe6   : > { %v3256_v39 = vpop.permute.xlu1 %479  ;;  %v3258_v41 = vpop.permute.xlu0 %487  ;;  %v3383_v53 = vmul.f32 %v3271_v61, %v3180_v59  ;;  %v673_v59 = vmul.f32 %v3271_v61, %v3191_v1  ;;  %vm822_vm3 = vcmp.le.s32.totalorder %v3322_v26, 3 }
  0xe7   : > { %4363 = vst [vmem:[#allocation28_spill] sm:$0xff] %v3256_v39  ;;  %4364 = vst [vmem:[#allocation29_spill] sm:$0xff] %v3258_v41  ;;  %v782_v41 = vsub.s32 0, %v757_v52  ;;  %v809_v39 = vsub.s32 0, %v766_v2  ;;  %vm823_vm8 = vcmp.le.s32.totalorder %v3339_v9, 3  ;;  %v4390_v9 = vld [vmem:[#allocation19_spill] sm:$0xff] }
  0xe9   : > { %v3329_v24 = vmin.u32 %v782_v41, %v757_v52  ;;  %v357_v41 = vmul.f32 %v3178_v58, %v3151_v38  ;;  %v3367_v38 = vmin.u32 %v806_v46, %v765_v13  ;;  %v369_v52 = vmul.f32 %v3178_v58, %v3169_v54 }
  0xea   : > { %v3261_v45 = vpop.permute.xlu1 %483  ;;  %v3263_v48 = vpop.permute.xlu0 %495  ;;  %v3394_v54 = vmul.f32 %v3271_v61, %v3189_v0  ;;  %v3410_v0 = vmul.f32 %v3271_v61, %v3207_v10  ;;  %v3423_v10 = vmul.f32 %v3271_v61, %v3216_v15 }
  0xeb   : > { %4365 = vst [vmem:[#allocation30_spill] sm:$0xff] %v3263_v48  ;;  %v773_v48 = vsub.s32 0, %v754_v32  ;;  %vm821_vm6 = vcmp.le.s32.totalorder %v3329_v24, 3  ;;  %vm829_vm14 = vcmp.le.s32.totalorder %v3367_v38, 3 }
  0xee   : > { %v3276_v7 = vpop.permute.xlu1 %491  ;;  %v3278_v8 = vpop.permute.xlu0 %503 }
  0xef   : > { %4366 = vst [vmem:[#allocation31_spill] sm:$0xff] %v3276_v7  ;;  %4367 = vst [vmem:[#allocation32_spill] sm:$0xff] %v3278_v8  ;;  %v779_v8 = vsub.s32 0, %v756_v18 }
  0xf1   : > { %v3318_v56 = vmin.u32 %v779_v8, %v756_v18  ;;  %v438_v8 = vmul.f32 %v3175_v57, %v3182_v60 }
  0xf2   : > { %v3297_v29 = vpop.permute.xlu1 %499  ;;  %v3299_v20 = vpop.permute.xlu0 %511 }
  0xf3   : > { %4368 = vst [vmem:[#allocation33_spill] sm:$0xff] %v3297_v29  ;;  %4369 = vst [vmem:[#allocation34_spill] sm:$0xff] %v3299_v20  ;;  %v768_v20 = vsub.s32 %v750_v43, %v3265_v51  ;;  %v3320_v43 = vmin.u32 %v773_v48, %v754_v32  ;;  %v3337_v48 = vmin.u32 %v797_v23, %v762_v19  ;;  %vm820_vm1 = vcmp.le.s32.totalorder %v3318_v56, 3 }
  0xf4   : > { %v3341_v32 = vmin.u32 %v803_v63, %v764_v55  ;;  %v538_v19 = vmul.f32 %v3271_v61, %v3252_v35  ;;  %v3358_v63 = vsub.s32 %v749_v25, %v3265_v51  ;;  %v365_v35 = vmul.f32 %v3178_v58, %v3161_v47 }
  0xf5   : > { %v815_v7 = vsub.s32 0, %v768_v20  ;;  %v454_v51 = vadd.f32 %v438_v8, %v354_v49  ;;  %v670_v55 = vmul.f32 %v3271_v61, %v3182_v60  ;;  %v459_v60 = vadd.f32 %v443_v40, %v359_v37 }
  0xf6   : > { %v3312_v17 = vpop.permute.xlu1 %507  ;;  %v3314_v29 = vpop.permute.xlu0 %519  ;;  %v4373_v37 = vld [vmem:[#allocation31_spill] sm:$0xff]  ;;  %vm818_vm2 = vcmp.le.s32.totalorder %v3320_v43, 3  ;;  %vm826_vm7 = vcmp.le.s32.totalorder %v3337_v48, 3  ;;  %vm828_vm9 = vcmp.le.s32.totalorder %v3341_v32, 3 }
  0xf7   : > { %4370 = vst [vmem:[#allocation35_spill] sm:$0xff] %v3312_v17  ;;  %4371 = vst [vmem:[#allocation36_spill] sm:$0xff] %v3314_v29  ;;  %v3325_v17 = vmin.u32 %v776_v4, %v755_v30  ;;  %v3327_v29 = vmin.u32 %v791_v12, %v760_v34  ;;  %v3345_v4 = vmin.u32 %v794_v28, %v761_v62 }
  0xf8   : > { %v3347_v30 = vmin.u32 %v809_v39, %v766_v2  ;;  %v3349_v34 = vmin.u32 %v800_v31, %v763_v3  ;;  %v3355_v33 = vmin.u32 %v815_v7, %v768_v20  ;;  %v361_v39 = vmul.f32 %v3178_v58, %v3157_v42 }
  0xf9   : > { %v441_v31 = vmul.f32 %v3175_v57, %v3191_v1  ;;  %v363_v20 = vmul.f32 %v3178_v58, %v3159_v44  ;;  %v367_v42 = vmul.f32 %v3178_v58, %v3165_v50  ;;  %v445_v44 = vmul.f32 %v3175_v57, %v3209_v11 }
  0xfa   : > { %v3333_v18 = vpop.permute.xlu1 %515  ;;  %v3335_v21 = vpop.permute.xlu0 %527  ;;  %v554_v62 = vadd.f32 %v538_v19, %v454_v51  ;;  %v541_v2 = vmul.f32 %v3271_v61, %v3261_v45  ;;  %v3400_v12 = vmul.f32 %v3271_v61, %v3198_v5  ;;  %v675_v45 = vmul.f32 %v3271_v61, %v3200_v6 }
  0xfb   : > { %v457_v3 = vadd.f32 %v441_v31, %v357_v41  ;;  %v461_v1 = vadd.f32 %v445_v44, %v361_v39  ;;  %v3414_v5 = vmul.f32 %v3271_v61, %v3209_v11  ;;  %v447_v28 = vmul.f32 %v3175_v57, %v3218_v16  ;;  %v4372_v11 = vld [vmem:[#allocation20_spill] sm:$0xff] }
  0xfc   : > { %v539_v6 = vmul.f32 %v3271_v61, %v3254_v36  ;;  %v3427_v41 = vmul.f32 %v3271_v61, %v3218_v16  ;;  %v449_v19 = vmul.f32 %v3175_v57, %v4372_v11  ;;  %v543_v39 = vmul.f32 %v3271_v61, %v4373_v37  ;;  %v4374_v36 = vld [vmem:[#allocation23_spill] sm:$0xff] }
  0xfd   : > { %v557_v46 = vadd.f32 %v541_v2, %v457_v3  ;;  %v451_v31 = vmul.f32 %v3175_v57, %v4374_v36  ;;  %v463_v44 = vadd.f32 %v447_v28, %v363_v20  ;;  %v3440_v16 = vmul.f32 %v3271_v61, %v4372_v11 }
  0xfe   : > { %v3375_v7 = vpop.permute.xlu1 %523  ;;  %v465_v28 = vadd.f32 %v449_v19, %v365_v35  ;;  %vm819_vm4 = vcmp.le.s32.totalorder %v3325_v17, 3  ;;  %vm824_vm5 = vcmp.le.s32.totalorder %v3327_v29, 3  ;;  %vm825_vm10 = vcmp.le.s32.totalorder %v3345_v4, 3  ;;  %v4389_v48 = vld [vmem:[#allocation36_spill] sm:$0xff] }
  0xff   : > { %v572_v47 = vpop.permute.xlu0 %571  ;;  %v3457_v37 = vadd.f32 %v451_v31, %v367_v42  ;;  %vm830_vm11 = vcmp.le.s32.totalorder %v3347_v30, 3  ;;  %vm827_vm12 = vcmp.le.s32.totalorder %v3349_v34, 3  ;;  %v552_v32 = vmul.f32 %v3271_v61, %v3335_v21 }
 0x100   : > { %v638_v50 = vmul.f32 %v3308_v14, %v572_v47  ;;  %v702_v23 = vmul.f32 %v572_v47, %v3178_v58  ;;  %v4375_v47 = vld [vmem:[#allocation26_spill] sm:$0xff]  ;;  %vm832_vm13 = vcmp.le.s32.totalorder %v3355_v33, 3 }
 0x102   : > { %v654_v13 = vadd.f32 %v638_v50, %v554_v62  ;;  %v3406_v27 = vpop.permute.xlu1 %531  ;;  %v4376_v62 = vld [vmem:[#allocation28_spill] sm:$0xff] }
 0x103   : > { %v584_v25 = vpop.permute.xlu0 %583  ;;  %v540_v2 = vmul.f32 %v3271_v61, %v4376_v62 }
 0x104   : > { %v686_v8 = vadd.f32 %v670_v55, %v654_v13  ;;  %v641_v49 = vmul.f32 %v3308_v14, %v584_v25  ;;  %v705_v15 = vmul.f32 %v584_v25, %v3178_v58  ;;  %v453_v55 = vmul.f32 %v3175_v57, %v4375_v47  ;;  %v4377_v13 = vld [vmem:[#allocation14_spill] sm:$0xff] }
 0x106   : > { %v718_v51 = vadd.f32 %v702_v23, %v686_v8  ;;  %v657_v40 = vadd.f32 %v641_v49, %v557_v46  ;;  %v555_v23 = vadd.f32 %v539_v6, %v4377_v13  ;;  %v559_v8 = vadd.f32 %v543_v39, %v459_v60  ;;  %v4378_v49 = vld [vmem:[#allocation33_spill] sm:$0xff]  ;;  %v4380_v60 = vld [vmem:[#allocation15_spill] sm:$0xff] }
 0x107   : > { %v576_v50 = vpop.permute.xlu1 %575  ;;  %v592_v3 = vpop.permute.xlu0 %591  ;;  %v545_v11 = vmul.f32 %v3271_v61, %v4378_v49  ;;  %v4379_v6 = vld [vmem:[#allocation29_spill] sm:$0xff]  ;;  %v3462_v35 = vadd.f32 %v453_v55, %v369_v52  ;;  %v556_v19 = vadd.f32 %v540_v2, %v4380_v60  ;;  %v4381_v39 = vld [vmem:[#allocation35_spill] sm:$0xff] }
 0x108   : > { %v3449_v25 = vsel %vm817_vm0, 0.0, %v718_v51  ;;  %v689_v46 = vadd.f32 %v673_v59, %v657_v40  ;;  %v639_v20 = vmul.f32 %v3308_v14, %v576_v50  ;;  %v643_v57 = vmul.f32 %v3308_v14, %v592_v3 }
 0x109   : > { %849 = vst [vmem:[#allocation2 + $0x30] sm:$0xff] %v3449_v25  ;;  %v542_v22 = vmul.f32 %v3271_v61, %v4379_v6  ;;  %v547_v40 = vmul.f32 %v3271_v61, %v4381_v39  ;;  %v561_v52 = vadd.f32 %v545_v11, %v461_v1  ;;  %v707_v2 = vmul.f32 %v592_v3, %v3178_v58 }
 0x10a   : > { %v721_v51 = vadd.f32 %v705_v15, %v689_v46  ;;  %v655_v59 = vadd.f32 %v639_v20, %v555_v23  ;;  %v659_v62 = vadd.f32 %v643_v57, %v559_v8  ;;  %v703_v15 = vmul.f32 %v576_v50, %v3178_v58  ;;  %v4382_v20 = vld [vmem:[#allocation16_spill] sm:$0xff]  ;;  %v4383_v8 = vld [vmem:[#allocation30_spill] sm:$0xff] }
 0x10b   : > { %v580_v13 = vpop.permute.xlu1 %579  ;;  %v600_v49 = vpop.permute.xlu0 %599  ;;  %v558_v56 = vadd.f32 %v542_v22, %v4382_v20  ;;  %v544_v57 = vmul.f32 %v3271_v61, %v4383_v8  ;;  %v563_v50 = vadd.f32 %v547_v40, %v463_v44  ;;  %v549_v1 = vmul.f32 %v3271_v61, %v3333_v18  ;;  %v4384_v40 = vld [vmem:[#allocation17_spill] sm:$0xff] }
 0x10c   : > { %v3469_v42 = vsel %vm820_vm1, 0.0, %v721_v51  ;;  %v687_v31 = vadd.f32 %v3383_v53, %v655_v59  ;;  %v640_v23 = vmul.f32 %v3308_v14, %v580_v13  ;;  %v691_v55 = vadd.f32 %v675_v45, %v659_v62  ;;  %v4385_v62 = vld [vmem:[#allocation32_spill] sm:$0xff] }
 0x10d   : > { %852 = vst [vmem:[#allocation2 + $0x18] sm:$0xff] %v3469_v42  ;;  %v645_v46 = vmul.f32 %v3308_v14, %v600_v49  ;;  %v704_v60 = vmul.f32 %v580_v13, %v3178_v58  ;;  %v709_v39 = vmul.f32 %v600_v49, %v3178_v58  ;;  %v546_v13 = vmul.f32 %v3271_v61, %v4385_v62 }
 0x10e   : > { %v719_v53 = vadd.f32 %v703_v15, %v687_v31  ;;  %v656_v6 = vadd.f32 %v640_v23, %v556_v19  ;;  %v723_v45 = vadd.f32 %v707_v2, %v691_v55  ;;  %v565_v26 = vadd.f32 %v549_v1, %v465_v28 }
 0x10f   : > { %v661_v11 = vadd.f32 %v645_v46, %v561_v52  ;;  %v588_v3 = vpop.permute.xlu1 %587  ;;  %v608_v51 = vpop.permute.xlu0 %607 }
 0x110   : > { %v3486_v59 = vsel %vm818_vm2, 0.0, %v719_v53  ;;  %v688_v22 = vadd.f32 %v3394_v54, %v656_v6  ;;  %v642_v19 = vmul.f32 %v3308_v14, %v588_v3  ;;  %v3494_v44 = vsel %vm822_vm3, 0.0, %v723_v45  ;;  %v4387_v53 = vld [vmem:[#allocation34_spill] sm:$0xff] }
 0x111   : > { %850 = vst [vmem:[#allocation2] sm:$0xff] %v3486_v59  ;;  %v693_v18 = vadd.f32 %v3414_v5, %v661_v11  ;;  %v647_v43 = vmul.f32 %v3308_v14, %v608_v51  ;;  %v560_v54 = vadd.f32 %v544_v57, %v4384_v40  ;;  %854 = vst [vmem:[#allocation2 + $0x68] sm:$0xff] %v3494_v44  ;;  %v4386_v57 = vld [vmem:[#allocation18_spill] sm:$0xff] }
 0x112   : > { %v720_v31 = vadd.f32 %v704_v60, %v688_v22  ;;  %v658_v15 = vadd.f32 %v642_v19, %v558_v56  ;;  %v551_v5 = vmul.f32 %v3271_v61, %v3375_v7  ;;  %v706_v20 = vmul.f32 %v588_v3, %v3178_v58 }
 0x113   : > { %v725_v49 = vadd.f32 %v709_v39, %v693_v18  ;;  %v663_v23 = vadd.f32 %v647_v43, %v563_v50  ;;  %v596_v52 = vpop.permute.xlu1 %595  ;;  %v616_v55 = vpop.permute.xlu0 %615  ;;  %v711_v8 = vmul.f32 %v608_v51, %v3178_v58  ;;  %v548_v6 = vmul.f32 %v3271_v61, %v4387_v53  ;;  %v4388_v43 = vld [vmem:[#allocation21_spill] sm:$0xff] }
 0x114   : > { %v3509_v2 = vsel %vm819_vm4, 0.0, %v720_v31  ;;  %v690_v46 = vadd.f32 %v3400_v12, %v658_v15  ;;  %v644_v56 = vmul.f32 %v3308_v14, %v596_v52  ;;  %v649_v17 = vmul.f32 %v3308_v14, %v616_v55 }
 0x115   : > { %851 = vst [vmem:[#allocation2 + $0x58] sm:$0xff] %v3509_v2  ;;  %v3517_v28 = vsel %vm824_vm5, 0.0, %v725_v49  ;;  %v695_v7 = vadd.f32 %v3427_v41, %v663_v23  ;;  %v562_v12 = vadd.f32 %v546_v13, %v4386_v57  ;;  %v567_v29 = vadd.f32 %v551_v5, %v3457_v37 }
 0x116   : > { %856 = vst [vmem:[#allocation2 + $0x48] sm:$0xff] %v3517_v28  ;;  %v722_v50 = vadd.f32 %v706_v20, %v690_v46  ;;  %v660_v1 = vadd.f32 %v644_v56, %v560_v54  ;;  %v553_v41 = vmul.f32 %v3271_v61, %v3406_v27  ;;  %v665_v11 = vadd.f32 %v649_v17, %v565_v26  ;;  %v4391_v17 = vld [vmem:[#allocation24_spill] sm:$0xff] }
 0x117   : > { %v727_v45 = vadd.f32 %v711_v8, %v695_v7  ;;  %v604_v3 = vpop.permute.xlu1 %603  ;;  %v624_v51 = vpop.permute.xlu0 %623  ;;  %v708_v19 = vmul.f32 %v596_v52, %v3178_v58  ;;  %v713_v39 = vmul.f32 %v616_v55, %v3178_v58  ;;  %v564_v40 = vadd.f32 %v548_v6, %v4388_v43 }
 0x118   : > { %v3533_v22 = vsel %vm821_vm6, 0.0, %v722_v50  ;;  %v692_v60 = vadd.f32 %v3410_v0, %v660_v1  ;;  %v646_v18 = vmul.f32 %v3308_v14, %v604_v3  ;;  %v697_v27 = vadd.f32 %v3440_v16, %v665_v11 }
 0x119   : > { %853 = vst [vmem:[#allocation2 + $0x50] sm:$0xff] %v3533_v22  ;;  %v3541_v37 = vsel %vm826_vm7, 0.0, %v727_v45  ;;  %v651_v24 = vmul.f32 %v3308_v14, %v624_v51  ;;  %v683_v0 = vmul.f32 %v3271_v61, %v4374_v36  ;;  %v550_v13 = vmul.f32 %v3271_v61, %v4389_v48 }
 0x11a   : > { %858 = vst [vmem:[#allocation2 + $0x20] sm:$0xff] %v3541_v37  ;;  %v724_v54 = vadd.f32 %v708_v19, %v692_v60  ;;  %v662_v62 = vadd.f32 %v646_v18, %v562_v12  ;;  %v569_v16 = vadd.f32 %v553_v41, %v3462_v35  ;;  %v729_v31 = vadd.f32 %v713_v39, %v697_v27  ;;  %v4393_v19 = vld [vmem:[#allocation27_spill] sm:$0xff] }
 0x11b   : > { %v667_v15 = vadd.f32 %v651_v24, %v567_v29  ;;  %v612_v26 = vpop.permute.xlu1 %611  ;;  %v632_v5 = vpop.permute.xlu0 %631  ;;  %v710_v23 = vmul.f32 %v604_v3, %v3178_v58  ;;  %v715_v46 = vmul.f32 %v624_v51, %v3178_v58  ;;  %v680_v56 = vmul.f32 %v3271_v61, %v4390_v9  ;;  %v4392_v3 = vld [vmem:[#allocation22_spill] sm:$0xff] }
 0x11c   : > { %v3556_v49 = vsel %vm823_vm8, 0.0, %v724_v54  ;;  %v694_v36 = vadd.f32 %v3423_v10, %v662_v62  ;;  %v648_v52 = vmul.f32 %v3308_v14, %v612_v26  ;;  %v3564_v55 = vsel %vm828_vm9, 0.0, %v729_v31  ;;  %v4394_v54 = vld [vmem:[#allocation25_spill] sm:$0xff] }
 0x11d   : > { %855 = vst [vmem:[#allocation2 + $0x8] sm:$0xff] %v3556_v49  ;;  %v699_v35 = vadd.f32 %v683_v0, %v667_v15  ;;  %v653_v20 = vmul.f32 %v3308_v14, %v632_v5  ;;  %v685_v10 = vmul.f32 %v3271_v61, %v4375_v47  ;;  %860 = vst [vmem:[#allocation2 + $0x38] sm:$0xff] %v3564_v55  ;;  %v812_v11 = vsub.s32 0, %v3358_v63 }
 0x11e   : > { %v726_v7 = vadd.f32 %v710_v23, %v694_v36  ;;  %v664_v8 = vadd.f32 %v648_v52, %v564_v40  ;;  %v566_v57 = vadd.f32 %v550_v13, %v4391_v17  ;;  %v712_v29 = vmul.f32 %v612_v26, %v3178_v58 }
 0x11f   : > { %v731_v12 = vadd.f32 %v715_v46, %v699_v35  ;;  %v669_v53 = vadd.f32 %v653_v20, %v569_v16  ;;  %v620_v6 = vpop.permute.xlu1 %619  ;;  %v717_v21 = vmul.f32 %v632_v5, %v3178_v58  ;;  %v682_v4 = vmul.f32 %v3271_v61, %v4392_v3 }
 0x120   : > { %v3578_v50 = vsel %vm825_vm10, 0.0, %v726_v7  ;;  %v696_v1 = vadd.f32 %v680_v56, %v664_v8  ;;  %v650_v47 = vmul.f32 %v3308_v14, %v620_v6  ;;  %v568_v18 = vadd.f32 %v552_v32, %v4393_v19 }
 0x121   : > { %857 = vst [vmem:[#allocation2 + $0x40] sm:$0xff] %v3578_v50  ;;  %v3585_v41 = vsel %vm830_vm11, 0.0, %v731_v12  ;;  %v701_v45 = vadd.f32 %v685_v10, %v669_v53  ;;  %v714_v0 = vmul.f32 %v620_v6, %v3178_v58  ;;  %v2318_v33 = vmin.u32 %v812_v11, %v3358_v63 }
 0x122   : > { %862 = vst [vmem:[#allocation2 + $0x70] sm:$0xff] %v3585_v41  ;;  %v728_v51 = vadd.f32 %v712_v29, %v696_v1  ;;  %v666_v60 = vadd.f32 %v650_v47, %v566_v57  ;;  %v684_v62 = vmul.f32 %v3271_v61, %v4394_v54 }
 0x123   : > { %v733_v27 = vadd.f32 %v717_v21, %v701_v45  ;;  %v628_v30 = vpop.permute.xlu1 %627  ;;  %vm831_vm15 = vcmp.le.s32.totalorder %v2318_v33, 3 }
 0x124   : > { %v3596_v39 = vsel %vm827_vm12, 0.0, %v728_v51  ;;  %v698_v24 = vadd.f32 %v682_v4, %v666_v60  ;;  %v652_v43 = vmul.f32 %v3308_v14, %v628_v30  ;;  %v716_v14 = vmul.f32 %v628_v30, %v3178_v58 }
 0x125   : > { %859 = vst [vmem:[#allocation2 + $0x10] sm:$0xff] %v3596_v39  ;;  %v3601_v40 = vsel %vm832_vm13, 0.0, %v733_v27 }
 0x126   : > { %864 = vst [vmem:[#allocation2 + $0x28] sm:$0xff] %v3601_v40  ;;  %v730_v34 = vadd.f32 %v714_v0, %v698_v24  ;;  %v668_v48 = vadd.f32 %v652_v43, %v568_v18 }
 0x128   : > { %v3608_v13 = vsel %vm829_vm14, 0.0, %v730_v34  ;;  %v700_v16 = vadd.f32 %v684_v62, %v668_v48 }
 0x129   : > { %861 = vst [vmem:[#allocation2 + $0x60] sm:$0xff] %v3608_v13 }
 0x12a   : > { %v732_v31 = vadd.f32 %v716_v14, %v700_v16 }
 0x12c   : > { %v3612_v15 = vsel %vm831_vm15, 0.0, %v732_v31 }
 0x12d   : > { %863 = vst [vmem:[#allocation2 + $0x78] sm:$0xff] %v3612_v15 }
 0x12e   : > { %2878 = dma.done.wait [#allocation8], 2048 }
 0x12f   : > { %2879 = vsyncadd [#allocation8], 4294965248  ;;  %v3615_v61 = vld [vmem:[#allocation3 + $0x28] sm:$0xff]  ;;  %v3619_v38 = vld [vmem:[#allocation3 + $0x10] sm:$0xff]  ;;  %vm1416_vm0 = vcmask 7168  }
 0x130   : > { %v3617_v63 = vld [vmem:[#allocation3 + $0x68] sm:$0xff]  ;;  %v2320_v26 = vadd.f32 -2.1972246, %v3615_v61  ;;  %v2322_v5 = vadd.f32 -2.1972246, %v3619_v38  ;;  %v3624_v36 = vld [vmem:[#allocation3 + $0x40] sm:$0xff] }
 0x131   : > { %v2321_v58 = vadd.f32 -2.1972246, %v3617_v63  ;;  %v3626_v23 = vld [vmem:[#allocation3 + $0x48] sm:$0xff]  ;;  %v3628_v52 = vld [vmem:[#allocation3 + $0x30] sm:$0xff]  ;;  %v2323_v9 = vadd.f32 -2.1972246, %v3624_v36 }
 0x132   : > { %v2336_v35 = vmul.f32 -1.442695, %v2320_v26  ;;  %v2338_v20 = vmul.f32 -1.442695, %v2322_v5  ;;  %v2324_v56 = vadd.f32 -2.1972246, %v3626_v23 }
 0x133   : > { %v2337_v46 = vmul.f32 -1.442695, %v2321_v58  ;;  %v2325_v10 = vadd.f32 -2.1972246, %v3628_v52  ;;  %v3633_v7 = vld [vmem:[#allocation3 + $0x70] sm:$0xff]  ;;  %v3635_v8 = vld [vmem:[#allocation3 + $0x38] sm:$0xff] }
 0x134   : > { %2562 = vpow2.f32 %v2336_v35  ;;  %v3637_v17 = vld [vmem:[#allocation3 + $0x20] sm:$0xff]  ;;  %v2339_v57 = vmul.f32 -1.442695, %v2323_v9  ;;  %v2340_v32 = vmul.f32 -1.442695, %v2324_v56  ;;  %v3642_v29 = vld [vmem:[#allocation3 + $0x78] sm:$0xff] }
 0x135   : > { %2564 = vpow2.f32 %v2337_v46  ;;  %v2341_v12 = vmul.f32 -1.442695, %v2325_v10  ;;  %v2326_v53 = vadd.f32 -2.1972246, %v3633_v7  ;;  %v2327_v6 = vadd.f32 -2.1972246, %v3635_v8 }
 0x136   : > { %2566 = vpow2.f32 %v2338_v20  ;;  %v2328_v1 = vadd.f32 -2.1972246, %v3637_v17  ;;  %v3644_v47 = vld [vmem:[#allocation3 + $0x18] sm:$0xff]  ;;  %v2329_v4 = vadd.f32 -2.1972246, %v3642_v29  ;;  %v3651_v19 = vld [vmem:[#allocation3] sm:$0xff] }
 0x137   : > { %2568 = vpow2.f32 %v2339_v57  ;;  %v3646_v45 = vld [vmem:[#allocation3 + $0x58] sm:$0xff]  ;;  %v2342_v21 = vmul.f32 -1.442695, %v2326_v53  ;;  %v2343_v11 = vmul.f32 -1.442695, %v2327_v6  ;;  %v3653_v18 = vld [vmem:[#allocation3 + $0x8] sm:$0xff] }
 0x138   : > { %2570 = vpow2.f32 %v2340_v32  ;;  %v2344_v3 = vmul.f32 -1.442695, %v2328_v1  ;;  %v2330_v51 = vadd.f32 -2.1972246, %v3644_v47  ;;  %v2331_v60 = vadd.f32 -2.1972246, %v3646_v45 }
 0x139   : > { %2572 = vpow2.f32 %v2341_v12  ;;  %v3655_v27 = vld [vmem:[#allocation3 + $0x60] sm:$0xff]  ;;  %v2345_v30 = vmul.f32 -1.442695, %v2329_v4  ;;  %v2332_v43 = vadd.f32 -2.1972246, %v3651_v19  ;;  %v3660_v62 = vld [vmem:[#allocation3 + $0x50] sm:$0xff] }
 0x13a   : > { %2574 = vpow2.f32 %v2342_v21  ;;  %v2346_v24 = vmul.f32 -1.442695, %v2330_v51  ;;  %v2347_v0 = vmul.f32 -1.442695, %v2331_v60  ;;  %v2333_v33 = vadd.f32 -2.1972246, %v3653_v18 }
 0x13b   : > { %2576 = vpow2.f32 %v2343_v11  ;;  %v2334_v54 = vadd.f32 -2.1972246, %v3655_v27  ;;  %v2348_v34 = vmul.f32 -1.442695, %v2332_v43  ;;  %v2335_v14 = vadd.f32 -2.1972246, %v3660_v62 }
 0x13c   : > { %2578 = vpow2.f32 %v2344_v3  ;;  %v2349_v48 = vmul.f32 -1.442695, %v2333_v33 }
 0x13d   : > { %2580 = vpow2.f32 %v2345_v30  ;;  %v2350_v16 = vmul.f32 -1.442695, %v2334_v54  ;;  %v2351_v26 = vmul.f32 -1.442695, %v2335_v14 }
 0x13e   : > { %2582 = vpow2.f32 %v2346_v24 }
 0x13f   : > { %2584 = vpow2.f32 %v2347_v0 }
 0x140   : > { %2586 = vpow2.f32 %v2348_v34 }
 0x141   : > { %v2563_v31 = vpop.eup %2562  ;;  %2588 = vpow2.f32 %v2349_v48 }
 0x142   : > { %v2565_v58 = vpop.eup %2564  ;;  %v952_v5 = vadd.f32 1.0, %v2563_v31  ;;  %2590 = vpow2.f32 %v2350_v16 }
 0x143   : > { %v2567_v35 = vpop.eup %2566  ;;  %v953_v46 = vadd.f32 1.0, %v2565_v58  ;;  %2592 = vpow2.f32 %v2351_v26 }
 0x144   : > { %v2569_v20 = vpop.eup %2568  ;;  %2594 = vrcp.f32 %v952_v5  ;;  %v954_v9 = vadd.f32 1.0, %v2567_v35 }
 0x145   : > { %v2571_v56 = vpop.eup %2570  ;;  %2596 = vrcp.f32 %v953_v46  ;;  %v955_v10 = vadd.f32 1.0, %v2569_v20 }
 0x146   : > { %v2573_v57 = vpop.eup %2572  ;;  %2598 = vrcp.f32 %v954_v9  ;;  %v956_v32 = vadd.f32 1.0, %v2571_v56 }
 0x147   : > { %v2575_v12 = vpop.eup %2574  ;;  %2600 = vrcp.f32 %v955_v10  ;;  %v957_v53 = vadd.f32 1.0, %v2573_v57 }
 0x148   : > { %v2577_v6 = vpop.eup %2576  ;;  %2602 = vrcp.f32 %v956_v32  ;;  %v958_v1 = vadd.f32 1.0, %v2575_v12 }
 0x149   : > { %v2579_v21 = vpop.eup %2578  ;;  %2604 = vrcp.f32 %v957_v53  ;;  %v959_v11 = vadd.f32 1.0, %v2577_v6 }
 0x14a   : > { %v2581_v3 = vpop.eup %2580  ;;  %2606 = vrcp.f32 %v958_v1  ;;  %v960_v4 = vadd.f32 1.0, %v2579_v21 }
 0x14b   : > { %v2583_v51 = vpop.eup %2582  ;;  %2608 = vrcp.f32 %v959_v11  ;;  %v961_v60 = vadd.f32 1.0, %v2581_v3 }
 0x14c   : > { %v2585_v30 = vpop.eup %2584  ;;  %v962_v24 = vadd.f32 1.0, %v2583_v51  ;;  %2610 = vrcp.f32 %v960_v4 }
 0x14d   : > { %v2587_v0 = vpop.eup %2586  ;;  %v963_v43 = vadd.f32 1.0, %v2585_v30  ;;  %2612 = vrcp.f32 %v961_v60 }
 0x14e   : > { %v2589_v33 = vpop.eup %2588  ;;  %v964_v54 = vadd.f32 1.0, %v2587_v0  ;;  %2614 = vrcp.f32 %v962_v24 }
 0x14f   : > { %v2591_v34 = vpop.eup %2590  ;;  %v965_v48 = vadd.f32 1.0, %v2589_v33  ;;  %2616 = vrcp.f32 %v963_v43 }
 0x150   : > { %v2593_v16 = vpop.eup %2592  ;;  %v966_v14 = vadd.f32 1.0, %v2591_v34  ;;  %2618 = vrcp.f32 %v964_v54 }
 0x151   : > { %v2595_v31 = vpop.eup %2594  ;;  %v967_v26 = vadd.f32 1.0, %v2593_v16  ;;  %2620 = vrcp.f32 %v965_v48 }
 0x152   : > { %v2597_v58 = vpop.eup %2596  ;;  %v3664_v5 = vmul.f32 %v2595_v31, %v3615_v61  ;;  %2622 = vrcp.f32 %v966_v14 }
 0x153   : > { %v2599_v35 = vpop.eup %2598  ;;  %v3667_v46 = vmul.f32 %v2597_v58, %v3617_v63  ;;  %2624 = vrcp.f32 %v967_v26 }
 0x154   : > { %v2601_v20 = vpop.eup %2600  ;;  %v2352_v9 = vmul.f32 -1.442695, %v3664_v5  ;;  %v2368_v56 = vadd.f32 -2.1972246, %v3664_v5  ;;  %v3672_v10 = vmul.f32 %v2599_v35, %v3619_v38  ;;  %1256 = vxpose.xlu0.b32.start [1/16] %v3664_v5, 128 }
 0x155   : > { %v2603_v57 = vpop.eup %2602  ;;  %v2353_v61 = vmul.f32 -1.442695, %v3667_v46  ;;  %v2369_v32 = vadd.f32 -2.1972246, %v3667_v46  ;;  %v3678_v63 = vmul.f32 %v2601_v20, %v3624_v36 }
 0x156   : > { %v2605_v12 = vpop.eup %2604  ;;  %2626 = vpow2.f32 %v2352_v9  ;;  %v2384_v53 = vmul.f32 -1.442695, %v2368_v56  ;;  %v2354_v6 = vmul.f32 -1.442695, %v3672_v10  ;;  %v2370_v38 = vadd.f32 -2.1972246, %v3672_v10 }
 0x157   : > { %v2607_v1 = vpop.eup %2606  ;;  %2628 = vpow2.f32 %v2353_v61  ;;  %v2385_v21 = vmul.f32 -1.442695, %v2369_v32  ;;  %v2355_v11 = vmul.f32 -1.442695, %v3678_v63  ;;  %v2371_v3 = vadd.f32 -2.1972246, %v3678_v63 }
 0x158   : > { %v2609_v4 = vpop.eup %2608  ;;  %2630 = vpow2.f32 %v2384_v53  ;;  %v2386_v51 = vmul.f32 -1.442695, %v2370_v38  ;;  %v3685_v36 = vmul.f32 %v2603_v57, %v3626_v23  ;;  %1257 = vxpose.xlu0.b32.cont [2/16] %v3667_v46, 128  ;;  %v3689_v60 = vmul.f32 %v2605_v12, %v3628_v52 }
 0x159   : > { %2632 = vpow2.f32 %v2385_v21  ;;  %v2387_v30 = vmul.f32 -1.442695, %v2371_v3  ;;  %v3692_v24 = vmul.f32 %v2607_v1, %v3633_v7  ;;  %v3695_v0 = vmul.f32 %v2609_v4, %v3635_v8  ;;  %v2611_v23 = vpop.eup %2610 }
 0x15a   : > { %2634 = vpow2.f32 %v2354_v6  ;;  %v2356_v43 = vmul.f32 -1.442695, %v3685_v36  ;;  %v2372_v33 = vadd.f32 -2.1972246, %v3685_v36  ;;  %v2373_v54 = vadd.f32 -2.1972246, %v3689_v60  ;;  %v2613_v34 = vpop.eup %2612 }
 0x15b   : > { %2636 = vpow2.f32 %v2386_v51  ;;  %v2374_v52 = vadd.f32 -2.1972246, %v3692_v24  ;;  %v2357_v7 = vmul.f32 -1.442695, %v3689_v60  ;;  %v2615_v8 = vpop.eup %2614  ;;  %v2375_v14 = vadd.f32 -2.1972246, %v3695_v0 }
 0x15c   : > { %2638 = vpow2.f32 %v2355_v11  ;;  %v2388_v48 = vmul.f32 -1.442695, %v2372_v33  ;;  %1258 = vxpose.xlu0.b32.cont [3/16] %v3672_v10, 128  ;;  %v2389_v16 = vmul.f32 -1.442695, %v2373_v54  ;;  %v3704_v31 = vpop.eup %2616  ;;  %v2358_v26 = vmul.f32 -1.442695, %v3692_v24 }
 0x15d   : > { %2640 = vpow2.f32 %v2387_v30  ;;  %v3707_v58 = vpop.eup %2618  ;;  %v2390_v35 = vmul.f32 -1.442695, %v2374_v52  ;;  %v2359_v9 = vmul.f32 -1.442695, %v3695_v0  ;;  %v2391_v57 = vmul.f32 -1.442695, %v2375_v14 }
 0x15e   : > { %2642 = vpow2.f32 %v2356_v43  ;;  %v3709_v20 = vpop.eup %2620 }
 0x15f   : > { %2644 = vpow2.f32 %v2388_v48  ;;  %v3713_v56 = vpop.eup %2622 }
 0x160   : > { %2646 = vpow2.f32 %v2357_v7  ;;  %1259 = vxpose.xlu0.b32.cont [4/16] %v3678_v63, 128  ;;  %v3715_v61 = vpop.eup %2624  ;;  %v3720_v7 = vmul.f32 %v2611_v23, %v3637_v17 }
 0x161   : > { %2648 = vpow2.f32 %v2389_v16 }
 0x162   : > { %2650 = vpow2.f32 %v2358_v26  ;;  %v2376_v23 = vadd.f32 -2.1972246, %v3720_v7 }
 0x163   : > { %v2627_v32 = vpop.eup %2626  ;;  %2652 = vpow2.f32 %v2390_v35 }
 0x164   : > { %v2629_v12 = vpop.eup %2628  ;;  %v1064_v53 = vadd.f32 1.0, %v2627_v32  ;;  %2654 = vpow2.f32 %v2359_v9  ;;  %1260 = vxpose.xlu0.b32.cont [5/16] %v3685_v36, 128  ;;  %v3724_v9 = vmul.f32 %v2613_v34, %v3642_v29  ;;  %v3733_v29 = vmul.f32 %v3704_v31, %v3646_v45 }
 0x165   : > { %v2631_v6 = vpop.eup %2630  ;;  %v1065_v38 = vadd.f32 1.0, %v2629_v12  ;;  %2656 = vpow2.f32 %v2391_v57  ;;  %v3727_v12 = vmul.f32 %v2615_v8, %v3644_v47  ;;  %v3740_v45 = vmul.f32 %v3707_v58, %v3651_v19 }
 0x166   : > { %v2633_v1 = vpop.eup %2632  ;;  %2658 = vrcp.f32 %v1064_v53  ;;  %v1176_v21 = vadd.f32 1.0, %v2631_v6  ;;  %v2377_v47 = vadd.f32 -2.1972246, %v3724_v9 }
 0x167   : > { %v2635_v11 = vpop.eup %2634  ;;  %2660 = vrcp.f32 %v1065_v38  ;;  %v1177_v3 = vadd.f32 1.0, %v2633_v1 }
 0x168   : > { %v2637_v4 = vpop.eup %2636  ;;  %2662 = vrcp.f32 %v1176_v21  ;;  %v1066_v51 = vadd.f32 1.0, %v2635_v11  ;;  %1261 = vxpose.xlu0.b32.cont [6/16] %v3689_v60, 128  ;;  %v2360_v11 = vmul.f32 -1.442695, %v3720_v7 }
 0x169   : > { %v2639_v30 = vpop.eup %2638  ;;  %2664 = vrcp.f32 %v1177_v3  ;;  %v1178_v43 = vadd.f32 1.0, %v2637_v4  ;;  %v2378_v3 = vadd.f32 -2.1972246, %v3727_v12 }
 0x16a   : > { %v2641_v33 = vpop.eup %2640  ;;  %2666 = vrcp.f32 %v1066_v51  ;;  %v1067_v54 = vadd.f32 1.0, %v2639_v30  ;;  %v2392_v30 = vmul.f32 -1.442695, %v2376_v23 }
 0x16b   : > { %v2643_v52 = vpop.eup %2642  ;;  %2668 = vrcp.f32 %v1178_v43  ;;  %v1179_v48 = vadd.f32 1.0, %v2641_v33  ;;  %v2361_v43 = vmul.f32 -1.442695, %v3724_v9  ;;  %v2379_v33 = vadd.f32 -2.1972246, %v3733_v29 }
 0x16c   : > { %v2645_v16 = vpop.eup %2644  ;;  %2670 = vrcp.f32 %v1067_v54  ;;  %v1068_v14 = vadd.f32 1.0, %v2643_v52  ;;  %1262 = vxpose.xlu0.b32.cont [7/16] %v3692_v24, 128  ;;  %v3747_v54 = vmul.f32 %v3709_v20, %v3653_v18  ;;  %v2394_v58 = vmul.f32 -1.442695, %v2378_v3 }
 0x16d   : > { %v2647_v26 = vpop.eup %2646  ;;  %2672 = vrcp.f32 %v1179_v48  ;;  %v1180_v35 = vadd.f32 1.0, %v2645_v16  ;;  %v2393_v48 = vmul.f32 -1.442695, %v2377_v47  ;;  %v2362_v16 = vmul.f32 -1.442695, %v3727_v12 }
 0x16e   : > { %v2649_v57 = vpop.eup %2648  ;;  %2674 = vrcp.f32 %v1068_v14  ;;  %v1069_v32 = vadd.f32 1.0, %v2647_v26  ;;  %v2363_v26 = vmul.f32 -1.442695, %v3733_v29  ;;  %v3754_v18 = vmul.f32 %v3713_v56, %v3655_v27 }
 0x16f   : > { %v2651_v53 = vpop.eup %2650  ;;  %2676 = vrcp.f32 %v1180_v35  ;;  %v1181_v17 = vadd.f32 1.0, %v2649_v57  ;;  %v2381_v23 = vadd.f32 -2.1972246, %v3747_v54  ;;  %v2364_v47 = vmul.f32 -1.442695, %v3740_v45 }
 0x170   : > { %v2653_v6 = vpop.eup %2652  ;;  %2678 = vrcp.f32 %v1069_v32  ;;  %v1070_v38 = vadd.f32 1.0, %v2651_v53  ;;  %1263 = vxpose.xlu0.b32.cont [8/16] %v3695_v0, 128  ;;  %v2380_v32 = vadd.f32 -2.1972246, %v3740_v45  ;;  %v2382_v3 = vadd.f32 -2.1972246, %v3754_v18 }
 0x171   : > { %v2655_v34 = vpop.eup %2654  ;;  %2680 = vrcp.f32 %v1181_v17  ;;  %v1182_v1 = vadd.f32 1.0, %v2653_v6  ;;  %v2395_v17 = vmul.f32 -1.442695, %v2379_v33 }
 0x172   : > { %v2657_v8 = vpop.eup %2656  ;;  %2682 = vrcp.f32 %v1070_v38  ;;  %v1071_v21 = vadd.f32 1.0, %v2655_v34 }
 0x173   : > { %v2659_v4 = vpop.eup %2658  ;;  %2684 = vrcp.f32 %v1182_v1  ;;  %v1183_v51 = vadd.f32 1.0, %v2657_v8  ;;  %v3760_v1 = vmul.f32 %v3715_v61, %v3660_v62  ;;  %v2365_v62 = vmul.f32 -1.442695, %v3747_v54 }
 0x174   : > { %v2661_v31 = vpop.eup %2660  ;;  %2686 = vrcp.f32 %v1071_v21  ;;  %1264 = vxpose.xlu0.b32.cont [9/16] %v3720_v7, 128 }
 0x175   : > { %v2663_v52 = vpop.eup %2662  ;;  %2688 = vrcp.f32 %v1183_v51 }
 0x176   : > { %v2665_v14 = vpop.eup %2664  ;;  %v1224_v19 = vmul.f32 %v2663_v52, %v2659_v4  ;;  %2690 = vpow2.f32 %v2360_v11  ;;  %v2396_v11 = vmul.f32 -1.442695, %v2380_v32  ;;  %v2366_v52 = vmul.f32 -1.442695, %v3754_v18 }
 0x177   : > { %v2667_v35 = vpop.eup %2666  ;;  %v1225_v57 = vmul.f32 %v2665_v14, %v2661_v31  ;;  %2692 = vpow2.f32 %v2392_v30  ;;  %v2397_v31 = vmul.f32 -1.442695, %v2381_v23 }
 0x178   : > { %v2669_v20 = vpop.eup %2668  ;;  %1240 = vst [vmem:[#allocation4 + $0x8] sm:$0xff] %v1224_v19  ;;  %v1352_v53 = vmul.f32 %v1224_v19, %v1224_v19  ;;  %2694 = vpow2.f32 %v2361_v43  ;;  %1265 = vxpose.xlu0.b32.cont [10/16] %v3724_v9, 128  ;;  %v2383_v43 = vadd.f32 -2.1972246, %v3760_v1 }
 0x179   : > { %v2671_v6 = vpop.eup %2670  ;;  %1241 = vst [vmem:[#allocation4] sm:$0xff] %v1225_v57  ;;  %v1353_v38 = vmul.f32 %v1225_v57, %v1225_v57  ;;  %v1226_v34 = vmul.f32 %v2669_v20, %v2667_v35  ;;  %2696 = vpow2.f32 %v2393_v48 }
 0x17a   : > { %v2673_v27 = vpop.eup %2672  ;;  %v1368_v56 = vmul.f32 %v1352_v53, %v3449_v25  ;;  %2698 = vpow2.f32 %v2362_v16  ;;  %v2398_v16 = vmul.f32 -1.442695, %v2382_v3  ;;  %v2399_v32 = vmul.f32 -1.442695, %v2383_v43 }
 0x17b   : > { %v2675_v8 = vpop.eup %2674  ;;  %1242 = vst [vmem:[#allocation4 + $0x48] sm:$0xff] %v1226_v34  ;;  %v1227_v21 = vmul.f32 %v2673_v27, %v2671_v6  ;;  %2700 = vpow2.f32 %v2394_v58  ;;  %v1369_v51 = vmul.f32 %v1353_v38, %v3486_v59  ;;  %v1354_v30 = vmul.f32 %v1226_v34, %v1226_v34 }
 0x17c   : > { %v2677_v4 = vpop.eup %2676  ;;  %1384 = vadd.xlane.f32.xlu1 %v1368_v56  ;;  %2702 = vpow2.f32 %v2363_v26  ;;  %1266 = vxpose.xlu0.b32.cont [11/16] %v3727_v12, 128  ;;  %v2367_v26 = vmul.f32 -1.442695, %v3760_v1 }
 0x17d   : > { %v2679_v25 = vpop.eup %2678  ;;  %1243 = vst [vmem:[#allocation4 + $0x60] sm:$0xff] %v1227_v21  ;;  %v1228_v61 = vmul.f32 %v2677_v4, %v2675_v8  ;;  %2704 = vpow2.f32 %v2395_v17  ;;  %v1370_v19 = vmul.f32 %v1354_v30, %v3509_v2  ;;  %v1355_v58 = vmul.f32 %v1227_v21, %v1227_v21 }
 0x17e   : > { %v2681_v33 = vpop.eup %2680  ;;  %2706 = vpow2.f32 %v2364_v47 }
 0x17f   : > { %v2683_v48 = vpop.eup %2682  ;;  %1244 = vst [vmem:[#allocation4 + $0x68] sm:$0xff] %v1228_v61  ;;  %v1229_v59 = vmul.f32 %v2681_v33, %v2679_v25  ;;  %2708 = vpow2.f32 %v2396_v11  ;;  %v1371_v2 = vmul.f32 %v1355_v58, %v3469_v42  ;;  %v1356_v6 = vmul.f32 %v1228_v61, %v1228_v61 }
 0x180   : > { %v2685_v14 = vpop.eup %2684  ;;  %1386 = vadd.xlane.f32.xlu1 %v1369_v51  ;;  %2710 = vpow2.f32 %v2365_v62  ;;  %1267 = vxpose.xlu0.b32.cont [12/16] %v3733_v29, 128 }
 0x181   : > { %v2687_v35 = vpop.eup %2686  ;;  %1245 = vst [vmem:[#allocation4 + $0x18] sm:$0xff] %v1229_v59  ;;  %v1230_v57 = vmul.f32 %v2685_v14, %v2683_v48  ;;  %2712 = vpow2.f32 %v2397_v31  ;;  %v1372_v3 = vmul.f32 %v1356_v6, %v3533_v22  ;;  %v1357_v42 = vmul.f32 %v1229_v59, %v1229_v59 }
 0x182   : > { %v2689_v20 = vpop.eup %2688  ;;  %2714 = vpow2.f32 %v2366_v52 }
 0x183   : > { %v2691_v53 = vpop.eup %2690  ;;  %1246 = vst [vmem:[#allocation4 + $0x10] sm:$0xff] %v1230_v57  ;;  %v1231_v17 = vmul.f32 %v2689_v20, %v2687_v35  ;;  %2716 = vpow2.f32 %v2398_v16  ;;  %v1373_v33 = vmul.f32 %v1357_v42, %v3494_v44  ;;  %v1358_v52 = vmul.f32 %v1230_v57, %v1230_v57 }
 0x184   : > { %v2693_v23 = vpop.eup %2692  ;;  %1388 = vadd.xlane.f32.xlu1 %v1370_v19  ;;  %v1072_v38 = vadd.f32 1.0, %v2691_v53  ;;  %2718 = vpow2.f32 %v2367_v26  ;;  %1268 = vxpose.xlu0.b32.cont [13/16] %v3740_v45, 128 }
 0x185   : > { %v2695_v34 = vpop.eup %2694  ;;  %1247 = vst [vmem:[#allocation4 + $0x38] sm:$0xff] %v1231_v17  ;;  %v1184_v27 = vadd.f32 1.0, %v2693_v23  ;;  %2720 = vpow2.f32 %v2399_v32  ;;  %v1374_v35 = vmul.f32 %v1358_v52, %v3556_v49  ;;  %v1359_v32 = vmul.f32 %v1231_v17, %v1231_v17 }
 0x186   : > { %v2697_v56 = vpop.eup %2696  ;;  %2722 = vrcp.f32 %v1072_v38  ;;  %v1073_v47 = vadd.f32 1.0, %v2695_v34 }
 0x187   : > { %v2699_v8 = vpop.eup %2698  ;;  %2724 = vrcp.f32 %v1184_v27  ;;  %v1185_v21 = vadd.f32 1.0, %v2697_v56  ;;  %v1375_v34 = vmul.f32 %v1359_v32, %v3517_v28 }
 0x188   : > { %v2701_v11 = vpop.eup %2700  ;;  %1390 = vadd.xlane.f32.xlu1 %v1371_v2  ;;  %2726 = vrcp.f32 %v1073_v47  ;;  %v1074_v4 = vadd.f32 1.0, %v2699_v8  ;;  %1269 = vxpose.xlu0.b32.cont [14/16] %v3747_v54, 128 }
 0x189   : > { %v2703_v51 = vpop.eup %2702  ;;  %2728 = vrcp.f32 %v1185_v21  ;;  %v1186_v30 = vadd.f32 1.0, %v2701_v11 }
 0x18a   : > { %v2705_v62 = vpop.eup %2704  ;;  %2730 = vrcp.f32 %v1074_v4  ;;  %v1075_v25 = vadd.f32 1.0, %v2703_v51 }
 0x18b   : > { %v2707_v61 = vpop.eup %2706  ;;  %2732 = vrcp.f32 %v1186_v30  ;;  %v1187_v31 = vadd.f32 1.0, %v2705_v62 }
 0x18c   : > { %v2709_v43 = vpop.eup %2708  ;;  %1392 = vadd.xlane.f32.xlu1 %v1372_v3  ;;  %2734 = vrcp.f32 %v1075_v25  ;;  %v1076_v22 = vadd.f32 1.0, %v2707_v61  ;;  %1270 = vxpose.xlu0.b32.cont [15/16] %v3754_v18, 128 }
 0x18d   : > { %v2711_v48 = vpop.eup %2710  ;;  %2736 = vrcp.f32 %v1187_v31  ;;  %v1188_v59 = vadd.f32 1.0, %v2709_v43 }
 0x18e   : > { %v2713_v16 = vpop.eup %2712  ;;  %2738 = vrcp.f32 %v1076_v22  ;;  %v1077_v14 = vadd.f32 1.0, %v2711_v48 }
 0x18f   : > { %v2715_v19 = vpop.eup %2714  ;;  %2740 = vrcp.f32 %v1188_v59  ;;  %v1189_v58 = vadd.f32 1.0, %v2713_v16 }
 0x190   : > { %v2717_v26 = vpop.eup %2716  ;;  %1394 = vadd.xlane.f32.xlu1 %v1373_v33  ;;  %2742 = vrcp.f32 %v1077_v14  ;;  %v1078_v44 = vadd.f32 1.0, %v2715_v19  ;;  %1271 = vxpose.xlu0.b32.end [16/16] %v3760_v1, 128 }
 0x191   : > { %v2719_v57 = vpop.eup %2718  ;;  %2744 = vrcp.f32 %v1189_v58  ;;  %v1190_v20 = vadd.f32 1.0, %v2717_v26 }
 0x192   : > { %v2721_v53 = vpop.eup %2720  ;;  %2746 = vrcp.f32 %v1078_v44  ;;  %v1079_v23 = vadd.f32 1.0, %v2719_v57 }
 0x193   : > { %v2723_v2 = vpop.eup %2722  ;;  %2748 = vrcp.f32 %v1190_v20  ;;  %v1191_v6 = vadd.f32 1.0, %v2721_v53 }
 0x194   : > { %v2725_v38 = vpop.eup %2724  ;;  %1396 = vadd.xlane.f32.xlu1 %v1374_v35  ;;  %2750 = vrcp.f32 %v1079_v23 }
 0x195   : > { %v2727_v49 = vpop.eup %2726  ;;  %v1232_v17 = vmul.f32 %v2725_v38, %v2723_v2  ;;  %2752 = vrcp.f32 %v1191_v6 }
 0x196   : > { %v2729_v27 = vpop.eup %2728 }
 0x197   : > { %v2731_v56 = vpop.eup %2730  ;;  %1248 = vst [vmem:[#allocation4 + $0x40] sm:$0xff] %v1232_v17  ;;  %v1360_v47 = vmul.f32 %v1232_v17, %v1232_v17  ;;  %v1233_v8 = vmul.f32 %v2729_v27, %v2727_v49 }
 0x198   : > { %v2733_v21 = vpop.eup %2732  ;;  %1398 = vadd.xlane.f32.xlu1 %v1375_v34 }
 0x199   : > { %v2735_v11 = vpop.eup %2734  ;;  %v1376_v3 = vmul.f32 %v1360_v47, %v3578_v50  ;;  %1249 = vst [vmem:[#allocation4 + $0x28] sm:$0xff] %v1233_v8  ;;  %v1361_v42 = vmul.f32 %v1233_v8, %v1233_v8  ;;  %v1234_v4 = vmul.f32 %v2733_v21, %v2731_v56 }
 0x19a   : > { %v2737_v51 = vpop.eup %2736 }
 0x19b   : > { %v2739_v30 = vpop.eup %2738  ;;  %1250 = vst [vmem:[#allocation4 + $0x70] sm:$0xff] %v1234_v4  ;;  %v1235_v28 = vmul.f32 %v2737_v51, %v2735_v11  ;;  %v1377_v25 = vmul.f32 %v1361_v42, %v3541_v37  ;;  %v1362_v61 = vmul.f32 %v1234_v4, %v1234_v4 }
 0x19c   : > { %v2741_v62 = vpop.eup %2740  ;;  %1400 = vadd.xlane.f32.xlu1 %v1376_v3 }
 0x19d   : > { %v2743_v31 = vpop.eup %2742  ;;  %1251 = vst [vmem:[#allocation4 + $0x20] sm:$0xff] %v1235_v28  ;;  %v1236_v43 = vmul.f32 %v2741_v62, %v2739_v30  ;;  %v1378_v48 = vmul.f32 %v1362_v61, %v3596_v39  ;;  %v1363_v59 = vmul.f32 %v1235_v28, %v1235_v28 }
 0x19e   : > { %v2745_v33 = vpop.eup %2744 }
 0x19f   : > { %v2747_v52 = vpop.eup %2746  ;;  %1252 = vst [vmem:[#allocation4 + $0x58] sm:$0xff] %v1236_v43  ;;  %v1237_v22 = vmul.f32 %v2745_v33, %v2743_v31  ;;  %v1379_v37 = vmul.f32 %v1363_v59, %v3564_v55  ;;  %v1364_v26 = vmul.f32 %v1236_v43, %v1236_v43 }
 0x1a0   : > { %v2749_v50 = vpop.eup %2748  ;;  %1402 = vadd.xlane.f32.xlu1 %v1377_v25 }
 0x1a1   : > { %v2751_v16 = vpop.eup %2750  ;;  %1253 = vst [vmem:[#allocation4 + $0x30] sm:$0xff] %v1237_v22  ;;  %v1238_v14 = vmul.f32 %v2749_v50, %v2747_v52  ;;  %v1380_v35 = vmul.f32 %v1364_v26, %v3608_v13  ;;  %v1365_v32 = vmul.f32 %v1237_v22, %v1237_v22 }
 0x1a2   : > { %v2753_v19 = vpop.eup %2752 }
 0x1a3   : > { %1254 = vst [vmem:[#allocation4 + $0x50] sm:$0xff] %v1238_v14  ;;  %v1239_v58 = vmul.f32 %v2753_v19, %v2751_v16  ;;  %v1381_v44 = vmul.f32 %v1365_v32, %v3585_v41  ;;  %v1366_v39 = vmul.f32 %v1238_v14, %v1238_v14 }
 0x1a4   : > { %1404 = vadd.xlane.f32.xlu1 %v1378_v48 }
 0x1a5   : > { %1255 = vst [vmem:[#allocation4 + $0x78] sm:$0xff] %v1239_v58  ;;  %v1382_v57 = vmul.f32 %v1366_v39, %v3612_v15  ;;  %v1367_v20 = vmul.f32 %v1239_v58, %v1239_v58 }
 0x1a7   : > { %v1383_v53 = vmul.f32 %v1367_v20, %v3601_v40 }
 0x1a8   : > { %1406 = vadd.xlane.f32.xlu1 %v1379_v37 }
 0x1ac   : > { %1408 = vadd.xlane.f32.xlu1 %v1380_v35 }
 0x1b0   : > { %1410 = vadd.xlane.f32.xlu1 %v1381_v44 }
 0x1b4   : > { %1412 = vadd.xlane.f32.xlu1 %v1382_v57 }
 0x1b8   : > { %1414 = vadd.xlane.f32.xlu1 %v1383_v53 }
 0x1d0   : > { %v1272_v23 = vpop.trf.xlu0 }
 0x1d1   : > { %v1288_v55 = vadd.f32 %v1272_v23, %v3664_v5 }
 0x1d3   : > { %v1304_v2 = vmul.f32 -0.5, %v1288_v55 }
 0x1d4   : > { %v1273_v6 = vpop.trf.xlu0 }
 0x1d5   : > { %1320 = vst [vmem:[#allocation3 + $0x28] sm:$0xff] %v1304_v2  ;;  %v1289_v13 = vadd.f32 %v1273_v6, %v3667_v46 }
 0x1d7   : > { %v1305_v38 = vmul.f32 -0.5, %v1289_v13 }
 0x1d8   : > { %v1274_v34 = vpop.trf.xlu0 }
 0x1d9   : > { %1321 = vst [vmem:[#allocation3 + $0x68] sm:$0xff] %v1305_v38  ;;  %v1290_v41 = vadd.f32 %v1274_v34, %v3672_v10 }
 0x1db   : > { %v1306_v49 = vmul.f32 -0.5, %v1290_v41 }
 0x1dc   : > { %v1275_v15 = vpop.trf.xlu0 }
 0x1dd   : > { %1322 = vst [vmem:[#allocation3 + $0x10] sm:$0xff] %v1306_v49  ;;  %v1291_v17 = vadd.f32 %v1275_v15, %v3678_v63 }
 0x1df   : > { %v1307_v40 = vmul.f32 -0.5, %v1291_v17 }
 0x1e0   : > { %v1276_v27 = vpop.trf.xlu0 }
 0x1e1   : > { %1323 = vst [vmem:[#allocation3 + $0x40] sm:$0xff] %v1307_v40  ;;  %v1292_v5 = vadd.f32 %v1276_v27, %v3685_v36 }
 0x1e3   : > { %v1308_v56 = vmul.f32 -0.5, %v1292_v5 }
 0x1e4   : > { %v1277_v47 = vpop.trf.xlu0 }
 0x1e5   : > { %1324 = vst [vmem:[#allocation3 + $0x48] sm:$0xff] %v1308_v56  ;;  %v1293_v46 = vadd.f32 %v1277_v47, %v3689_v60 }
 0x1e7   : > { %v1309_v8 = vmul.f32 -0.5, %v1293_v46 }
 0x1e8   : > { %v1278_v21 = vpop.trf.xlu0 }
 0x1e9   : > { %1325 = vst [vmem:[#allocation3 + $0x30] sm:$0xff] %v1309_v8  ;;  %v1294_v10 = vadd.f32 %v1278_v21, %v3692_v24 }
 0x1eb   : > { %v1310_v11 = vmul.f32 -0.5, %v1294_v10 }
 0x1ec   : > { %v1279_v3 = vpop.trf.xlu0 }
 0x1ed   : > { %1326 = vst [vmem:[#allocation3 + $0x70] sm:$0xff] %v1310_v11  ;;  %v1295_v63 = vadd.f32 %v1279_v3, %v3695_v0 }
 0x1ef   : > { %v1311_v42 = vmul.f32 -0.5, %v1295_v63 }
 0x1f0   : > { %v1280_v4 = vpop.trf.xlu0 }
 0x1f1   : > { %1327 = vst [vmem:[#allocation3 + $0x38] sm:$0xff] %v1311_v42  ;;  %v1296_v36 = vadd.f32 %v1280_v4, %v3720_v7 }
 0x1f3   : > { %v1312_v51 = vmul.f32 -0.5, %v1296_v36 }
 0x1f4   : > { %v1281_v30 = vpop.trf.xlu0 }
 0x1f5   : > { %1328 = vst [vmem:[#allocation3 + $0x20] sm:$0xff] %v1312_v51  ;;  %v1297_v60 = vadd.f32 %v1281_v30, %v3724_v9 }
 0x1f7   : > { %v1313_v28 = vmul.f32 -0.5, %v1297_v60 }
 0x1f8   : > { %v1282_v62 = vpop.trf.xlu0 }
 0x1f9   : > { %1329 = vst [vmem:[#allocation3 + $0x78] sm:$0xff] %v1313_v28  ;;  %v1298_v24 = vadd.f32 %v1282_v62, %v3727_v12 }
 0x1fb   : > { %v1314_v25 = vmul.f32 -0.5, %v1298_v24 }
 0x1fc   : > { %v1283_v61 = vpop.trf.xlu0 }
 0x1fd   : > { %1330 = vst [vmem:[#allocation3 + $0x18] sm:$0xff] %v1314_v25  ;;  %v1299_v0 = vadd.f32 %v1283_v61, %v3733_v29 }
 0x1ff   : > { %v1315_v31 = vmul.f32 -0.5, %v1299_v0 }
 0x200   : > { %v1284_v43 = vpop.trf.xlu0 }
 0x201   : > { %1331 = vst [vmem:[#allocation3 + $0x58] sm:$0xff] %v1315_v31  ;;  %v1300_v7 = vadd.f32 %v1284_v43, %v3740_v45 }
 0x203   : > { %v1316_v33 = vmul.f32 -0.5, %v1300_v7 }
 0x204   : > { %v1285_v52 = vpop.trf.xlu0 }
 0x205   : > { %v1385_v22 = vpop.xlane.xlu1 %1384  ;;  %1332 = vst [vmem:[#allocation3] sm:$0xff] %v1316_v33  ;;  %v1301_v9 = vadd.f32 %v1285_v52, %v3747_v54 }
 0x206   : > { %1417 = vst.msk [vmem:[#allocation6] sm:$0xff] %vm1416_vm0, %v1385_v22  ;;  %v2400_v12 = vadd.f32 -1.0, %v1385_v22 }
 0x207   : > { %v1317_v50 = vmul.f32 -0.5, %v1301_v9 }
 0x208   : > { %v1449_v48 = vmax.f32 %v2400_v12, 0.0  ;;  %v1286_v59 = vpop.trf.xlu0 }
 0x209   : > { %v1387_v16 = vpop.xlane.xlu1 %1386  ;;  %1333 = vst [vmem:[#allocation3 + $0x8] sm:$0xff] %v1317_v50  ;;  %v1302_v29 = vadd.f32 %v1286_v59, %v3754_v18 }
 0x20a   : > { %1465 = vst.msk [vmem:[#allocation5] sm:$0xff] %vm1416_vm0, %v1449_v48  ;;  %1418 = vst.msk [vmem:[#allocation6 + $0x8] sm:$0xff] %vm1416_vm0, %v1387_v16  ;;  %v2401_v45 = vadd.f32 -1.0, %v1387_v16 }
 0x20b   : > { %v1318_v14 = vmul.f32 -0.5, %v1302_v29 }
 0x20c   : > { %v1450_v19 = vmax.f32 %v2401_v45, 0.0  ;;  %v1287_v58 = vpop.trf.xlu0 }
 0x20d   : > { %v1389_v37 = vpop.xlane.xlu1 %1388  ;;  %1334 = vst [vmem:[#allocation3 + $0x60] sm:$0xff] %v1318_v14  ;;  %v1303_v54 = vadd.f32 %v1287_v58, %v3760_v1 }
 0x20e   : > { %1466 = vst.msk [vmem:[#allocation5 + $0x8] sm:$0xff] %vm1416_vm0, %v1450_v19  ;;  %1419 = vst.msk [vmem:[#allocation6 + $0x10] sm:$0xff] %vm1416_vm0, %v1389_v37  ;;  %v2402_v26 = vadd.f32 -1.0, %v1389_v37 }
 0x20f   : > { %v1319_v35 = vmul.f32 -0.5, %v1303_v54 }
 0x210   : > { %v1451_v32 = vmax.f32 %v2402_v26, 0.0 }
 0x211   : > { %v1391_v18 = vpop.xlane.xlu1 %1390  ;;  %1335 = vst [vmem:[#allocation3 + $0x50] sm:$0xff] %v1319_v35 }
 0x212   : > { %1467 = vst.msk [vmem:[#allocation5 + $0x10] sm:$0xff] %vm1416_vm0, %v1451_v32  ;;  %1420 = vst.msk [vmem:[#allocation6 + $0x18] sm:$0xff] %vm1416_vm0, %v1391_v18  ;;  %v2403_v44 = vadd.f32 -1.0, %v1391_v18 }
 0x214   : > { %v1452_v39 = vmax.f32 %v2403_v44, 0.0 }
 0x215   : > { %v1393_v57 = vpop.xlane.xlu1 %1392 }
 0x216   : > { %1468 = vst.msk [vmem:[#allocation5 + $0x18] sm:$0xff] %vm1416_vm0, %v1452_v39  ;;  %1421 = vst.msk [vmem:[#allocation6 + $0x20] sm:$0xff] %vm1416_vm0, %v1393_v57  ;;  %v2404_v1 = vadd.f32 -1.0, %v1393_v57 }
 0x218   : > { %v1453_v20 = vmax.f32 %v2404_v1, 0.0 }
 0x219   : > { %v1395_v53 = vpop.xlane.xlu1 %1394 }
 0x21a   : > { %1469 = vst.msk [vmem:[#allocation5 + $0x20] sm:$0xff] %vm1416_vm0, %v1453_v20  ;;  %1422 = vst.msk [vmem:[#allocation6 + $0x28] sm:$0xff] %vm1416_vm0, %v1395_v53  ;;  %v2405_v23 = vadd.f32 -1.0, %v1395_v53 }
 0x21c   : > { %v1454_v55 = vmax.f32 %v2405_v23, 0.0 }
 0x21d   : > { %v1397_v2 = vpop.xlane.xlu1 %1396 }
 0x21e   : > { %1470 = vst.msk [vmem:[#allocation5 + $0x28] sm:$0xff] %vm1416_vm0, %v1454_v55  ;;  %1423 = vst.msk [vmem:[#allocation6 + $0x30] sm:$0xff] %vm1416_vm0, %v1397_v2  ;;  %v2406_v6 = vadd.f32 -1.0, %v1397_v2 }
 0x220   : > { %v1455_v13 = vmax.f32 %v2406_v6, 0.0 }
 0x221   : > { %v1399_v38 = vpop.xlane.xlu1 %1398 }
 0x222   : > { %1471 = vst.msk [vmem:[#allocation5 + $0x30] sm:$0xff] %vm1416_vm0, %v1455_v13  ;;  %1424 = vst.msk [vmem:[#allocation6 + $0x38] sm:$0xff] %vm1416_vm0, %v1399_v38  ;;  %v2407_v34 = vadd.f32 -1.0, %v1399_v38 }
 0x224   : > { %v1456_v41 = vmax.f32 %v2407_v34, 0.0 }
 0x225   : > { %v1401_v49 = vpop.xlane.xlu1 %1400 }
 0x226   : > { %1472 = vst.msk [vmem:[#allocation5 + $0x38] sm:$0xff] %vm1416_vm0, %v1456_v41  ;;  %1425 = vst.msk [vmem:[#allocation6 + $0x40] sm:$0xff] %vm1416_vm0, %v1401_v49  ;;  %v2408_v15 = vadd.f32 -1.0, %v1401_v49 }
 0x228   : > { %v1457_v17 = vmax.f32 %v2408_v15, 0.0 }
 0x229   : > { %v1403_v40 = vpop.xlane.xlu1 %1402 }
 0x22a   : > { %1473 = vst.msk [vmem:[#allocation5 + $0x40] sm:$0xff] %vm1416_vm0, %v1457_v17  ;;  %1426 = vst.msk [vmem:[#allocation6 + $0x48] sm:$0xff] %vm1416_vm0, %v1403_v40  ;;  %v2409_v27 = vadd.f32 -1.0, %v1403_v40 }
 0x22c   : > { %v1458_v5 = vmax.f32 %v2409_v27, 0.0 }
 0x22d   : > { %v1405_v56 = vpop.xlane.xlu1 %1404 }
 0x22e   : > { %1474 = vst.msk [vmem:[#allocation5 + $0x48] sm:$0xff] %vm1416_vm0, %v1458_v5  ;;  %1427 = vst.msk [vmem:[#allocation6 + $0x50] sm:$0xff] %vm1416_vm0, %v1405_v56  ;;  %v2410_v47 = vadd.f32 -1.0, %v1405_v56 }
 0x230   : > { %v1459_v46 = vmax.f32 %v2410_v47, 0.0 }
 0x231   : > { %v1407_v8 = vpop.xlane.xlu1 %1406 }
 0x232   : > { %1475 = vst.msk [vmem:[#allocation5 + $0x50] sm:$0xff] %vm1416_vm0, %v1459_v46  ;;  %1428 = vst.msk [vmem:[#allocation6 + $0x58] sm:$0xff] %vm1416_vm0, %v1407_v8  ;;  %v2411_v21 = vadd.f32 -1.0, %v1407_v8 }
 0x234   : > { %v1460_v10 = vmax.f32 %v2411_v21, 0.0 }
 0x235   : > { %v1409_v11 = vpop.xlane.xlu1 %1408 }
 0x236   : > { %1476 = vst.msk [vmem:[#allocation5 + $0x58] sm:$0xff] %vm1416_vm0, %v1460_v10  ;;  %1429 = vst.msk [vmem:[#allocation6 + $0x60] sm:$0xff] %vm1416_vm0, %v1409_v11  ;;  %v2412_v3 = vadd.f32 -1.0, %v1409_v11 }
 0x238   : > { %v1461_v63 = vmax.f32 %v2412_v3, 0.0 }
 0x239   : > { %v1411_v42 = vpop.xlane.xlu1 %1410 }
 0x23a   : > { %1477 = vst.msk [vmem:[#allocation5 + $0x60] sm:$0xff] %vm1416_vm0, %v1461_v63  ;;  %1430 = vst.msk [vmem:[#allocation6 + $0x68] sm:$0xff] %vm1416_vm0, %v1411_v42  ;;  %v2413_v4 = vadd.f32 -1.0, %v1411_v42 }
 0x23c   : > { %v1462_v36 = vmax.f32 %v2413_v4, 0.0 }
 0x23d   : > { %v1413_v51 = vpop.xlane.xlu1 %1412 }
 0x23e   : > { %1478 = vst.msk [vmem:[#allocation5 + $0x68] sm:$0xff] %vm1416_vm0, %v1462_v36  ;;  %1431 = vst.msk [vmem:[#allocation6 + $0x70] sm:$0xff] %vm1416_vm0, %v1413_v51  ;;  %v2414_v30 = vadd.f32 -1.0, %v1413_v51 }
 0x240   : > { %v1463_v60 = vmax.f32 %v2414_v30, 0.0 }
 0x241   : > { %v1415_v28 = vpop.xlane.xlu1 %1414 }
 0x242   : > { %1479 = vst.msk [vmem:[#allocation5 + $0x70] sm:$0xff] %vm1416_vm0, %v1463_v60  ;;  %1432 = vst.msk [vmem:[#allocation6 + $0x78] sm:$0xff] %vm1416_vm0, %v1415_v28  ;;  %v2415_v62 = vadd.f32 -1.0, %v1415_v28 }
 0x244   : > { %v1464_v24 = vmax.f32 %v2415_v62, 0.0 }
 0x246   : > { %1480 = vst.msk [vmem:[#allocation5 + $0x78] sm:$0xff] %vm1416_vm0, %v1464_v24 }
 0x247 PF: > { %v1537_v25 = vld [vmem:[#allocation6] sm:$0xff]  ;;  %v2922_v61 = vmov 0   ;;  %v1539_v31 = vld [vmem:[#allocation6 + $0x10] sm:$0xff]  ;;  %v1538_v43 = vld [vmem:[#allocation6 + $0x8] sm:$0xff]  ;;  %s3898_s7 = sld [smem:[#allocation7]]  ;;  %p2449_p0 = scmp.eq.s32.totalorder %s2898_s15, 3 }
 0x248   : > { %2754 = vset.pattern.permute.xlu0 %v2922_v61  ;;  %v2417_v0 = vadd.f32 -1.0, %v1537_v25  ;;  %2755 = vset.pattern.permute.xlu1 %v2922_v61  ;;  %v2419_v7 = vadd.f32 -1.0, %v1539_v31  ;;  %v2418_v33 = vadd.f32 -1.0, %v1538_v43  ;;  %v1540_v52 = vld [vmem:[#allocation6 + $0x18] sm:$0xff]  ;;  %v1541_v12 = vld [vmem:[#allocation6 + $0x20] sm:$0xff]  ;;  %v1542_v50 = vld [vmem:[#allocation6 + $0x28] sm:$0xff] }
 0x249   : > { %v2420_v9 = vadd.f32 -1.0, %v1540_v52  ;;  %v2421_v16 = vadd.f32 -1.0, %v1541_v12  ;;  %v2422_v29 = vadd.f32 -1.0, %v1542_v50  ;;  %v1543_v14 = vld [vmem:[#allocation6 + $0x30] sm:$0xff]  ;;  %v1544_v54 = vld [vmem:[#allocation6 + $0x38] sm:$0xff]  ;;  %v1545_v35 = vld [vmem:[#allocation6 + $0x40] sm:$0xff] }
 0x24a   : > { %v2433_v22 = vmul.f32 -1.442695, %v2417_v0  ;;  %v2435_v48 = vmul.f32 -1.442695, %v2419_v7  ;;  %v2434_v59 = vmul.f32 -1.442695, %v2418_v33 }
 0x24b   : > { %v2436_v45 = vmul.f32 -1.442695, %v2420_v9  ;;  %v2437_v19 = vmul.f32 -1.442695, %v2421_v16  ;;  %v2438_v58 = vmul.f32 -1.442695, %v2422_v29 }
 0x24c   : > { %2756 = vpow2.f32 %v2433_v22  ;;  %v2423_v37 = vadd.f32 -1.0, %v1543_v14  ;;  %v2424_v26 = vadd.f32 -1.0, %v1544_v54  ;;  %v2425_v18 = vadd.f32 -1.0, %v1545_v35  ;;  %v1546_v44 = vld [vmem:[#allocation6 + $0x48] sm:$0xff]  ;;  %v1547_v39 = vld [vmem:[#allocation6 + $0x50] sm:$0xff]  ;;  %v1548_v53 = vld [vmem:[#allocation6 + $0x58] sm:$0xff] }
 0x24d   : > { %2758 = vpow2.f32 %v2435_v48  ;;  %v2426_v1 = vadd.f32 -1.0, %v1546_v44  ;;  %v2427_v20 = vadd.f32 -1.0, %v1547_v39  ;;  %v2428_v55 = vadd.f32 -1.0, %v1548_v53  ;;  %v1549_v2 = vld [vmem:[#allocation6 + $0x60] sm:$0xff]  ;;  %v1550_v34 = vld [vmem:[#allocation6 + $0x68] sm:$0xff]  ;;  %v1551_v15 = vld [vmem:[#allocation6 + $0x70] sm:$0xff] }
 0x24e   : > { %2760 = vpow2.f32 %v2434_v59  ;;  %v2439_v32 = vmul.f32 -1.442695, %v2423_v37  ;;  %v2440_v57 = vmul.f32 -1.442695, %v2424_v26  ;;  %v2441_v23 = vmul.f32 -1.442695, %v2425_v18 }
 0x24f   : > { %2762 = vpow2.f32 %v2436_v45  ;;  %v2442_v6 = vmul.f32 -1.442695, %v2426_v1  ;;  %v2443_v13 = vmul.f32 -1.442695, %v2427_v20  ;;  %v2429_v38 = vadd.f32 -1.0, %v1549_v2  ;;  %v1552_v27 = vld [vmem:[#allocation6 + $0x78] sm:$0xff] }
 0x250   : > { %2764 = vpow2.f32 %v2437_v19  ;;  %v2444_v41 = vmul.f32 -1.442695, %v2428_v55  ;;  %v2430_v49 = vadd.f32 -1.0, %v1550_v34  ;;  %v2431_v40 = vadd.f32 -1.0, %v1551_v15  ;;  %v3838_v12 = vld [vmem:[#allocation5] sm:$0xff]  ;;  %v3840_v48 = vld [vmem:[#allocation5 + $0x10] sm:$0xff] }
 0x251   : > { %2766 = vpow2.f32 %v2438_v58  ;;  %v2445_v17 = vmul.f32 -1.442695, %v2429_v38  ;;  %v2432_v56 = vadd.f32 -1.0, %v1552_v27  ;;  %4395 = vst [vmem:[#allocation37_spill] sm:$0xff] %v3838_v12  ;;  %4396 = vst [vmem:[#allocation38_spill] sm:$0xff] %v3840_v48  ;;  %v3842_v29 = vld [vmem:[#allocation5 + $0x8] sm:$0xff] }
 0x252   : > { %2768 = vpow2.f32 %v2439_v32  ;;  %v2446_v5 = vmul.f32 -1.442695, %v2430_v49  ;;  %v2447_v47 = vmul.f32 -1.442695, %v2431_v40  ;;  %4397 = vst [vmem:[#allocation39_spill] sm:$0xff] %v3842_v29  ;;  %v3847_v58 = vld [vmem:[#allocation5 + $0x18] sm:$0xff] }
 0x253   : > { %2770 = vpow2.f32 %v2440_v57  ;;  %v2448_v46 = vmul.f32 -1.442695, %v2432_v56  ;;  %4398 = vst [vmem:[#allocation40_spill] sm:$0xff] %v3847_v58  ;;  %v3860_v39 = vld [vmem:[#allocation5 + $0x20] sm:$0xff]  ;;  %v3862_v20 = vld [vmem:[#allocation5 + $0x28] sm:$0xff]  ;;  %v3870_v34 = vld [vmem:[#allocation5 + $0x38] sm:$0xff] }
 0x254   : > { %2772 = vpow2.f32 %v2441_v23  ;;  %4399 = vst [vmem:[#allocation41_spill] sm:$0xff] %v3860_v39  ;;  %4400 = vst [vmem:[#allocation42_spill] sm:$0xff] %v3862_v20  ;;  %v3876_v27 = vld [vmem:[#allocation5 + $0x48] sm:$0xff]  ;;  %s1483_s8 = smul.f32 0.99, %s3898_s7  ;;  %s3907_s9 = sld [smem:[#allocation7 + $0x1]] }
 0x255   : > { %2774 = vpow2.f32 %v2442_v6  ;;  %v3868_v6 = vld [vmem:[#allocation5 + $0x30] sm:$0xff]  ;;  %4402 = vst [vmem:[#allocation44_spill] sm:$0xff] %v3870_v34  ;;  %4404 = vst [vmem:[#allocation46_spill] sm:$0xff] %v3876_v27 }
 0x256   : > { %2776 = vpow2.f32 %v2443_v13  ;;  %4401 = vst [vmem:[#allocation43_spill] sm:$0xff] %v3868_v6  ;;  %1485 = sst [smem:[#allocation7]] %s1483_s8 }
 0x257   : > { %2778 = vpow2.f32 %v2444_v41 }
 0x258   : > { %2780 = vpow2.f32 %v2445_v17  ;;  %v3874_v17 = vld [vmem:[#allocation5 + $0x40] sm:$0xff] }
 0x259   : > { %v2757_v8 = vpop.eup %2756  ;;  %2782 = vpow2.f32 %v2446_v5  ;;  %4403 = vst [vmem:[#allocation45_spill] sm:$0xff] %v3874_v17 }
 0x25a   : > { %v2759_v21 = vpop.eup %2758  ;;  %v1617_v10 = vadd.f32 1.0, %v2757_v8  ;;  %2784 = vpow2.f32 %v2447_v47  ;;  %s1486_s10 = smul.f32 0.99, %s3907_s9 }
 0x25b   : > { %v2761_v11 = vpop.eup %2760  ;;  %v1619_v3 = vadd.f32 1.0, %v2759_v21  ;;  %2786 = vpow2.f32 %v2448_v46  ;;  %v3880_v46 = vld [vmem:[#allocation5 + $0x50] sm:$0xff]  ;;  %v3882_v21 = vld [vmem:[#allocation5 + $0x58] sm:$0xff] }
 0x25c   : > { %v2763_v63 = vpop.eup %2762  ;;  %2788 = vrcp.f32 %v1617_v10  ;;  %v1618_v42 = vadd.f32 1.0, %v2761_v11  ;;  %4405 = vst [vmem:[#allocation47_spill] sm:$0xff] %v3880_v46  ;;  %4406 = vst [vmem:[#allocation48_spill] sm:$0xff] %v3882_v21  ;;  %1488 = sst [smem:[#allocation7 + $0x1]] %s1486_s10 }
 0x25d   : > { %v2765_v4 = vpop.eup %2764  ;;  %2790 = vrcp.f32 %v1619_v3  ;;  %v1620_v36 = vadd.f32 1.0, %v2763_v63  ;;  %v3886_v63 = vld [vmem:[#allocation5 + $0x60] sm:$0xff] }
 0x25e   : > { %v2767_v51 = vpop.eup %2766  ;;  %2792 = vrcp.f32 %v1618_v42  ;;  %v1621_v30 = vadd.f32 1.0, %v2765_v4  ;;  %4407 = vst [vmem:[#allocation49_spill] sm:$0xff] %v3886_v63  ;;  %v3888_v4 = vld [vmem:[#allocation5 + $0x68] sm:$0xff] }
 0x25f   : > { %v2769_v60 = vpop.eup %2768  ;;  %2794 = vrcp.f32 %v1620_v36  ;;  %v1622_v28 = vadd.f32 1.0, %v2767_v51  ;;  %4408 = vst [vmem:[#allocation50_spill] sm:$0xff] %v3888_v4 }
 0x260   : > { %v2771_v62 = vpop.eup %2770  ;;  %2796 = vrcp.f32 %v1621_v30  ;;  %v1623_v24 = vadd.f32 1.0, %v2769_v60  ;;  %v3892_v60 = vld [vmem:[#allocation5 + $0x70] sm:$0xff] }
 0x261   : > { %v2773_v25 = vpop.eup %2772  ;;  %2798 = vrcp.f32 %v1622_v28  ;;  %v1624_v61 = vadd.f32 1.0, %v2771_v62  ;;  %4409 = vst [vmem:[#allocation51_spill] sm:$0xff] %v3892_v60  ;;  %v3894_v62 = vld [vmem:[#allocation5 + $0x78] sm:$0xff] }
 0x262   : > { %v2775_v0 = vpop.eup %2774  ;;  %2800 = vrcp.f32 %v1623_v24  ;;  %v1625_v7 = vadd.f32 1.0, %v2773_v25  ;;  %4410 = vst [vmem:[#allocation52_spill] sm:$0xff] %v3894_v62 }
 0x263   : > { %v2777_v31 = vpop.eup %2776  ;;  %2802 = vrcp.f32 %v1624_v61  ;;  %v1626_v52 = vadd.f32 1.0, %v2775_v0 }
 0x264   : > { %v2779_v43 = vpop.eup %2778  ;;  %2804 = vrcp.f32 %v1625_v7  ;;  %v1627_v59 = vadd.f32 1.0, %v2777_v31 }
 0x265   : > { %v2781_v33 = vpop.eup %2780  ;;  %2806 = vrcp.f32 %v1626_v52  ;;  %v1628_v45 = vadd.f32 1.0, %v2779_v43 }
 0x266   : > { %v2783_v22 = vpop.eup %2782  ;;  %2808 = vrcp.f32 %v1627_v59  ;;  %v1629_v32 = vadd.f32 1.0, %v2781_v33 }
 0x267   : > { %v2785_v9 = vpop.eup %2784  ;;  %2810 = vrcp.f32 %v1628_v45  ;;  %v1630_v57 = vadd.f32 1.0, %v2783_v22 }
 0x268   : > { %v2787_v50 = vpop.eup %2786  ;;  %2812 = vrcp.f32 %v1629_v32  ;;  %v1631_v23 = vadd.f32 1.0, %v2785_v9  ;;  %v3946_v32 = vld [vmem:[#allocation2 + $0x50] sm:$0xff] }
 0x269   : > { %v2789_v16 = vpop.eup %2788  ;;  %2814 = vrcp.f32 %v1630_v57  ;;  %v1632_v13 = vadd.f32 1.0, %v2787_v50  ;;  %4415 = vst [vmem:[#allocation57_spill] sm:$0xff] %v3946_v32  ;;  %v3952_v57 = vld [vmem:[#allocation2 + $0x8] sm:$0xff] }
 0x26a   : > { %v2791_v14 = vpop.eup %2790  ;;  %v3845_v19 = vmul.f32 %v2789_v16, %v3838_v12  ;;  %2816 = vrcp.f32 %v1631_v23  ;;  %v1825_v16 = vlaneseq  ;;  %4417 = vst [vmem:[#allocation59_spill] sm:$0xff] %v3952_v57  ;;  %v3958_v23 = vld [vmem:[#allocation4] sm:$0xff]  ;;  %v1686_v12 = vld [vmem:[#allocation3 + $0x30] sm:$0xff] }
 0x26b   : > { %v2793_v37 = vpop.eup %2792  ;;  %v3850_v54 = vmul.f32 %v2791_v14, %v3840_v48  ;;  %2818 = vrcp.f32 %v1632_v13  ;;  %v3934_v14 = vld [vmem:[#allocation2 + $0x30] sm:$0xff]  ;;  %v3964_v13 = vld [vmem:[#allocation2 + $0x20] sm:$0xff] }
 0x26c   : > { %v2795_v26 = vpop.eup %2794  ;;  %1699 = vperm.xlu0 %2754, %v3845_v19   ;;  %v3854_v35 = vmul.f32 %v2793_v37, %v3842_v29  ;;  %4411 = vst [vmem:[#allocation53_spill] sm:$0xff] %v3934_v14  ;;  %v3938_v37 = vshrl.u32 %v1825_v16, 7  ;;  %4420 = vst [vmem:[#allocation62_spill] sm:$0xff] %v3964_v13  ;;  %v1687_v48 = vld [vmem:[#allocation3 + $0x70] sm:$0xff] }
 0x26d   : > { %v2797_v18 = vpop.eup %2796  ;;  %1709 = vperm.xlu1 %2755, %v3850_v54   ;;  %v3858_v44 = vmul.f32 %v2795_v26, %v3847_v58  ;;  %v3942_v26 = vld [vmem:[#allocation2 + $0x58] sm:$0xff] }
 0x26e   : > { %v2799_v1 = vpop.eup %2798  ;;  %v1669_v53 = vmul.f32 %v2797_v18, %v3860_v39  ;;  %4413 = vst [vmem:[#allocation55_spill] sm:$0xff] %v3942_v26  ;;  %v3948_v18 = vld [vmem:[#allocation4 + $0x8] sm:$0xff] }
 0x26f   : > { %v2801_v55 = vpop.eup %2800  ;;  %v1670_v2 = vmul.f32 %v2799_v1, %v3862_v20  ;;  %v3954_v1 = vld [vmem:[#allocation2 + $0x48] sm:$0xff] }
 0x270   : > { %1704 = vperm.xlu0 %2754, %v3854_v35   ;;  %v2803_v38 = vpop.eup %2802  ;;  %v1671_v41 = vmul.f32 %v2801_v55, %v3868_v6  ;;  %4418 = vst [vmem:[#allocation60_spill] sm:$0xff] %v3954_v1  ;;  %v3960_v55 = vld [vmem:[#allocation4 + $0x48] sm:$0xff] }
 0x271   : > { %1714 = vperm.xlu1 %2755, %v3858_v44   ;;  %v2805_v49 = vpop.eup %2804  ;;  %v1672_v15 = vmul.f32 %v2803_v38, %v3870_v34  ;;  %v3966_v38 = vld [vmem:[#allocation2 + $0x10] sm:$0xff]  ;;  %v1685_v6 = vld [vmem:[#allocation3 + $0x48] sm:$0xff] }
 0x272   : > { %v2807_v40 = vpop.eup %2806  ;;  %v1673_v5 = vmul.f32 %v2805_v49, %v3874_v17  ;;  %4421 = vst [vmem:[#allocation63_spill] sm:$0xff] %v3966_v38  ;;  %v3970_v49 = vld [vmem:[#allocation2 + $0x60] sm:$0xff]  ;;  %v1682_v17 = vld [vmem:[#allocation3 + $0x68] sm:$0xff] }
 0x273   : > { %v2809_v56 = vpop.eup %2808  ;;  %v1674_v47 = vmul.f32 %v2807_v40, %v3876_v27  ;;  %4423 = vst [vmem:[#allocation65_spill] sm:$0xff] %v3970_v49  ;;  %v3974_v40 = vld [vmem:[#allocation4 + $0x18] sm:$0xff]  ;;  %v1684_v27 = vld [vmem:[#allocation3 + $0x40] sm:$0xff] }
 0x274   : > { %1719 = vperm.xlu0 %2754, %v1669_v53   ;;  %v2811_v8 = vpop.eup %2810  ;;  %v1675_v10 = vmul.f32 %v2809_v56, %v3880_v46  ;;  %v3978_v56 = vld [vmem:[#allocation2 + $0x70] sm:$0xff] }
 0x275   : > { %1724 = vperm.xlu1 %2755, %v1670_v2   ;;  %v2813_v11 = vpop.eup %2812  ;;  %v1676_v3 = vmul.f32 %v2811_v8, %v3882_v21  ;;  %4425 = vst [vmem:[#allocation67_spill] sm:$0xff] %v3978_v56  ;;  %v3982_v8 = vld [vmem:[#allocation2 + $0x28] sm:$0xff] }
 0x276   : > { %v2815_v42 = vpop.eup %2814  ;;  %v1677_v36 = vmul.f32 %v2813_v11, %v3886_v63  ;;  %4427 = vst [vmem:[#allocation69_spill] sm:$0xff] %v3982_v8  ;;  %v3986_v11 = vld [vmem:[#allocation4 + $0x40] sm:$0xff]  ;;  %v4005_v63 = vld [vmem:[#allocation4 + $0x78] sm:$0xff] }
 0x277   : > { %v2817_v51 = vpop.eup %2816  ;;  %v1678_v30 = vmul.f32 %v2815_v42, %v3888_v4  ;;  %4429 = vst [vmem:[#allocation71_spill] sm:$0xff] %v3986_v11  ;;  %v1681_v42 = vld [vmem:[#allocation3 + $0x28] sm:$0xff]  ;;  %4436 = vst [vmem:[#allocation78_spill] sm:$0xff] %v4005_v63  ;;  %v4013_v4 = vmul.f32 %v3960_v55, %v3942_v26  ;;  %v1689_v26 = vld [vmem:[#allocation3 + $0x20] sm:$0xff] }
 0x278   : > { %1729 = vperm.xlu0 %2754, %v1671_v41   ;;  %v2819_v28 = vpop.eup %2818  ;;  %v1679_v24 = vmul.f32 %v2817_v51, %v3892_v60  ;;  %v1827_v51 = vsub.s32 0, %v3938_v37  ;;  %v4001_v60 = vld [vmem:[#allocation4 + $0x30] sm:$0xff] }
 0x279   : > { %1734 = vperm.xlu1 %2755, %v1672_v15   ;;  %v1680_v25 = vmul.f32 %v2819_v28, %v3894_v62  ;;  %v3993_v28 = vld [vmem:[#allocation4 + $0x20] sm:$0xff]  ;;  %4434 = vst [vmem:[#allocation76_spill] sm:$0xff] %v4001_v60  ;;  %v4003_v62 = vld [vmem:[#allocation4 + $0x50] sm:$0xff] }
 0x27a   : > { %4432 = vst [vmem:[#allocation74_spill] sm:$0xff] %v3993_v28  ;;  %4435 = vst [vmem:[#allocation77_spill] sm:$0xff] %v4003_v62 }
 0x27c   : > { %1739 = vperm.xlu0 %2754, %v1673_v5  }
 0x27d   : > { %1744 = vperm.xlu1 %2755, %v1674_v47  }
 0x280   : > { %1749 = vperm.xlu0 %2754, %v1675_v10  }
 0x281   : > { %1754 = vperm.xlu1 %2755, %v1676_v3  }
 0x284   : > { %1759 = vperm.xlu0 %2754, %v1677_v36  }
 0x285   : > { %1764 = vperm.xlu1 %2755, %v1678_v30  }
 0x288   : > { %1769 = vperm.xlu0 %2754, %v1679_v24  }
 0x289   : > { %1774 = vperm.xlu1 %2755, %v1680_v25  }
 0x2a6   : > { %1793 = vxpose.xlu0.b32.start [1/16] (narrow) %v3845_v19, 8 }
 0x2aa   : > { %1794 = vxpose.xlu0.b32.cont [2/16] (narrow) %v3854_v35, 8  ;;  %v3944_v35 = vld [vmem:[#allocation2 + $0x18] sm:$0xff] }
 0x2ab   : > { %4414 = vst [vmem:[#allocation56_spill] sm:$0xff] %v3944_v35 }
 0x2ae   : > { %1795 = vxpose.xlu0.b32.cont [3/16] (narrow) %v3850_v54, 8  ;;  %v3940_v54 = vld [vmem:[#allocation2] sm:$0xff] }
 0x2af   : > { %4412 = vst [vmem:[#allocation54_spill] sm:$0xff] %v3940_v54  ;;  %v4009_v37 = vmul.f32 %v3958_v23, %v3940_v54  ;;  %v1690_v54 = vld [vmem:[#allocation3 + $0x78] sm:$0xff] }
 0x2b2   : > { %1796 = vxpose.xlu0.b32.cont [4/16] (narrow) %v3858_v44, 8  ;;  %v3950_v44 = vld [vmem:[#allocation2 + $0x68] sm:$0xff] }
 0x2b3   : > { %4416 = vst [vmem:[#allocation58_spill] sm:$0xff] %v3950_v44  ;;  %v4025_v39 = vmul.f32 %v3974_v40, %v3950_v44 }
 0x2b6   : > { %1797 = vxpose.xlu0.b32.cont [5/16] (narrow) %v1669_v53, 8  ;;  %v3956_v53 = vld [vmem:[#allocation2 + $0x40] sm:$0xff] }
 0x2b7   : > { %4419 = vst [vmem:[#allocation61_spill] sm:$0xff] %v3956_v53  ;;  %v4037_v58 = vmul.f32 %v3986_v11, %v3956_v53  ;;  %v1691_v53 = vld [vmem:[#allocation3 + $0x18] sm:$0xff] }
 0x2ba   : > { %1798 = vxpose.xlu0.b32.cont [6/16] (narrow) %v1670_v2, 8  ;;  %v3962_v2 = vld [vmem:[#allocation4 + $0x60] sm:$0xff] }
 0x2bb   : > { %v4017_v46 = vmul.f32 %v3962_v2, %v3944_v35 }
 0x2be   : > { %1799 = vxpose.xlu0.b32.cont [7/16] (narrow) %v1671_v41, 8  ;;  %v3968_v41 = vld [vmem:[#allocation2 + $0x38] sm:$0xff] }
 0x2bf   : > { %4422 = vst [vmem:[#allocation64_spill] sm:$0xff] %v3968_v41 }
 0x2c2   : > { %1800 = vxpose.xlu0.b32.cont [8/16] (narrow) %v1672_v15, 8  ;;  %v3972_v15 = vld [vmem:[#allocation4 + $0x68] sm:$0xff] }
 0x2c3   : > { %v4021_v21 = vmul.f32 %v3972_v15, %v3946_v32  ;;  %v1688_v32 = vld [vmem:[#allocation3 + $0x38] sm:$0xff] }
 0x2c6   : > { %1801 = vxpose.xlu0.b32.cont [9/16] (narrow) %v1673_v5, 8  ;;  %v3976_v5 = vld [vmem:[#allocation4 + $0x10] sm:$0xff] }
 0x2c7   : > { %4424 = vst [vmem:[#allocation66_spill] sm:$0xff] %v3976_v5  ;;  %v4029_v20 = vmul.f32 %v3976_v5, %v3952_v57  ;;  %v1856_v57 = vmul.f32 %v3993_v28, %v3968_v41  ;;  %v1693_v28 = vld [vmem:[#allocation3] sm:$0xff] }
 0x2ca   : > { %1802 = vxpose.xlu0.b32.cont [10/16] (narrow) %v1674_v47, 8  ;;  %v3980_v47 = vld [vmem:[#allocation2 + $0x78] sm:$0xff] }
 0x2cb   : > { %4426 = vst [vmem:[#allocation68_spill] sm:$0xff] %v3980_v47  ;;  %v1859_v11 = vmul.f32 %v4003_v62, %v3980_v47  ;;  %v1695_v62 = vld [vmem:[#allocation3 + $0x60] sm:$0xff] }
 0x2ce   : > { %1803 = vxpose.xlu0.b32.cont [11/16] (narrow) %v1675_v10, 8  ;;  %v3984_v10 = vld [vmem:[#allocation4 + $0x38] sm:$0xff] }
 0x2cf   : > { %4428 = vst [vmem:[#allocation70_spill] sm:$0xff] %v3984_v10  ;;  %v4033_v29 = vmul.f32 %v3984_v10, %v3954_v1  ;;  %v4061_v10 = vstv %s1483_s8 }
 0x2d0   : > { %4437 = vst [vmem:[#allocation79_spill] sm:$0xff] %v4061_v10 }
 0x2d2   : > { %1804 = vxpose.xlu0.b32.cont [12/16] (narrow) %v1676_v3, 8  ;;  %v3988_v3 = vld [vmem:[#allocation4 + $0x28] sm:$0xff] }
 0x2d3   : > { %4430 = vst [vmem:[#allocation72_spill] sm:$0xff] %v3988_v3  ;;  %v1854_v44 = vmul.f32 %v3988_v3, %v3964_v13  ;;  %v1860_v13 = vmul.f32 %v4005_v63, %v3982_v8  ;;  %v1694_v3 = vld [vmem:[#allocation3 + $0x8] sm:$0xff] }
 0x2d6   : > { %1805 = vxpose.xlu0.b32.cont [13/16] (narrow) %v1677_v36, 8  ;;  %v1683_v36 = vld [vmem:[#allocation3 + $0x10] sm:$0xff] }
 0x2da   : > { %1806 = vxpose.xlu0.b32.cont [14/16] (narrow) %v1678_v30, 8  ;;  %v3991_v30 = vld [vmem:[#allocation4 + $0x70] sm:$0xff] }
 0x2db   : > { %4431 = vst [vmem:[#allocation73_spill] sm:$0xff] %v3991_v30  ;;  %v1855_v35 = vmul.f32 %v3991_v30, %v3966_v38  ;;  %v4054_v38 = vstv %s3898_s7 }
 0x2de   : > { %1807 = vxpose.xlu0.b32.cont [15/16] (narrow) %v1679_v24, 8  ;;  %v3995_v24 = vld [vmem:[#allocation4 + $0x58] sm:$0xff] }
 0x2df   : > { %4433 = vst [vmem:[#allocation75_spill] sm:$0xff] %v3995_v24  ;;  %v1857_v1 = vmul.f32 %v3995_v24, %v3970_v49  ;;  %v1692_v24 = vld [vmem:[#allocation3 + $0x58] sm:$0xff] }
 0x2e2   : > { %1808 = vxpose.xlu0.b32.end [16/16] (narrow) %v1680_v25, 8  ;;  %v3999_v25 = vmul.f32 %v3948_v18, %v3934_v14  ;;  %v1858_v14 = vmul.f32 %v4001_v60, %v3978_v56 }
 0x2e7   : > { %v3910_v61 = vpop.permute.xlu0 %1699 }
 0x2e8   : > { %v3912_v0 = vpop.permute.xlu1 %1709  ;;  %v1777_v30 = vadd.f32 %v3910_v61, %v1681_v42  ;;  %v1696_v42 = vld [vmem:[#allocation3 + $0x50] sm:$0xff] }
 0x2e9   : > { %v1779_v41 = vadd.f32 %v3912_v0, %v1683_v36 }
 0x2eb   : > { %v3914_v31 = vpop.permute.xlu0 %1704 }
 0x2ec   : > { %v3916_v43 = vpop.permute.xlu1 %1714  ;;  %v1778_v49 = vadd.f32 %v3914_v31, %v1682_v17 }
 0x2ed   : > { %v1780_v56 = vadd.f32 %v3916_v43, %v1684_v27 }
 0x2ef   : > { %v3918_v7 = vpop.permute.xlu0 %1719 }
 0x2f0   : > { %v3920_v33 = vpop.permute.xlu1 %1724  ;;  %v1781_v47 = vadd.f32 %v3918_v7, %v1685_v6 }
 0x2f1   : > { %v1782_v8 = vadd.f32 %v3920_v33, %v1686_v12 }
 0x2f3   : > { %v3922_v52 = vpop.permute.xlu0 %1729 }
 0x2f4   : > { %v3924_v22 = vpop.permute.xlu1 %1734  ;;  %v1783_v63 = vadd.f32 %v3922_v52, %v1687_v48 }
 0x2f5   : > { %v1784_v0 = vadd.f32 %v3924_v22, %v1688_v32 }
 0x2f7   : > { %v3926_v9 = vpop.permute.xlu0 %1739 }
 0x2f8   : > { %v3928_v50 = vpop.permute.xlu1 %1744  ;;  %v1785_v17 = vadd.f32 %v3926_v9, %v1689_v26 }
 0x2f9   : > { %v1786_v31 = vadd.f32 %v3928_v50, %v1690_v54 }
 0x2fb   : > { %v3930_v59 = vpop.permute.xlu0 %1749 }
 0x2fc   : > { %v3932_v45 = vpop.permute.xlu1 %1754  ;;  %v1787_v10 = vadd.f32 %v3930_v59, %v1691_v53 }
 0x2fd   : > { %v1788_v27 = vadd.f32 %v3932_v45, %v1692_v24 }
 0x2ff   : > { %v3936_v19 = vpop.permute.xlu0 %1759 }
 0x300   : > { %v1765_v16 = vpop.permute.xlu1 %1764  ;;  %v1789_v6 = vadd.f32 %v3936_v19, %v1693_v28 }
 0x301   : > { %v1790_v12 = vadd.f32 %v1765_v16, %v1694_v3 }
 0x303   : > { %v1770_v34 = vpop.permute.xlu0 %1769 }
 0x304   : > { %v1775_v36 = vpop.permute.xlu1 %1774  ;;  %v1791_v43 = vadd.f32 %v1770_v34, %v1695_v62 }
 0x305   : > { %v1792_v52 = vadd.f32 %v1775_v36, %v1696_v42 }
 0x322   : > { %v1809_v61 = vpop.trf.xlu0 }
 0x323   : > { %v1828_v60 = vrot.slane %v1809_v61, %v1827_v51 }
 0x325   : > { %v1829_v48 = vadd.f32 %v1828_v60, %v1777_v30  ;;  %v1830_v7 = vadd.f32 %v1828_v60, %v1778_v49  ;;  %v1831_v33 = vadd.f32 %v1828_v60, %v1779_v41  ;;  %v1832_v22 = vadd.f32 %v1828_v60, %v1780_v56 }
 0x326   : > { %v1833_v32 = vadd.f32 %v1828_v60, %v1781_v47  ;;  %v1834_v9 = vadd.f32 %v1828_v60, %v1782_v8  ;;  %v1835_v26 = vadd.f32 %v1828_v60, %v1783_v63  ;;  %v1836_v50 = vadd.f32 %v1828_v60, %v1784_v0 }
 0x327   : > { %v1837_v54 = vadd.f32 %v1828_v60, %v1785_v17  ;;  %v1838_v5 = vadd.f32 %v1828_v60, %v1786_v31  ;;  %v1839_v51 = vadd.f32 %v1828_v60, %v1787_v10  ;;  %v1840_v61 = vadd.f32 %v1828_v60, %v1788_v27 }
 0x328   : > { %v1841_v59 = vadd.f32 %v1828_v60, %v1789_v6  ;;  %v1842_v53 = vadd.f32 %v1828_v60, %v1790_v12  ;;  %v1843_v45 = vadd.f32 %v1828_v60, %v1791_v43  ;;  %v1861_v19 = vmul.f32 %v3999_v25, %v1829_v48  ;;  %v4438_v6 = vld [vmem:[#allocation66_spill] sm:$0xff] }
 0x329   : > { %v1862_v34 = vmul.f32 %v4009_v37, %v1830_v7  ;;  %v1863_v62 = vmul.f32 %v4013_v4, %v1831_v33  ;;  %v1844_v41 = vadd.f32 %v1828_v60, %v1792_v52  ;;  %v1864_v49 = vmul.f32 %v4017_v46, %v1832_v22  ;;  %v4439_v43 = vld [vmem:[#allocation70_spill] sm:$0xff]  ;;  %v4440_v7 = vld [vmem:[#allocation71_spill] sm:$0xff]  ;;  %v4441_v52 = vld [vmem:[#allocation72_spill] sm:$0xff] }
 0x32a   : > { %v1865_v56 = vmul.f32 %v4021_v21, %v1833_v32  ;;  %v1866_v63 = vmul.f32 %v4025_v39, %v1834_v9  ;;  %v1867_v47 = vmul.f32 %v4029_v20, %v1835_v26  ;;  %v1868_v8 = vmul.f32 %v4033_v29, %v1836_v50  ;;  %v4442_v22 = vld [vmem:[#allocation73_spill] sm:$0xff]  ;;  %v4443_v32 = vld [vmem:[#allocation74_spill] sm:$0xff]  ;;  %v4444_v9 = vld [vmem:[#allocation75_spill] sm:$0xff] }
 0x32b   : > { %v1869_v10 = vmul.f32 %v4037_v58, %v1837_v54  ;;  %v1870_v3 = vmul.f32 %v1854_v44, %v1838_v5  ;;  %v1871_v30 = vmul.f32 %v1855_v35, %v1839_v51  ;;  %v1872_v28 = vmul.f32 %v1856_v57, %v1840_v61  ;;  %v4445_v26 = vld [vmem:[#allocation76_spill] sm:$0xff]  ;;  %v4446_v50 = vld [vmem:[#allocation77_spill] sm:$0xff]  ;;  %v4447_v61 = vld [vmem:[#allocation78_spill] sm:$0xff] }
 0x32c   : > { %v1873_v24 = vmul.f32 %v1857_v1, %v1841_v59  ;;  %v1874_v25 = vmul.f32 %v1858_v14, %v1842_v53  ;;  %v1875_v16 = vmul.f32 %v1859_v11, %v1843_v45  ;;  %v1878_v4 = vmul.f32 %v4054_v38, %v1861_v19 }
 0x32d   : > { %v1879_v46 = vmul.f32 %v4054_v38, %v1862_v34  ;;  %v1880_v21 = vmul.f32 %v4054_v38, %v1863_v62  ;;  %v1876_v60 = vmul.f32 %v1860_v13, %v1844_v41  ;;  %v1881_v39 = vmul.f32 %v4054_v38, %v1864_v49  ;;  %v4448_v49 = vld [vmem:[#allocation79_spill] sm:$0xff] }
 0x32e   : > { %v1882_v20 = vmul.f32 %v4054_v38, %v1865_v56  ;;  %v1883_v29 = vmul.f32 %v4054_v38, %v1866_v63  ;;  %v1884_v58 = vmul.f32 %v4054_v38, %v1867_v47  ;;  %v1885_v35 = vmul.f32 %v4054_v38, %v1868_v8 }
 0x32f   : > { %v1886_v14 = vmul.f32 %v4054_v38, %v1869_v10  ;;  %v1887_v44 = vmul.f32 %v4054_v38, %v1870_v3  ;;  %v1888_v57 = vmul.f32 %v4054_v38, %v1871_v30  ;;  %v1889_v1 = vmul.f32 %v4054_v38, %v1872_v28 }
 0x330   : > { %v1890_v13 = vmul.f32 %v4054_v38, %v1873_v24  ;;  %v1891_v5 = vmul.f32 %v4054_v38, %v1874_v25  ;;  %v1892_v11 = vmul.f32 %v4054_v38, %v1875_v16  ;;  %v1894_v37 = vsub.f32 %v3948_v18, %v1878_v4 }
 0x331   : > { %v1895_v0 = vsub.f32 %v3958_v23, %v1879_v46  ;;  %v1896_v17 = vsub.f32 %v3960_v55, %v1880_v21  ;;  %v1893_v31 = vmul.f32 %v4054_v38, %v1876_v60  ;;  %v1897_v42 = vsub.f32 %v3962_v2, %v1881_v39 }
 0x332   : > { %v1898_v36 = vsub.f32 %v3972_v15, %v1882_v20  ;;  %v1899_v27 = vsub.f32 %v3974_v40, %v1883_v29  ;;  %v1900_v12 = vsub.f32 %v4438_v6, %v1884_v58  ;;  %v1901_v48 = vsub.f32 %v4439_v43, %v1885_v35 }
 0x333   : > { %v1902_v33 = vsub.f32 %v4440_v7, %v1886_v14  ;;  %v1903_v18 = vsub.f32 %v4441_v52, %v1887_v44  ;;  %v1904_v23 = vsub.f32 %v4442_v22, %v1888_v57  ;;  %v1905_v55 = vsub.f32 %v4443_v32, %v1889_v1 }
 0x334   : > { %v1906_v38 = vsub.f32 %v4444_v9, %v1890_v13  ;;  %v1907_v2 = vsub.f32 %v4445_v26, %v1891_v5  ;;  %v1908_v15 = vsub.f32 %v4446_v50, %v1892_v11  ;;  %v1910_v54 = vand.u32 2147483647, %v1894_v37 }
 0x335   : > { %v1911_v40 = vand.u32 2147483647, %v1895_v0  ;;  %v1912_v51 = vand.u32 2147483647, %v1896_v17  ;;  %v1909_v59 = vsub.f32 %v4447_v61, %v1893_v31  ;;  %v1913_v53 = vand.u32 2147483647, %v1897_v42 }
 0x336   : > { %v1914_v45 = vand.u32 2147483647, %v1898_v36  ;;  %v1915_v19 = vand.u32 2147483647, %v1899_v27  ;;  %v1916_v34 = vand.u32 2147483647, %v1900_v12  ;;  %v1927_v56 = vsub.f32 %v1910_v54, %v4448_v49 }
 0x337   : > { %v1917_v62 = vand.u32 2147483647, %v1901_v48  ;;  %v1918_v41 = vand.u32 2147483647, %v1902_v33  ;;  %v1919_v63 = vand.u32 2147483647, %v1903_v18  ;;  %v1928_v10 = vsub.f32 %v1911_v40, %v4448_v49 }
 0x338   : > { %v1920_v47 = vand.u32 2147483647, %v1904_v23  ;;  %v1921_v8 = vand.u32 2147483647, %v1905_v55  ;;  %v1922_v3 = vand.u32 2147483647, %v1906_v38  ;;  %v1929_v24 = vsub.f32 %v1912_v51, %v4448_v49 }
 0x339   : > { %v1923_v30 = vand.u32 2147483647, %v1907_v2  ;;  %v1924_v28 = vand.u32 2147483647, %v1908_v15  ;;  %v1925_v25 = vand.u32 2147483647, %v1909_v59  ;;  %v1930_v16 = vsub.f32 %v1913_v53, %v4448_v49 }
 0x33a   : > { %v1931_v4 = vsub.f32 %v1914_v45, %v4448_v49  ;;  %v1932_v46 = vsub.f32 %v1915_v19, %v4448_v49  ;;  %v1933_v21 = vsub.f32 %v1916_v34, %v4448_v49  ;;  %v1934_v60 = vsub.f32 %v1917_v62, %v4448_v49 }
 0x33b   : > { %v1935_v39 = vsub.f32 %v1918_v41, %v4448_v49  ;;  %v1936_v20 = vsub.f32 %v1919_v63, %v4448_v49  ;;  %v1937_v29 = vsub.f32 %v1920_v47, %v4448_v49  ;;  %v1938_v58 = vsub.f32 %v1921_v8, %v4448_v49 }
 0x33c   : > { %v1939_v35 = vsub.f32 %v1922_v3, %v4448_v49  ;;  %v1940_v14 = vsub.f32 %v1923_v30, %v4448_v49  ;;  %v1941_v44 = vsub.f32 %v1924_v28, %v4448_v49  ;;  %v1942_v57 = vsub.f32 %v1925_v25, %v4448_v49  ;;  %v4449_v28 = vld [vmem:[#allocation53_spill] sm:$0xff]  ;;  %v4450_v25 = vld [vmem:[#allocation54_spill] sm:$0xff] }
 0x33d   : > { %v1943_v1 = vmax.f32 %v1927_v56, 0.0  ;;  %v1944_v13 = vmax.f32 %v1928_v10, 0.0  ;;  %v1945_v5 = vmax.f32 %v1929_v24, 0.0  ;;  %v1946_v11 = vmax.f32 %v1930_v16, 0.0 }
 0x33e   : > { %v1947_v37 = vmax.f32 %v1931_v4, 0.0  ;;  %v1948_v0 = vmax.f32 %v1932_v46, 0.0  ;;  %v1949_v17 = vmax.f32 %v1933_v21, 0.0  ;;  %v1950_v31 = vmax.f32 %v1934_v60, 0.0  ;;  %v4451_v4 = vld [vmem:[#allocation55_spill] sm:$0xff]  ;;  %v4452_v21 = vld [vmem:[#allocation56_spill] sm:$0xff] }
 0x33f   : > { %v1951_v42 = vmax.f32 %v1935_v39, 0.0  ;;  %v1952_v36 = vmax.f32 %v1936_v20, 0.0  ;;  %v1953_v27 = vmax.f32 %v1937_v29, 0.0  ;;  %v1954_v6 = vmax.f32 %v1938_v58, 0.0  ;;  %v4453_v39 = vld [vmem:[#allocation57_spill] sm:$0xff]  ;;  %v4454_v29 = vld [vmem:[#allocation58_spill] sm:$0xff] }
 0x340   : > { %v1955_v12 = vmax.f32 %v1939_v35, 0.0  ;;  %v1956_v43 = vmax.f32 %v1940_v14, 0.0  ;;  %v1957_v48 = vmax.f32 %v1941_v44, 0.0  ;;  %v1958_v7 = vmax.f32 %v1942_v57, 0.0  ;;  %v4455_v35 = vld [vmem:[#allocation59_spill] sm:$0xff]  ;;  %v4456_v44 = vld [vmem:[#allocation60_spill] sm:$0xff] }
 0x341   : > { %v1959_v33 = vmin.f32 %v1943_v1, 1.0  ;;  %v1960_v52 = vmin.f32 %v1944_v13, 1.0  ;;  %v1961_v18 = vmin.f32 %v1945_v5, 1.0  ;;  %v1962_v22 = vmin.f32 %v1946_v11, 1.0  ;;  %v4457_v1 = vld [vmem:[#allocation61_spill] sm:$0xff]  ;;  %v4458_v5 = vld [vmem:[#allocation62_spill] sm:$0xff] }
 0x342   : > { %v1963_v23 = vmin.f32 %v1947_v37, 1.0  ;;  %v1964_v32 = vmin.f32 %v1948_v0, 1.0  ;;  %v1965_v55 = vmin.f32 %v1949_v17, 1.0  ;;  %v1966_v9 = vmin.f32 %v1950_v31, 1.0  ;;  %v4459_v37 = vld [vmem:[#allocation63_spill] sm:$0xff]  ;;  %v4460_v17 = vld [vmem:[#allocation64_spill] sm:$0xff] }
 0x343   : > { %v1967_v38 = vmin.f32 %v1951_v42, 1.0  ;;  %v1968_v26 = vmin.f32 %v1952_v36, 1.0  ;;  %1975 = vst [vmem:[#allocation4 + $0x8] sm:$0xff] %v1959_v33  ;;  %1976 = vst [vmem:[#allocation4] sm:$0xff] %v1960_v52  ;;  %v1969_v2 = vmin.f32 %v1953_v27, 1.0  ;;  %v1970_v50 = vmin.f32 %v1954_v6, 1.0 }
 0x344   : > { %v1971_v15 = vmin.f32 %v1955_v12, 1.0  ;;  %v1972_v54 = vmin.f32 %v1956_v43, 1.0  ;;  %1977 = vst [vmem:[#allocation4 + $0x48] sm:$0xff] %v1961_v18  ;;  %1978 = vst [vmem:[#allocation4 + $0x60] sm:$0xff] %v1962_v22  ;;  %v1973_v40 = vmin.f32 %v1957_v48, 1.0  ;;  %v1974_v51 = vmin.f32 %v1958_v7, 1.0 }
 0x345   : > { %1979 = vst [vmem:[#allocation4 + $0x68] sm:$0xff] %v1963_v23  ;;  %1980 = vst [vmem:[#allocation4 + $0x18] sm:$0xff] %v1964_v32  ;;  %v1991_v61 = vmul.f32 %v1959_v33, %v1959_v33  ;;  %v1992_v59 = vmul.f32 %v1960_v52, %v1960_v52  ;;  %v1993_v53 = vmul.f32 %v1961_v18, %v1961_v18  ;;  %v4461_v42 = vld [vmem:[#allocation65_spill] sm:$0xff]  ;;  %v4462_v27 = vld [vmem:[#allocation67_spill] sm:$0xff] }
 0x346   : > { %1981 = vst [vmem:[#allocation4 + $0x10] sm:$0xff] %v1965_v55  ;;  %1982 = vst [vmem:[#allocation4 + $0x38] sm:$0xff] %v1966_v9  ;;  %v1994_v45 = vmul.f32 %v1962_v22, %v1962_v22  ;;  %v1995_v19 = vmul.f32 %v1963_v23, %v1963_v23  ;;  %v1996_v34 = vmul.f32 %v1964_v32, %v1964_v32  ;;  %v4463_v12 = vld [vmem:[#allocation68_spill] sm:$0xff]  ;;  %v4464_v48 = vld [vmem:[#allocation69_spill] sm:$0xff] }
 0x347   : > { %1983 = vst [vmem:[#allocation4 + $0x40] sm:$0xff] %v1967_v38  ;;  %1984 = vst [vmem:[#allocation4 + $0x28] sm:$0xff] %v1968_v26  ;;  %v1997_v62 = vmul.f32 %v1965_v55, %v1965_v55  ;;  %v1998_v41 = vmul.f32 %v1966_v9, %v1966_v9  ;;  %v1999_v49 = vmul.f32 %v1967_v38, %v1967_v38 }
 0x348   : > { %1985 = vst [vmem:[#allocation4 + $0x70] sm:$0xff] %v1969_v2  ;;  %1986 = vst [vmem:[#allocation4 + $0x20] sm:$0xff] %v1970_v50  ;;  %v2000_v56 = vmul.f32 %v1968_v26, %v1968_v26  ;;  %v2001_v63 = vmul.f32 %v1969_v2, %v1969_v2  ;;  %v2002_v47 = vmul.f32 %v1970_v50, %v1970_v50 }
 0x349   : > { %1987 = vst [vmem:[#allocation4 + $0x58] sm:$0xff] %v1971_v15  ;;  %1988 = vst [vmem:[#allocation4 + $0x30] sm:$0xff] %v1972_v54  ;;  %v2003_v8 = vmul.f32 %v1971_v15, %v1971_v15  ;;  %v2004_v10 = vmul.f32 %v1972_v54, %v1972_v54  ;;  %v2005_v3 = vmul.f32 %v1973_v40, %v1973_v40 }
 0x34a   : > { %1989 = vst [vmem:[#allocation4 + $0x50] sm:$0xff] %v1973_v40  ;;  %1990 = vst [vmem:[#allocation4 + $0x78] sm:$0xff] %v1974_v51  ;;  %v2006_v30 = vmul.f32 %v1974_v51, %v1974_v51  ;;  %v2007_v24 = vmul.f32 %v1991_v61, %v4449_v28  ;;  %v2008_v16 = vmul.f32 %v1992_v59, %v4450_v25 }
 0x34b   : > { %v2009_v46 = vmul.f32 %v1993_v53, %v4451_v4  ;;  %v2010_v60 = vmul.f32 %v1994_v45, %v4452_v21  ;;  %v2011_v20 = vmul.f32 %v1995_v19, %v4453_v39  ;;  %v2012_v58 = vmul.f32 %v1996_v34, %v4454_v29 }
 0x34c   : > { %v2013_v14 = vmul.f32 %v1997_v62, %v4455_v35  ;;  %v2014_v57 = vmul.f32 %v1998_v41, %v4456_v44  ;;  %v2015_v13 = vmul.f32 %v1999_v49, %v4457_v1  ;;  %v2016_v11 = vmul.f32 %v2000_v56, %v4458_v5  ;;  %2023 = vst [vmem:[%s3032_s27] sm:$0xff] %v2007_v24 }
 0x34d   : > { %2024 = vst [vmem:[%s3032_s27 + $0x8] sm:$0xff] %v2008_v16  ;;  %v2017_v0 = vmul.f32 %v2001_v63, %v4459_v37  ;;  %v2018_v31 = vmul.f32 %v2002_v47, %v4460_v17  ;;  %v2019_v36 = vmul.f32 %v2003_v8, %v4461_v42  ;;  %v2020_v6 = vmul.f32 %v2004_v10, %v4462_v27 }
 0x34e   : > { %2025 = vst [vmem:[%s3032_s27 + $0x10] sm:$0xff] %v2009_v46  ;;  %2026 = vst [vmem:[%s3032_s27 + $0x18] sm:$0xff] %v2010_v60  ;;  %v2021_v43 = vmul.f32 %v2005_v3, %v4463_v12  ;;  %v2022_v7 = vmul.f32 %v2006_v30, %v4464_v48 }
 0x34f   : > { %2027 = vst [vmem:[%s3032_s27 + $0x20] sm:$0xff] %v2011_v20  ;;  %2028 = vst [vmem:[%s3032_s27 + $0x28] sm:$0xff] %v2012_v58 }
 0x350   : > { %2029 = vst [vmem:[%s3032_s27 + $0x30] sm:$0xff] %v2013_v14  ;;  %2030 = vst [vmem:[%s3032_s27 + $0x38] sm:$0xff] %v2014_v57  ;;  %2042 = sbr.rel (%p2449_p0) target bundleno = 1028 (0x404), region = 70 }
 0x351   : > { %2031 = vst [vmem:[%s3032_s27 + $0x40] sm:$0xff] %v2015_v13  ;;  %2032 = vst [vmem:[%s3032_s27 + $0x48] sm:$0xff] %v2016_v11 }
 0x352   : > { %2033 = vst [vmem:[%s3032_s27 + $0x50] sm:$0xff] %v2017_v0  ;;  %2034 = vst [vmem:[%s3032_s27 + $0x58] sm:$0xff] %v2018_v31 }
 0x353   : > { %2035 = vst [vmem:[%s3032_s27 + $0x60] sm:$0xff] %v2019_v36  ;;  %2036 = vst [vmem:[%s3032_s27 + $0x68] sm:$0xff] %v2020_v6 }
 0x354   : > { %2037 = vst [vmem:[%s3032_s27 + $0x70] sm:$0xff] %v2021_v43  ;;  %2038 = vst [vmem:[%s3032_s27 + $0x78] sm:$0xff] %v2022_v7 }
 0x355   : > { %2047 = vadd.xlane.f32.xlu1 %v2009_v46  ;;  %2043 = vadd.xlane.f32.xlu0 %v2007_v24  ;;  %vm2075_vm1 = vcmask 7168   ;;  %v4166_v23 = vstv %s3907_s9  ;;  %v4465_v54 = vld [vmem:[#allocation38_spill] sm:$0xff]  ;;  %v4466_v51 = vld [vmem:[#allocation37_spill] sm:$0xff]  ;;  %v4467_v56 = vld [vmem:[#allocation40_spill] sm:$0xff] }
 0x356   : > { %v4468_v47 = vld [vmem:[#allocation39_spill] sm:$0xff]  ;;  %v4469_v46 = vld [vmem:[#allocation42_spill] sm:$0xff] }
 0x359   : > { %2049 = vadd.xlane.f32.xlu1 %v2010_v60  ;;  %2045 = vadd.xlane.f32.xlu0 %v2008_v16  ;;  %v4470_v60 = vld [vmem:[#allocation41_spill] sm:$0xff] }
 0x35d   : > { %2053 = vadd.xlane.f32.xlu1 %v2012_v58  ;;  %2051 = vadd.xlane.f32.xlu0 %v2011_v20 }
 0x361   : > { %2057 = vadd.xlane.f32.xlu1 %v2014_v57  ;;  %2055 = vadd.xlane.f32.xlu0 %v2013_v14 }
 0x365   : > { %2061 = vadd.xlane.f32.xlu1 %v2016_v11  ;;  %2059 = vadd.xlane.f32.xlu0 %v2015_v13  ;;  %v4471_v13 = vld [vmem:[#allocation44_spill] sm:$0xff]  ;;  %v4472_v11 = vld [vmem:[#allocation43_spill] sm:$0xff] }
 0x369   : > { %2065 = vadd.xlane.f32.xlu1 %v2018_v31  ;;  %2063 = vadd.xlane.f32.xlu0 %v2017_v0 }
 0x36d   : > { %2069 = vadd.xlane.f32.xlu1 %v2020_v6  ;;  %2067 = vadd.xlane.f32.xlu0 %v2019_v36 }
 0x371   : > { %2073 = vadd.xlane.f32.xlu1 %v2022_v7  ;;  %2071 = vadd.xlane.f32.xlu0 %v2021_v43  ;;  %v4473_v43 = vld [vmem:[#allocation46_spill] sm:$0xff]  ;;  %v4474_v7 = vld [vmem:[#allocation45_spill] sm:$0xff] }
 0x3de   : > { %v2048_v33 = vpop.xlane.xlu1 %2047  ;;  %v2044_v52 = vpop.xlane.xlu0 %2043 }
 0x3df   : > { %2078 = vst.msk [vmem:[#allocation6 + $0x10] sm:$0xff] %vm2075_vm1, %v2048_v33  ;;  %v2452_v18 = vadd.f32 -1.0, %v2048_v33  ;;  %2076 = vst.msk [vmem:[#allocation6] sm:$0xff] %vm2075_vm1, %v2044_v52  ;;  %v2450_v22 = vadd.f32 -1.0, %v2044_v52 }
 0x3e1   : > { %v2110_v32 = vmax.f32 %v2452_v18, 0.0  ;;  %v2108_v55 = vmax.f32 %v2450_v22, 0.0 }
 0x3e2   : > { %v2050_v9 = vpop.xlane.xlu1 %2049  ;;  %v2046_v38 = vpop.xlane.xlu0 %2045 }
 0x3e3   : > { %v2127_v26 = vmul.f32 %v4166_v23, %v2110_v32  ;;  %v2125_v2 = vmul.f32 %v4166_v23, %v2108_v55  ;;  %2079 = vst.msk [vmem:[#allocation6 + $0x18] sm:$0xff] %vm2075_vm1, %v2050_v9  ;;  %v2453_v50 = vadd.f32 -1.0, %v2050_v9  ;;  %2077 = vst.msk [vmem:[#allocation6 + $0x8] sm:$0xff] %vm2075_vm1, %v2046_v38  ;;  %v2451_v15 = vadd.f32 -1.0, %v2046_v38 }
 0x3e5   : > { %v2143_v40 = vadd.f32 %v2127_v26, %v4465_v54  ;;  %v2141_v61 = vadd.f32 %v2125_v2, %v4466_v51  ;;  %v2111_v59 = vmax.f32 %v2453_v50, 0.0  ;;  %v2109_v53 = vmax.f32 %v2451_v15, 0.0  ;;  %v4475_v2 = vld [vmem:[#allocation48_spill] sm:$0xff]  ;;  %v4476_v15 = vld [vmem:[#allocation47_spill] sm:$0xff] }
 0x3e6   : > { %v2054_v45 = vpop.xlane.xlu1 %2053  ;;  %v2052_v19 = vpop.xlane.xlu0 %2051 }
 0x3e7   : > { %2159 = vst.msk [vmem:[#allocation5 + $0x10] sm:$0xff] %vm2075_vm1, %v2143_v40  ;;  %2157 = vst.msk [vmem:[#allocation5] sm:$0xff] %vm2075_vm1, %v2141_v61  ;;  %v2128_v34 = vmul.f32 %v4166_v23, %v2111_v59  ;;  %v2126_v62 = vmul.f32 %v4166_v23, %v2109_v53  ;;  %v2455_v41 = vadd.f32 -1.0, %v2054_v45  ;;  %v2454_v49 = vadd.f32 -1.0, %v2052_v19 }
 0x3e8   : > { %2081 = vst.msk [vmem:[#allocation6 + $0x28] sm:$0xff] %vm2075_vm1, %v2054_v45  ;;  %2080 = vst.msk [vmem:[#allocation6 + $0x20] sm:$0xff] %vm2075_vm1, %v2052_v19 }
 0x3e9   : > { %v2144_v63 = vadd.f32 %v2128_v34, %v4467_v56  ;;  %v2142_v8 = vadd.f32 %v2126_v62, %v4468_v47  ;;  %v2113_v10 = vmax.f32 %v2455_v41, 0.0  ;;  %v2112_v3 = vmax.f32 %v2454_v49, 0.0  ;;  %v4477_v62 = vld [vmem:[#allocation50_spill] sm:$0xff]  ;;  %v4478_v49 = vld [vmem:[#allocation49_spill] sm:$0xff] }
 0x3ea   : > { %v2058_v30 = vpop.xlane.xlu1 %2057  ;;  %v2056_v28 = vpop.xlane.xlu0 %2055 }
 0x3eb   : > { %2160 = vst.msk [vmem:[#allocation5 + $0x18] sm:$0xff] %vm2075_vm1, %v2144_v63  ;;  %2158 = vst.msk [vmem:[#allocation5 + $0x8] sm:$0xff] %vm2075_vm1, %v2142_v8  ;;  %v2130_v24 = vmul.f32 %v4166_v23, %v2113_v10  ;;  %v2129_v25 = vmul.f32 %v4166_v23, %v2112_v3  ;;  %v2457_v16 = vadd.f32 -1.0, %v2058_v30  ;;  %v2456_v4 = vadd.f32 -1.0, %v2056_v28  ;;  %v4479_v3 = vld [vmem:[#allocation52_spill] sm:$0xff] }
 0x3ec   : > { %2083 = vst.msk [vmem:[#allocation6 + $0x38] sm:$0xff] %vm2075_vm1, %v2058_v30  ;;  %2082 = vst.msk [vmem:[#allocation6 + $0x30] sm:$0xff] %vm2075_vm1, %v2056_v28  ;;  %v4480_v28 = vld [vmem:[#allocation51_spill] sm:$0xff] }
 0x3ed   : > { %v2146_v21 = vadd.f32 %v2130_v24, %v4469_v46  ;;  %v2145_v39 = vadd.f32 %v2129_v25, %v4470_v60  ;;  %v2115_v20 = vmax.f32 %v2457_v16, 0.0  ;;  %v2114_v29 = vmax.f32 %v2456_v4, 0.0 }
 0x3ee   : > { %v2062_v58 = vpop.xlane.xlu1 %2061  ;;  %v2060_v35 = vpop.xlane.xlu0 %2059 }
 0x3ef   : > { %2162 = vst.msk [vmem:[#allocation5 + $0x28] sm:$0xff] %vm2075_vm1, %v2146_v21  ;;  %2161 = vst.msk [vmem:[#allocation5 + $0x20] sm:$0xff] %vm2075_vm1, %v2145_v39  ;;  %v2132_v14 = vmul.f32 %v4166_v23, %v2115_v20  ;;  %v2131_v44 = vmul.f32 %v4166_v23, %v2114_v29  ;;  %v2459_v57 = vadd.f32 -1.0, %v2062_v58  ;;  %v2458_v1 = vadd.f32 -1.0, %v2060_v35 }
 0x3f0   : > { %2085 = vst.msk [vmem:[#allocation6 + $0x48] sm:$0xff] %vm2075_vm1, %v2062_v58  ;;  %2084 = vst.msk [vmem:[#allocation6 + $0x40] sm:$0xff] %vm2075_vm1, %v2060_v35 }
 0x3f1   : > { %v2148_v5 = vadd.f32 %v2132_v14, %v4471_v13  ;;  %v2147_v37 = vadd.f32 %v2131_v44, %v4472_v11  ;;  %v2117_v0 = vmax.f32 %v2459_v57, 0.0  ;;  %v2116_v17 = vmax.f32 %v2458_v1, 0.0 }
 0x3f2   : > { %v2066_v31 = vpop.xlane.xlu1 %2065  ;;  %v2064_v42 = vpop.xlane.xlu0 %2063 }
 0x3f3   : > { %2164 = vst.msk [vmem:[#allocation5 + $0x38] sm:$0xff] %vm2075_vm1, %v2148_v5  ;;  %2163 = vst.msk [vmem:[#allocation5 + $0x30] sm:$0xff] %vm2075_vm1, %v2147_v37  ;;  %v2134_v36 = vmul.f32 %v4166_v23, %v2117_v0  ;;  %v2133_v27 = vmul.f32 %v4166_v23, %v2116_v17  ;;  %v2461_v6 = vadd.f32 -1.0, %v2066_v31  ;;  %v2460_v12 = vadd.f32 -1.0, %v2064_v42 }
 0x3f4   : > { %2087 = vst.msk [vmem:[#allocation6 + $0x58] sm:$0xff] %vm2075_vm1, %v2066_v31  ;;  %2086 = vst.msk [vmem:[#allocation6 + $0x50] sm:$0xff] %vm2075_vm1, %v2064_v42 }
 0x3f5   : > { %v2150_v48 = vadd.f32 %v2134_v36, %v4473_v43  ;;  %v2149_v33 = vadd.f32 %v2133_v27, %v4474_v7  ;;  %v2119_v52 = vmax.f32 %v2461_v6, 0.0  ;;  %v2118_v18 = vmax.f32 %v2460_v12, 0.0 }
 0x3f6   : > { %v2070_v22 = vpop.xlane.xlu1 %2069  ;;  %v2068_v32 = vpop.xlane.xlu0 %2067 }
 0x3f7   : > { %2166 = vst.msk [vmem:[#allocation5 + $0x48] sm:$0xff] %vm2075_vm1, %v2150_v48  ;;  %2165 = vst.msk [vmem:[#allocation5 + $0x40] sm:$0xff] %vm2075_vm1, %v2149_v33  ;;  %v2136_v55 = vmul.f32 %v4166_v23, %v2119_v52  ;;  %v2135_v9 = vmul.f32 %v4166_v23, %v2118_v18  ;;  %v2463_v38 = vadd.f32 -1.0, %v2070_v22  ;;  %v2462_v26 = vadd.f32 -1.0, %v2068_v32 }
 0x3f8   : > { %2089 = vst.msk [vmem:[#allocation6 + $0x68] sm:$0xff] %vm2075_vm1, %v2070_v22  ;;  %2088 = vst.msk [vmem:[#allocation6 + $0x60] sm:$0xff] %vm2075_vm1, %v2068_v32 }
 0x3f9   : > { %v2152_v50 = vadd.f32 %v2136_v55, %v4475_v2  ;;  %v2151_v54 = vadd.f32 %v2135_v9, %v4476_v15  ;;  %v2121_v40 = vmax.f32 %v2463_v38, 0.0  ;;  %v2120_v51 = vmax.f32 %v2462_v26, 0.0 }
 0x3fa   : > { %v2074_v61 = vpop.xlane.xlu1 %2073  ;;  %v2072_v59 = vpop.xlane.xlu0 %2071 }
 0x3fb   : > { %2168 = vst.msk [vmem:[#allocation5 + $0x58] sm:$0xff] %vm2075_vm1, %v2152_v50  ;;  %2167 = vst.msk [vmem:[#allocation5 + $0x50] sm:$0xff] %vm2075_vm1, %v2151_v54  ;;  %v2138_v53 = vmul.f32 %v4166_v23, %v2121_v40  ;;  %v2137_v45 = vmul.f32 %v4166_v23, %v2120_v51  ;;  %v2465_v19 = vadd.f32 -1.0, %v2074_v61  ;;  %v2464_v34 = vadd.f32 -1.0, %v2072_v59 }
 0x3fc   : > { %2091 = vst.msk [vmem:[#allocation6 + $0x78] sm:$0xff] %vm2075_vm1, %v2074_v61  ;;  %2090 = vst.msk [vmem:[#allocation6 + $0x70] sm:$0xff] %vm2075_vm1, %v2072_v59 }
 0x3fd   : > { %v2154_v41 = vadd.f32 %v2138_v53, %v4477_v62  ;;  %v2153_v56 = vadd.f32 %v2137_v45, %v4478_v49  ;;  %v2123_v63 = vmax.f32 %v2465_v19, 0.0  ;;  %v2122_v47 = vmax.f32 %v2464_v34, 0.0 }
 0x3ff   : > { %2170 = vst.msk [vmem:[#allocation5 + $0x68] sm:$0xff] %vm2075_vm1, %v2154_v41  ;;  %2169 = vst.msk [vmem:[#allocation5 + $0x60] sm:$0xff] %vm2075_vm1, %v2153_v56  ;;  %v2140_v8 = vmul.f32 %v4166_v23, %v2123_v63  ;;  %v2139_v10 = vmul.f32 %v4166_v23, %v2122_v47 }
 0x401   : > { %v2156_v30 = vadd.f32 %v2140_v8, %v4479_v3  ;;  %v2155_v24 = vadd.f32 %v2139_v10, %v4480_v28 }
 0x403   : > { %2172 = vst.msk [vmem:[#allocation5 + $0x78] sm:$0xff] %vm2075_vm1, %v2156_v30  ;;  %2171 = vst.msk [vmem:[#allocation5 + $0x70] sm:$0xff] %vm2075_vm1, %v2155_v24 }
 0x404 PF: > { %s2467_s11 = sshll.u32 %s2902_s16, 4  ;;  %s2468_s20 = sshll.u32 %s2898_s15, 5 }
 0x405   : > { %s2189_s21 = sshll.u32 %s3032_s27, 4  ;;  %s2186_s24 = sadd.s32 %s2468_s20, %s2467_s11  ;;  %s4233_s21 = int_to_ptr.vmem [resolvable:$true] %s2189_s21 }
 0x406   : > { %s2469_s28 = sshll.u32 %s2186_s24, 7  ;;  %s4481_s5 = sand.u32 1, %s2890_s13  }
 0x407   : > { %s4238_s4 = scalar_lea.hbm %s4296_s3, %s2469_s28  ;;  %s4242_s7 = scalar_lea.sflag [#allocation10], %s4481_s5 }
 0x408   : > { %s2820_s8 = scalar_lea.vmem %s4233_s21, 2048  ;;  %s2923_s15 = smov [#allocation9]  }
 0x409   : > { %p2821_p1 = scmp.ne.s32.totalorder %s4233_s21, %s2820_s8  ;;  %s2824_s16 = sshll.u32 %s2923_s15, 4  ;;  %s2825_s16 = int_to_ptr.vmem [resolvable:$false] %s2824_s16 }
 0x40a   : > { %s2826_s27 = scalar_lea.vmem %s2825_s16, 4096  ;;  %p2827_p5 = scmp.lt.s32.totalorder %s4233_s21, %s2825_s16 }
 0x40b   : > { %p2822_p2 = pnand %p2821_p1, %p2997_p3  ;;  %p2828_p6 = scmp.lt.s32.totalorder %s2826_s27, %s2820_s8 }
 0x40d   : > { %p2823_p4 = pneg %p2822_p2  ;;  %p2829_p7 = por %p2828_p6, %p2827_p5 }
 0x40f   : > { %p2830_p9 = pnand %p2829_p7, %p2823_p4 }
 0x411   : > { %2833 = shalt.err (!%p2830_p9)
}
 0x412   : > { %s2834_s9 = scalar_lea.hbm %s4238_s4, 2048  ;;  %s2838_s20 = scalar_lea.hbm %s4296_s3, 16384 }
 0x413   : > { %p2835_p10 = scmp.ne.s32.totalorder %s4238_s4, %s2834_s9  ;;  %p2839_p13 = scmp.lt.s32.totalorder %s4238_s4, %s4296_s3 }
 0x414   : > { %p2840_p0 = scmp.lt.s32.totalorder %s2838_s20, %s2834_s9 }
 0x415   : > { %p2836_p11 = pnand %p2835_p10, %p2997_p3 }
 0x416   : > { %p2841_p1 = por %p2840_p0, %p2839_p13 }
 0x417   : > { %p2837_p12 = pneg %p2836_p11 }
 0x419   : > { %p2842_p2 = pnand %p2841_p1, %p2837_p12 }
 0x41b   : > { %2845 = shalt.err (!%p2842_p2)
}
 0x41c   : > { %s2924_s29 = smov 128   ;;  %s2925_s6 = smov 8  }
 0x41d   : > { %2474 = dma.vmem_to_hbm [thread:$0]  (%p2997_p3), %s4233_s21, 2048, %s4238_s4, %s4242_s7, %s2924_s29, %s2924_s29, %s2925_s6  }
 0x41e PF: > { %p2480_p4 = scmp.ge.s32.totalorder %s2914_s19, 2  ;;  %s2204_s5 = sand.u32 1, %s2886_s12  }
 0x41f   : > { %s2205_s8 = scalar_lea.sflag [#allocation10], %s2204_s5 }
 0x420   : > { %p2477_p5 = pnand %p2480_p4, %p3006_p8 }
 0x422   : > { %p2478_p6 = pneg %p2477_p5 }
 0x424   : > { %2881 = dma.done.wait (%p2478_p6), %s2205_s8, 2048  }
 0x425   : > { %2883 = vsyncadd (%p2478_p6), %s2205_s8, 4294965248  ;;  %s16_s19 = sadd.s32 1, %s2914_s19   ;;  %s4482_s12 = smov %s2890_s13 }
 0x426   : > { %p13_p7 = scmp.ge.s32.totalorder %s16_s19, 10   ;;  %s4483_s13 = smov %s2894_s14 }
 0x427   : > { %s4484_s14 = smov %s3015_s30  ;;  %s4485_s15 = smov %s2906_s17 }
 0x428   : > { %s4486_s16 = smov %s2910_s18  ;;  %s4487_s17 = smov %s4490_s22 }
 0x429   : > { %s4488_s18 = smov %s4494_s23  ;;  %15 = sbr.rel (!%p13_p7) target bundleno = 5 (0x5), region = 121 }
 0x42e   :  { %2210 = vsyncpa [#allocation10], 1 }
 0x42f   :  { %2212 = vsyncpa [#allocation10 + $0x1], 1 }
 0x430   :  { %2213 = vsyncmov [#allocation8] }
 0x433   :  { %s2214_s25 = vpop.sfrf %2213 }
 0x434   :  { %p2472_p3 = scmp.ne.s32.totalorder %s2214_s25, 0 }
 0x436   :  { %2218 = shalt.err (%p2472_p3)  }

</bundles_post_ra>
